<compile_context>
chip_gen: v6e
topology: v6e:2x2x1
jax: 0.10.0
libtpu: 0.0.40
codegen_flags: <defaults>
</compile_context>

<pallas_src>
import math
import numpy as np
import jax
import jax.numpy as jnp
from jax import lax
from jax.experimental import pallas as pl
from jax.experimental.pallas import tpu as pltpu


def _round_up(x, m):
    return (x + m - 1) // m * m


_VMEM_SPEC = pl.BlockSpec(memory_space=pltpu.MemorySpace.VMEM)


def _vmem_cap_bytes():
    """Per-chip VMEM ceiling (85% of physical, leaving compiler headroom)."""
    phys = 64 * 1024 * 1024          # conservative fallback (v7x per-TC)
    try:
        info = pltpu.get_tpu_info()
        phys = int(getattr(info, "vmem_capacity_bytes", phys))
    except Exception:
        pass
    return int(phys * 0.85)


# ---------------------------------------------------------------------------
# Fused decoder kernel factory
# ---------------------------------------------------------------------------

def _make_decoder_kernel(L, T, Bp, Hp):
    """Builds the fused kernel for L GRU layers + FC head.

    Ref layout (all VMEM, single program, no grid):
      inputs : x2d (T*Bp, D0p) bf16, h0 (L, Bp, Hp) f32,
               per layer: wih (Din_p, 3Hp) bf16, whh (Hp, 3Hp) bf16,
                          b_all (1, 3Hp) f32  [= b_ir+b_hr | b_iz+b_hz | b_in],
                          b_hn  (1, Hp)  f32,
               wfc (Hp, Op) bf16, bfc (1, Op) f32
      outputs: pred (T*Bp, Op) f32, hT (L, Bp, Hp) f32
      scratch: gx (T*Bp, 3Hp) f32, act_a (T*Bp, Hp) f32, act_b (T*Bp, Hp) f32
    """
    # Shape-aware unroll: full unroll only when code size / vreg pressure is
    # small; cap it for large Hp so spills don't hit the vld/vst slots.
    if Hp <= 256:
        unroll = True if T <= 32 else 8
    elif Hp <= 512:
        unroll = max(1, min(T, 4))
    else:
        unroll = max(1, min(T, 2))

    def kernel(*refs):
        x_ref, h0_ref = refs[0], refs[1]
        layer_refs = [refs[2 + 4 * l: 2 + 4 * (l + 1)] for l in range(L)]
        wfc_ref, bfc_ref = refs[2 + 4 * L], refs[3 + 4 * L]
        pred_ref, hT_ref = refs[4 + 4 * L], refs[5 + 4 * L]
        gx_ref, act_a, act_b = refs[6 + 4 * L], refs[7 + 4 * L], refs[8 + 4 * L]

        bufs = (act_a, act_b)

        for l in range(L):
            wih_ref, whh_ref, ball_ref, bhn_ref = layer_refs[l]
            in_ref = x_ref if l == 0 else bufs[(l - 1) % 2]
            out_ref = bufs[l % 2]

            # --- Batched input projection for ALL timesteps (off the serial
            # --- critical path).  bf16 operands, f32 accumulation; the
            # --- input-side biases are folded in here.
            gx_ref[...] = (jnp.dot(in_ref[...].astype(jnp.bfloat16),
                                   wih_ref[...],
                                   preferred_element_type=jnp.float32)
                           + ball_ref[...])

            # Hoist the per-step bias broadcast out of the loop (f32).
            b_hn_b = jnp.broadcast_to(bhn_ref[...], (Bp, Hp))
            h_init = h0_ref[l]                       # (Bp, Hp) f32

            def step(t, h_prev):
                row = pl.multiple_of(t * Bp, Bp)     # 8-aligned sublane offset
                gx_t = gx_ref[pl.ds(row, Bp), :]     # (Bp, 3Hp) f32
                # bf16 x bf16 matmul on the MXU, f32 accumulation.
                gh = jnp.dot(h_prev.astype(jnp.bfloat16), whh_ref[...],
                             preferred_element_type=jnp.float32)  # (Bp, 3Hp)
                # Gate math kept in f32 (v5e VPU/EUP have no bf16 path).
                rz = jax.nn.sigmoid(gx_t[:, :2 * Hp] + gh[:, :2 * Hp])
                r = rz[:, :Hp]
                z = rz[:, Hp:]
                n = jnp.tanh(gx_t[:, 2 * Hp:] + r * (gh[:, 2 * Hp:] + b_hn_b))
                h_new = n + z * (h_prev - n)         # == (1-z)*n + z*h
                out_ref[pl.ds(row, Bp), :] = h_new
                return h_new

            hT = lax.fori_loop(0, T, step, h_init, unroll=unroll)
            hT_ref[l] = hT

        # --- FC head fused as epilogue on the last layer's (lane-dense) output.
        last = bufs[(L - 1) % 2]
        pred_ref[...] = (jnp.dot(last[...].astype(jnp.bfloat16), wfc_ref[...],
                                 preferred_element_type=jnp.float32)
                         + bfc_ref[...])

    return kernel


# ---------------------------------------------------------------------------
# Decoder module (parameter container + forward)
# ---------------------------------------------------------------------------

class DecoderPallas:
    def __init__(self, input_size=7, hidden_size=400, output_size=4,
                 num_layers=4, key=None):
        self.input_size = input_size
        self.hidden_size = hidden_size
        self.output_size = output_size
        self.num_layers = num_layers

        self.Hp = _round_up(hidden_size, 128)
        self.Op = _round_up(output_size, 128)
        self.D0p = _round_up(input_size, 128)

        if key is None:
            key = jax.random.PRNGKey(0)
        k = 1.0 / math.sqrt(hidden_size)

        # --- raw (PyTorch-layout) parameters, kept for the reference check ---
        self.w_ih, self.w_hh, self.b_ih, self.b_hh = [], [], [], []
        for layer in range(num_layers):
            d_in = input_size if layer == 0 else hidden_size
            key, k1, k2, k3, k4 = jax.random.split(key, 5)
            self.w_ih.append(jax.random.uniform(
                k1, (3 * hidden_size, d_in), jnp.float32, -k, k))
            self.w_hh.append(jax.random.uniform(
                k2, (3 * hidden_size, hidden_size), jnp.float32, -k, k))
            self.b_ih.append(jax.random.uniform(
                k3, (3 * hidden_size,), jnp.float32, -k, k))
            self.b_hh.append(jax.random.uniform(
                k4, (3 * hidden_size,), jnp.float32, -k, k))

        key, kf1, kf2 = jax.random.split(key, 3)
        self.w_fc = jax.random.uniform(
            kf1, (output_size, hidden_size), jnp.float32, -k, k)
        self.b_fc = jax.random.uniform(
            kf2, (output_size,), jnp.float32, -k, k)

        # --- pack weights ONCE: transposed, per-gate split, lane-padded,
        # --- input-side biases combined; matmul weights stored as bf16
        # --- (native MXU dtype on v5e/v6e/v7x, halves weight VMEM + per-step
        # --- load traffic); biases kept f32.
        H, Hp = hidden_size, self.Hp
        self.wih_p, self.whh_p, self.ball_p, self.bhn_p = [], [], [], []
        for layer in range(num_layers):
            d_in = input_size if layer == 0 else hidden_size
            d_in_p = self.D0p if layer == 0 else Hp
            wih = np.asarray(self.w_ih[layer])
            whh = np.asarray(self.w_hh[layer])
            bih = np.asarray(self.b_ih[layer])
            bhh = np.asarray(self.b_hh[layer])

            wih_p = np.zeros((d_in_p, 3 * Hp), np.float32)
            whh_p = np.zeros((Hp, 3 * Hp), np.float32)
            ball = np.zeros((1, 3 * Hp), np.float32)
            bhn = np.zeros((1, Hp), np.float32)
            for g in range(3):
                wih_p[:d_in, g * Hp:g * Hp + H] = wih[g * H:(g + 1) * H, :].T
                whh_p[:H, g * Hp:g * Hp + H] = whh[g * H:(g + 1) * H, :].T
            ball[0, 0 * Hp:0 * Hp + H] = bih[0:H] + bhh[0:H]           # r
            ball[0, 1 * Hp:1 * Hp + H] = bih[H:2 * H] + bhh[H:2 * H]   # z
            ball[0, 2 * Hp:2 * Hp + H] = bih[2 * H:3 * H]              # n (input side)
            bhn[0, :H] = bhh[2 * H:3 * H]                              # n (hidden side)

            self.wih_p.append(jnp.asarray(wih_p, dtype=jnp.bfloat16))
            self.whh_p.append(jnp.asarray(whh_p, dtype=jnp.bfloat16))
            self.ball_p.append(jnp.asarray(ball))
            self.bhn_p.append(jnp.asarray(bhn))

        wfc_p = np.zeros((Hp, self.Op), np.float32)
        wfc_p[:H, :output_size] = np.asarray(self.w_fc).T
        bfc_p = np.zeros((1, self.Op), np.float32)
        bfc_p[0, :output_size] = np.asarray(self.b_fc)
        self.wfc_p = jnp.asarray(wfc_p, dtype=jnp.bfloat16)
        self.bfc_p = jnp.asarray(bfc_p)

    # -----------------------------------------------------------------
    def __call__(self, x, hidden, lengths=None):
        """x: (B, T, input_size), hidden: (num_layers, B, hidden_size)."""
        assert lengths is None  # TODO(synk): packed-sequence path unsupported
        B, T, D = x.shape
        L, H, Hp, Op = self.num_layers, self.hidden_size, self.Hp, self.Op
        Bp = _round_up(B, 8)
        n_rows = T * Bp

        # Time-major, batch/lane padded inputs (pad lanes must be ZERO so the
        # padded hidden lanes stay zero through the recurrence).  x is passed
        # as bf16 (matmul-operand dtype); h0 stays f32.
        x_tm = jnp.transpose(x, (1, 0, 2)).astype(jnp.bfloat16)      # (T,B,D)
        x_pad = jnp.zeros((T, Bp, self.D0p), jnp.bfloat16).at[:, :B, :D].set(x_tm)
        x2d = x_pad.reshape(n_rows, self.D0p)
        h0_pad = jnp.zeros((L, Bp, Hp), jnp.float32).at[:, :B, :H].set(
            hidden.astype(jnp.float32))

        inputs = [x2d, h0_pad]
        for l in range(L):
            inputs += [self.wih_p[l], self.whh_p[l], self.ball_p[l], self.bhn_p[l]]
        inputs += [self.wfc_p, self.bfc_p]

        # Per-chip VMEM budget: 2x the resident estimate, at least 32 MiB
        # (v5e scoped default is only 16 MiB), capped at ~85% of physical
        # VMEM (v5e/v6e 128 MiB, v7x 64 MiB per TensorCore).
        def nbytes(a):
            return int(np.prod(a.shape)) * jnp.dtype(a.dtype).itemsize
        est = (sum(nbytes(a) for a in inputs)
               + 4 * (n_rows * Op + L * Bp * Hp)            # f32 outputs
               + 4 * n_rows * (3 * Hp + 2 * Hp))             # f32 scratch
        vmem_limit = int(min(_vmem_cap_bytes(),
                             max(2 * est, 32 * 1024 * 1024)))

        kernel = _make_decoder_kernel(L, T, Bp, Hp)
        pred_pad, hT_pad = pl.pallas_call(
            kernel,
            out_shape=(jax.ShapeDtypeStruct((n_rows, Op), jnp.float32),
                       jax.ShapeDtypeStruct((L, Bp, Hp), jnp.float32)),
            in_specs=[_VMEM_SPEC] * len(inputs),
            out_specs=(_VMEM_SPEC, _VMEM_SPEC),
            scratch_shapes=[pltpu.VMEM((n_rows, 3 * Hp), jnp.float32),
                            pltpu.VMEM((n_rows, Hp), jnp.float32),
                            pltpu.VMEM((n_rows, Hp), jnp.float32)],
            compiler_params=pltpu.CompilerParams(vmem_limit_bytes=vmem_limit),
        )(*inputs)

        prediction = (pred_pad.reshape(T, Bp, Op)[:, :B, :self.output_size]
                      .transpose(1, 0, 2))                       # (B, T, O)
        hidden_out = hT_pad[:, :B, :H]                           # (L, B, H)
        return prediction, hidden_out


# ---------------------------------------------------------------------------
# Pure-JAX reference (for a correctness check)
# ---------------------------------------------------------------------------

def _reference_forward(dec: DecoderPallas, x, hidden):
    H = dec.hidden_size
    inp = jnp.transpose(x, (1, 0, 2))
    h_finals = []
    for layer in range(dec.num_layers):
        wih, whh = dec.w_ih[layer], dec.w_hh[layer]
        bih, bhh = dec.b_ih[layer], dec.b_hh[layer]

        def step(h, x_t):
            gx = x_t @ wih.T + bih
            gh = h @ whh.T + bhh
            r = jax.nn.sigmoid(gx[:, :H] + gh[:, :H])
            z = jax.nn.sigmoid(gx[:, H:2 * H] + gh[:, H:2 * H])
            n = jnp.tanh(gx[:, 2 * H:] + r * gh[:, 2 * H:])
            h_new = (1.0 - z) * n + z * h
            return h_new, h_new

        hT, ys = lax.scan(step, hidden[layer], inp)
        h_finals.append(hT)
        inp = ys
    pred = inp @ dec.w_fc.T + dec.b_fc
    return jnp.transpose(pred, (1, 0, 2)), jnp.stack(h_finals, axis=0)


# ---------------------------------------------------------------------------
# Main
# ---------------------------------------------------------------------------

if __name__ == "__main__":
    B, T = 2, 8
    INPUT, HIDDEN, OUTPUT, LAYERS = 7, 32, 4, 2

    key = jax.random.PRNGKey(0)
    k_model, k_x, k_h = jax.random.split(key, 3)

    dec = DecoderPallas(input_size=INPUT, hidden_size=HIDDEN,
                        output_size=OUTPUT, num_layers=LAYERS, key=k_model)

    x = jax.random.normal(k_x, (B, T, INPUT), jnp.float32)
    hidden = jax.random.normal(k_h, (LAYERS, B, HIDDEN), jnp.float32)

    prediction, hidden_out = dec(x, hidden)
    jax.block_until_ready(prediction)
    jax.block_until_ready(hidden_out)

    assert prediction.shape == (B, T, OUTPUT)
    assert hidden_out.shape == (LAYERS, B, HIDDEN)

    # Verify against a pure-f32 JAX reference.  Tolerance is relaxed vs. the
    # previous all-f32 kernel because the matmul operands are now bf16 (with
    # f32 accumulation); the recurrence compounds the operand rounding.
    ref_pred, ref_hidden = _reference_forward(dec, x, hidden)
    np.testing.assert_allclose(np.asarray(prediction), np.asarray(ref_pred),
                               rtol=2e-2, atol=2e-2)
    np.testing.assert_allclose(np.asarray(hidden_out), np.asarray(ref_hidden),
                               rtol=2e-2, atol=2e-2)

    print("KERNEL_OK")
</pallas_src>

<mosaic_0001>
module attributes {stable_mosaic.version = 11 : i64} {
  func.func @kernel(%arg0: memref<64x128xbf16, #tpu.memory_space<vmem>>, %arg1: memref<2x8x128xf32, #tpu.memory_space<vmem>>, %arg2: memref<128x384xbf16, #tpu.memory_space<vmem>>, %arg3: memref<128x384xbf16, #tpu.memory_space<vmem>>, %arg4: memref<1x384xf32, #tpu.memory_space<vmem>>, %arg5: memref<1x128xf32, #tpu.memory_space<vmem>>, %arg6: memref<128x384xbf16, #tpu.memory_space<vmem>>, %arg7: memref<128x384xbf16, #tpu.memory_space<vmem>>, %arg8: memref<1x384xf32, #tpu.memory_space<vmem>>, %arg9: memref<1x128xf32, #tpu.memory_space<vmem>>, %arg10: memref<128x128xbf16, #tpu.memory_space<vmem>>, %arg11: memref<1x128xf32, #tpu.memory_space<vmem>>, %arg12: memref<64x128xf32, #tpu.memory_space<vmem>>, %arg13: memref<2x8x128xf32, #tpu.memory_space<vmem>>, %arg14: memref<64x384xf32, #tpu.memory_space<vmem>>, %arg15: memref<64x128xf32, #tpu.memory_space<vmem>>, %arg16: memref<64x128xf32, #tpu.memory_space<vmem>>) attributes {dimension_semantics = [], scalar_prefetch = 0 : i64, scratch_operands = 3 : i64, tpu.core_type = #tpu.core_type<tc>} {
    %c0 = arith.constant 0 : index
    %c0_0 = arith.constant 0 : index
    %0 = vector.load %arg0[%c0, %c0_0] : memref<64x128xbf16, #tpu.memory_space<vmem>>, vector<64x128xbf16>
    %c0_1 = arith.constant 0 : index
    %c0_2 = arith.constant 0 : index
    %1 = vector.load %arg2[%c0_1, %c0_2] : memref<128x384xbf16, #tpu.memory_space<vmem>>, vector<128x384xbf16>
    %cst = arith.constant dense<0.000000e+00> : vector<64x384xf32>
    %2 = tpu.matmul %0, %1, %cst {dimension_numbers = #tpu.dot_dimension_numbers<[1], [0], [0], [1], [0, 0, 1, 1], [], []>} : vector<64x128xbf16>, vector<128x384xbf16>, vector<64x384xf32> -> vector<64x384xf32>
    %c0_3 = arith.constant 0 : index
    %c0_4 = arith.constant 0 : index
    %3 = vector.load %arg4[%c0_3, %c0_4] : memref<1x384xf32, #tpu.memory_space<vmem>>, vector<1x384xf32>
    %4 = vector.broadcast %3 : vector<1x384xf32> to vector<64x384xf32>
    %5 = arith.addf %2, %4 : vector<64x384xf32>
    %c0_5 = arith.constant 0 : index
    %c0_6 = arith.constant 0 : index
    %6 = vector.load %arg14[%c0_5, %c0_6] : memref<64x384xf32, #tpu.memory_space<vmem>>, vector<64x384xf32>
    tpu.vector_store %arg14[%c0_5, %c0_6], %5 {strides = array<i32>} : memref<64x384xf32, #tpu.memory_space<vmem>>, vector<64x384xf32>,
    %c0_7 = arith.constant 0 : index
    %c0_8 = arith.constant 0 : index
    %7 = vector.load %arg5[%c0_7, %c0_8] : memref<1x128xf32, #tpu.memory_space<vmem>>, vector<1x128xf32>
    %8 = vector.shape_cast %7 : vector<1x128xf32> to vector<1x128xf32>
    %9 = vector.broadcast %8 : vector<1x128xf32> to vector<8x128xf32>
    %c0_9 = arith.constant 0 : index
    %c0_10 = arith.constant 0 : index
    %c0_11 = arith.constant 0 : index
    %10 = vector.load %arg1[%c0_9, %c0_10, %c0_11] : memref<2x8x128xf32, #tpu.memory_space<vmem>>, vector<1x8x128xf32>
    %11 = vector.shape_cast %10 : vector<1x8x128xf32> to vector<8x128xf32>
    %c0_i32 = arith.constant 0 : i32
    %c8_i32 = arith.constant 8 : i32
    %12 = arith.muli %c0_i32, %c8_i32 : i32
    %13 = tpu.assume_multiple %12, 8 : i32
    %14 = arith.index_cast %13 : i32 to index
    %c0_12 = arith.constant 0 : index
    %15 = vector.load %arg14[%14, %c0_12] : memref<64x384xf32, #tpu.memory_space<vmem>>, vector<8x384xf32>
    %16 = arith.truncf %11 : vector<8x128xf32> to vector<8x128xbf16>
    %c0_13 = arith.constant 0 : index
    %c0_14 = arith.constant 0 : index
    %17 = vector.load %arg3[%c0_13, %c0_14] : memref<128x384xbf16, #tpu.memory_space<vmem>>, vector<128x384xbf16>
    %cst_15 = arith.constant dense<0.000000e+00> : vector<8x384xf32>
    %18 = tpu.matmul %16, %17, %cst_15 {dimension_numbers = #tpu.dot_dimension_numbers<[1], [0], [0], [1], [0, 0, 1, 1], [], []>} : vector<8x128xbf16>, vector<128x384xbf16>, vector<8x384xf32> -> vector<8x384xf32>
    %19 = vector.extract_strided_slice %15 {offsets = [0, 0], sizes = [8, 256], strides = [1, 1]} : vector<8x384xf32> to vector<8x256xf32>
    %20 = vector.extract_strided_slice %18 {offsets = [0, 0], sizes = [8, 256], strides = [1, 1]} : vector<8x384xf32> to vector<8x256xf32>
    %21 = arith.addf %19, %20 : vector<8x256xf32>
    %22 = arith.negf %21 : vector<8x256xf32>
    %23 = math.exp %22 : vector<8x256xf32>
    %cst_16 = arith.constant 1.000000e+00 : f32
    %24 = vector.broadcast %cst_16 : f32 to vector<8x256xf32>
    %25 = arith.addf %24, %23 : vector<8x256xf32>
    %26 = arith.divf %24, %25 : vector<8x256xf32>
    %27 = vector.extract_strided_slice %26 {offsets = [0, 0], sizes = [8, 128], strides = [1, 1]} : vector<8x256xf32> to vector<8x128xf32>
    %28 = vector.extract_strided_slice %26 {offsets = [0, 128], sizes = [8, 128], strides = [1, 1]} : vector<8x256xf32> to vector<8x128xf32>
    %29 = vector.extract_strided_slice %15 {offsets = [0, 256], sizes = [8, 128], strides = [1, 1]} : vector<8x384xf32> to vector<8x128xf32>
    %30 = vector.extract_strided_slice %18 {offsets = [0, 256], sizes = [8, 128], strides = [1, 1]} : vector<8x384xf32> to vector<8x128xf32>
    %31 = arith.addf %30, %9 : vector<8x128xf32>
    %32 = arith.mulf %27, %31 : vector<8x128xf32>
    %33 = arith.addf %29, %32 : vector<8x128xf32>
    %34 = math.tanh %33 : vector<8x128xf32>
    %35 = arith.subf %11, %34 : vector<8x128xf32>
    %36 = arith.mulf %28, %35 : vector<8x128xf32>
    %37 = arith.addf %34, %36 : vector<8x128xf32>
    %38 = arith.index_cast %13 : i32 to index
    %c0_17 = arith.constant 0 : index
    %39 = vector.load %arg15[%38, %c0_17] : memref<64x128xf32, #tpu.memory_space<vmem>>, vector<8x128xf32>
    tpu.vector_store %arg15[%38, %c0_17], %37 {strides = array<i32>} : memref<64x128xf32, #tpu.memory_space<vmem>>, vector<8x128xf32>,
    %c1_i32 = arith.constant 1 : i32
    %c8_i32_18 = arith.constant 8 : i32
    %40 = arith.muli %c1_i32, %c8_i32_18 : i32
    %41 = tpu.assume_multiple %40, 8 : i32
    %42 = arith.index_cast %41 : i32 to index
    %c0_19 = arith.constant 0 : index
    %43 = vector.load %arg14[%42, %c0_19] : memref<64x384xf32, #tpu.memory_space<vmem>>, vector<8x384xf32>
    %44 = arith.truncf %37 : vector<8x128xf32> to vector<8x128xbf16>
    %c0_20 = arith.constant 0 : index
    %c0_21 = arith.constant 0 : index
    %45 = vector.load %arg3[%c0_20, %c0_21] : memref<128x384xbf16, #tpu.memory_space<vmem>>, vector<128x384xbf16>
    %cst_22 = arith.constant dense<0.000000e+00> : vector<8x384xf32>
    %46 = tpu.matmul %44, %45, %cst_22 {dimension_numbers = #tpu.dot_dimension_numbers<[1], [0], [0], [1], [0, 0, 1, 1], [], []>} : vector<8x128xbf16>, vector<128x384xbf16>, vector<8x384xf32> -> vector<8x384xf32>
    %47 = vector.extract_strided_slice %43 {offsets = [0, 0], sizes = [8, 256], strides = [1, 1]} : vector<8x384xf32> to vector<8x256xf32>
    %48 = vector.extract_strided_slice %46 {offsets = [0, 0], sizes = [8, 256], strides = [1, 1]} : vector<8x384xf32> to vector<8x256xf32>
    %49 = arith.addf %47, %48 : vector<8x256xf32>
    %50 = arith.negf %49 : vector<8x256xf32>
    %51 = math.exp %50 : vector<8x256xf32>
    %cst_23 = arith.constant 1.000000e+00 : f32
    %52 = vector.broadcast %cst_23 : f32 to vector<8x256xf32>
    %53 = arith.addf %52, %51 : vector<8x256xf32>
    %54 = arith.divf %52, %53 : vector<8x256xf32>
    %55 = vector.extract_strided_slice %54 {offsets = [0, 0], sizes = [8, 128], strides = [1, 1]} : vector<8x256xf32> to vector<8x128xf32>
    %56 = vector.extract_strided_slice %54 {offsets = [0, 128], sizes = [8, 128], strides = [1, 1]} : vector<8x256xf32> to vector<8x128xf32>
    %57 = vector.extract_strided_slice %43 {offsets = [0, 256], sizes = [8, 128], strides = [1, 1]} : vector<8x384xf32> to vector<8x128xf32>
    %58 = vector.extract_strided_slice %46 {offsets = [0, 256], sizes = [8, 128], strides = [1, 1]} : vector<8x384xf32> to vector<8x128xf32>
    %59 = arith.addf %58, %9 : vector<8x128xf32>
    %60 = arith.mulf %55, %59 : vector<8x128xf32>
    %61 = arith.addf %57, %60 : vector<8x128xf32>
    %62 = math.tanh %61 : vector<8x128xf32>
    %63 = arith.subf %37, %62 : vector<8x128xf32>
    %64 = arith.mulf %56, %63 : vector<8x128xf32>
    %65 = arith.addf %62, %64 : vector<8x128xf32>
    %66 = arith.index_cast %41 : i32 to index
    %c0_24 = arith.constant 0 : index
    %67 = vector.load %arg15[%66, %c0_24] : memref<64x128xf32, #tpu.memory_space<vmem>>, vector<8x128xf32>
    tpu.vector_store %arg15[%66, %c0_24], %65 {strides = array<i32>} : memref<64x128xf32, #tpu.memory_space<vmem>>, vector<8x128xf32>,
    %c2_i32 = arith.constant 2 : i32
    %c8_i32_25 = arith.constant 8 : i32
    %68 = arith.muli %c2_i32, %c8_i32_25 : i32
    %69 = tpu.assume_multiple %68, 8 : i32
    %70 = arith.index_cast %69 : i32 to index
    %c0_26 = arith.constant 0 : index
    %71 = vector.load %arg14[%70, %c0_26] : memref<64x384xf32, #tpu.memory_space<vmem>>, vector<8x384xf32>
    %72 = arith.truncf %65 : vector<8x128xf32> to vector<8x128xbf16>
    %c0_27 = arith.constant 0 : index
    %c0_28 = arith.constant 0 : index
    %73 = vector.load %arg3[%c0_27, %c0_28] : memref<128x384xbf16, #tpu.memory_space<vmem>>, vector<128x384xbf16>
    %cst_29 = arith.constant dense<0.000000e+00> : vector<8x384xf32>
    %74 = tpu.matmul %72, %73, %cst_29 {dimension_numbers = #tpu.dot_dimension_numbers<[1], [0], [0], [1], [0, 0, 1, 1], [], []>} : vector<8x128xbf16>, vector<128x384xbf16>, vector<8x384xf32> -> vector<8x384xf32>
    %75 = vector.extract_strided_slice %71 {offsets = [0, 0], sizes = [8, 256], strides = [1, 1]} : vector<8x384xf32> to vector<8x256xf32>
    %76 = vector.extract_strided_slice %74 {offsets = [0, 0], sizes = [8, 256], strides = [1, 1]} : vector<8x384xf32> to vector<8x256xf32>
    %77 = arith.addf %75, %76 : vector<8x256xf32>
    %78 = arith.negf %77 : vector<8x256xf32>
    %79 = math.exp %78 : vector<8x256xf32>
    %cst_30 = arith.constant 1.000000e+00 : f32
    %80 = vector.broadcast %cst_30 : f32 to vector<8x256xf32>
    %81 = arith.addf %80, %79 : vector<8x256xf32>
    %82 = arith.divf %80, %81 : vector<8x256xf32>
    %83 = vector.extract_strided_slice %82 {offsets = [0, 0], sizes = [8, 128], strides = [1, 1]} : vector<8x256xf32> to vector<8x128xf32>
    %84 = vector.extract_strided_slice %82 {offsets = [0, 128], sizes = [8, 128], strides = [1, 1]} : vector<8x256xf32> to vector<8x128xf32>
    %85 = vector.extract_strided_slice %71 {offsets = [0, 256], sizes = [8, 128], strides = [1, 1]} : vector<8x384xf32> to vector<8x128xf32>
    %86 = vector.extract_strided_slice %74 {offsets = [0, 256], sizes = [8, 128], strides = [1, 1]} : vector<8x384xf32> to vector<8x128xf32>
    %87 = arith.addf %86, %9 : vector<8x128xf32>
    %88 = arith.mulf %83, %87 : vector<8x128xf32>
    %89 = arith.addf %85, %88 : vector<8x128xf32>
    %90 = math.tanh %89 : vector<8x128xf32>
    %91 = arith.subf %65, %90 : vector<8x128xf32>
    %92 = arith.mulf %84, %91 : vector<8x128xf32>
    %93 = arith.addf %90, %92 : vector<8x128xf32>
    %94 = arith.index_cast %69 : i32 to index
    %c0_31 = arith.constant 0 : index
    %95 = vector.load %arg15[%94, %c0_31] : memref<64x128xf32, #tpu.memory_space<vmem>>, vector<8x128xf32>
    tpu.vector_store %arg15[%94, %c0_31], %93 {strides = array<i32>} : memref<64x128xf32, #tpu.memory_space<vmem>>, vector<8x128xf32>,
    %c3_i32 = arith.constant 3 : i32
    %c8_i32_32 = arith.constant 8 : i32
    %96 = arith.muli %c3_i32, %c8_i32_32 : i32
    %97 = tpu.assume_multiple %96, 8 : i32
    %98 = arith.index_cast %97 : i32 to index
    %c0_33 = arith.constant 0 : index
    %99 = vector.load %arg14[%98, %c0_33] : memref<64x384xf32, #tpu.memory_space<vmem>>, vector<8x384xf32>
    %100 = arith.truncf %93 : vector<8x128xf32> to vector<8x128xbf16>
    %c0_34 = arith.constant 0 : index
    %c0_35 = arith.constant 0 : index
    %101 = vector.load %arg3[%c0_34, %c0_35] : memref<128x384xbf16, #tpu.memory_space<vmem>>, vector<128x384xbf16>
    %cst_36 = arith.constant dense<0.000000e+00> : vector<8x384xf32>
    %102 = tpu.matmul %100, %101, %cst_36 {dimension_numbers = #tpu.dot_dimension_numbers<[1], [0], [0], [1], [0, 0, 1, 1], [], []>} : vector<8x128xbf16>, vector<128x384xbf16>, vector<8x384xf32> -> vector<8x384xf32>
    %103 = vector.extract_strided_slice %99 {offsets = [0, 0], sizes = [8, 256], strides = [1, 1]} : vector<8x384xf32> to vector<8x256xf32>
    %104 = vector.extract_strided_slice %102 {offsets = [0, 0], sizes = [8, 256], strides = [1, 1]} : vector<8x384xf32> to vector<8x256xf32>
    %105 = arith.addf %103, %104 : vector<8x256xf32>
    %106 = arith.negf %105 : vector<8x256xf32>
    %107 = math.exp %106 : vector<8x256xf32>
    %cst_37 = arith.constant 1.000000e+00 : f32
    %108 = vector.broadcast %cst_37 : f32 to vector<8x256xf32>
    %109 = arith.addf %108, %107 : vector<8x256xf32>
    %110 = arith.divf %108, %109 : vector<8x256xf32>
    %111 = vector.extract_strided_slice %110 {offsets = [0, 0], sizes = [8, 128], strides = [1, 1]} : vector<8x256xf32> to vector<8x128xf32>
    %112 = vector.extract_strided_slice %110 {offsets = [0, 128], sizes = [8, 128], strides = [1, 1]} : vector<8x256xf32> to vector<8x128xf32>
    %113 = vector.extract_strided_slice %99 {offsets = [0, 256], sizes = [8, 128], strides = [1, 1]} : vector<8x384xf32> to vector<8x128xf32>
    %114 = vector.extract_strided_slice %102 {offsets = [0, 256], sizes = [8, 128], strides = [1, 1]} : vector<8x384xf32> to vector<8x128xf32>
    %115 = arith.addf %114, %9 : vector<8x128xf32>
    %116 = arith.mulf %111, %115 : vector<8x128xf32>
    %117 = arith.addf %113, %116 : vector<8x128xf32>
    %118 = math.tanh %117 : vector<8x128xf32>
    %119 = arith.subf %93, %118 : vector<8x128xf32>
    %120 = arith.mulf %112, %119 : vector<8x128xf32>
    %121 = arith.addf %118, %120 : vector<8x128xf32>
    %122 = arith.index_cast %97 : i32 to index
    %c0_38 = arith.constant 0 : index
    %123 = vector.load %arg15[%122, %c0_38] : memref<64x128xf32, #tpu.memory_space<vmem>>, vector<8x128xf32>
    tpu.vector_store %arg15[%122, %c0_38], %121 {strides = array<i32>} : memref<64x128xf32, #tpu.memory_space<vmem>>, vector<8x128xf32>,
    %c4_i32 = arith.constant 4 : i32
    %c8_i32_39 = arith.constant 8 : i32
    %124 = arith.muli %c4_i32, %c8_i32_39 : i32
    %125 = tpu.assume_multiple %124, 8 : i32
    %126 = arith.index_cast %125 : i32 to index
    %c0_40 = arith.constant 0 : index
    %127 = vector.load %arg14[%126, %c0_40] : memref<64x384xf32, #tpu.memory_space<vmem>>, vector<8x384xf32>
    %128 = arith.truncf %121 : vector<8x128xf32> to vector<8x128xbf16>
    %c0_41 = arith.constant 0 : index
    %c0_42 = arith.constant 0 : index
    %129 = vector.load %arg3[%c0_41, %c0_42] : memref<128x384xbf16, #tpu.memory_space<vmem>>, vector<128x384xbf16>
    %cst_43 = arith.constant dense<0.000000e+00> : vector<8x384xf32>
    %130 = tpu.matmul %128, %129, %cst_43 {dimension_numbers = #tpu.dot_dimension_numbers<[1], [0], [0], [1], [0, 0, 1, 1], [], []>} : vector<8x128xbf16>, vector<128x384xbf16>, vector<8x384xf32> -> vector<8x384xf32>
    %131 = vector.extract_strided_slice %127 {offsets = [0, 0], sizes = [8, 256], strides = [1, 1]} : vector<8x384xf32> to vector<8x256xf32>
    %132 = vector.extract_strided_slice %130 {offsets = [0, 0], sizes = [8, 256], strides = [1, 1]} : vector<8x384xf32> to vector<8x256xf32>
    %133 = arith.addf %131, %132 : vector<8x256xf32>
    %134 = arith.negf %133 : vector<8x256xf32>
    %135 = math.exp %134 : vector<8x256xf32>
    %cst_44 = arith.constant 1.000000e+00 : f32
    %136 = vector.broadcast %cst_44 : f32 to vector<8x256xf32>
    %137 = arith.addf %136, %135 : vector<8x256xf32>
    %138 = arith.divf %136, %137 : vector<8x256xf32>
    %139 = vector.extract_strided_slice %138 {offsets = [0, 0], sizes = [8, 128], strides = [1, 1]} : vector<8x256xf32> to vector<8x128xf32>
    %140 = vector.extract_strided_slice %138 {offsets = [0, 128], sizes = [8, 128], strides = [1, 1]} : vector<8x256xf32> to vector<8x128xf32>
    %141 = vector.extract_strided_slice %127 {offsets = [0, 256], sizes = [8, 128], strides = [1, 1]} : vector<8x384xf32> to vector<8x128xf32>
    %142 = vector.extract_strided_slice %130 {offsets = [0, 256], sizes = [8, 128], strides = [1, 1]} : vector<8x384xf32> to vector<8x128xf32>
    %143 = arith.addf %142, %9 : vector<8x128xf32>
    %144 = arith.mulf %139, %143 : vector<8x128xf32>
    %145 = arith.addf %141, %144 : vector<8x128xf32>
    %146 = math.tanh %145 : vector<8x128xf32>
    %147 = arith.subf %121, %146 : vector<8x128xf32>
    %148 = arith.mulf %140, %147 : vector<8x128xf32>
    %149 = arith.addf %146, %148 : vector<8x128xf32>
    %150 = arith.index_cast %125 : i32 to index
    %c0_45 = arith.constant 0 : index
    %151 = vector.load %arg15[%150, %c0_45] : memref<64x128xf32, #tpu.memory_space<vmem>>, vector<8x128xf32>
    tpu.vector_store %arg15[%150, %c0_45], %149 {strides = array<i32>} : memref<64x128xf32, #tpu.memory_space<vmem>>, vector<8x128xf32>,
    %c5_i32 = arith.constant 5 : i32
    %c8_i32_46 = arith.constant 8 : i32
    %152 = arith.muli %c5_i32, %c8_i32_46 : i32
    %153 = tpu.assume_multiple %152, 8 : i32
    %154 = arith.index_cast %153 : i32 to index
    %c0_47 = arith.constant 0 : index
    %155 = vector.load %arg14[%154, %c0_47] : memref<64x384xf32, #tpu.memory_space<vmem>>, vector<8x384xf32>
    %156 = arith.truncf %149 : vector<8x128xf32> to vector<8x128xbf16>
    %c0_48 = arith.constant 0 : index
    %c0_49 = arith.constant 0 : index
    %157 = vector.load %arg3[%c0_48, %c0_49] : memref<128x384xbf16, #tpu.memory_space<vmem>>, vector<128x384xbf16>
    %cst_50 = arith.constant dense<0.000000e+00> : vector<8x384xf32>
    %158 = tpu.matmul %156, %157, %cst_50 {dimension_numbers = #tpu.dot_dimension_numbers<[1], [0], [0], [1], [0, 0, 1, 1], [], []>} : vector<8x128xbf16>, vector<128x384xbf16>, vector<8x384xf32> -> vector<8x384xf32>
    %159 = vector.extract_strided_slice %155 {offsets = [0, 0], sizes = [8, 256], strides = [1, 1]} : vector<8x384xf32> to vector<8x256xf32>
    %160 = vector.extract_strided_slice %158 {offsets = [0, 0], sizes = [8, 256], strides = [1, 1]} : vector<8x384xf32> to vector<8x256xf32>
    %161 = arith.addf %159, %160 : vector<8x256xf32>
    %162 = arith.negf %161 : vector<8x256xf32>
    %163 = math.exp %162 : vector<8x256xf32>
    %cst_51 = arith.constant 1.000000e+00 : f32
    %164 = vector.broadcast %cst_51 : f32 to vector<8x256xf32>
    %165 = arith.addf %164, %163 : vector<8x256xf32>
    %166 = arith.divf %164, %165 : vector<8x256xf32>
    %167 = vector.extract_strided_slice %166 {offsets = [0, 0], sizes = [8, 128], strides = [1, 1]} : vector<8x256xf32> to vector<8x128xf32>
    %168 = vector.extract_strided_slice %166 {offsets = [0, 128], sizes = [8, 128], strides = [1, 1]} : vector<8x256xf32> to vector<8x128xf32>
    %169 = vector.extract_strided_slice %155 {offsets = [0, 256], sizes = [8, 128], strides = [1, 1]} : vector<8x384xf32> to vector<8x128xf32>
    %170 = vector.extract_strided_slice %158 {offsets = [0, 256], sizes = [8, 128], strides = [1, 1]} : vector<8x384xf32> to vector<8x128xf32>
    %171 = arith.addf %170, %9 : vector<8x128xf32>
    %172 = arith.mulf %167, %171 : vector<8x128xf32>
    %173 = arith.addf %169, %172 : vector<8x128xf32>
    %174 = math.tanh %173 : vector<8x128xf32>
    %175 = arith.subf %149, %174 : vector<8x128xf32>
    %176 = arith.mulf %168, %175 : vector<8x128xf32>
    %177 = arith.addf %174, %176 : vector<8x128xf32>
    %178 = arith.index_cast %153 : i32 to index
    %c0_52 = arith.constant 0 : index
    %179 = vector.load %arg15[%178, %c0_52] : memref<64x128xf32, #tpu.memory_space<vmem>>, vector<8x128xf32>
    tpu.vector_store %arg15[%178, %c0_52], %177 {strides = array<i32>} : memref<64x128xf32, #tpu.memory_space<vmem>>, vector<8x128xf32>,
    %c6_i32 = arith.constant 6 : i32
    %c8_i32_53 = arith.constant 8 : i32
    %180 = arith.muli %c6_i32, %c8_i32_53 : i32
    %181 = tpu.assume_multiple %180, 8 : i32
    %182 = arith.index_cast %181 : i32 to index
    %c0_54 = arith.constant 0 : index
    %183 = vector.load %arg14[%182, %c0_54] : memref<64x384xf32, #tpu.memory_space<vmem>>, vector<8x384xf32>
    %184 = arith.truncf %177 : vector<8x128xf32> to vector<8x128xbf16>
    %c0_55 = arith.constant 0 : index
    %c0_56 = arith.constant 0 : index
    %185 = vector.load %arg3[%c0_55, %c0_56] : memref<128x384xbf16, #tpu.memory_space<vmem>>, vector<128x384xbf16>
    %cst_57 = arith.constant dense<0.000000e+00> : vector<8x384xf32>
    %186 = tpu.matmul %184, %185, %cst_57 {dimension_numbers = #tpu.dot_dimension_numbers<[1], [0], [0], [1], [0, 0, 1, 1], [], []>} : vector<8x128xbf16>, vector<128x384xbf16>, vector<8x384xf32> -> vector<8x384xf32>
    %187 = vector.extract_strided_slice %183 {offsets = [0, 0], sizes = [8, 256], strides = [1, 1]} : vector<8x384xf32> to vector<8x256xf32>
    %188 = vector.extract_strided_slice %186 {offsets = [0, 0], sizes = [8, 256], strides = [1, 1]} : vector<8x384xf32> to vector<8x256xf32>
    %189 = arith.addf %187, %188 : vector<8x256xf32>
    %190 = arith.negf %189 : vector<8x256xf32>
    %191 = math.exp %190 : vector<8x256xf32>
    %cst_58 = arith.constant 1.000000e+00 : f32
    %192 = vector.broadcast %cst_58 : f32 to vector<8x256xf32>
    %193 = arith.addf %192, %191 : vector<8x256xf32>
    %194 = arith.divf %192, %193 : vector<8x256xf32>
    %195 = vector.extract_strided_slice %194 {offsets = [0, 0], sizes = [8, 128], strides = [1, 1]} : vector<8x256xf32> to vector<8x128xf32>
    %196 = vector.extract_strided_slice %194 {offsets = [0, 128], sizes = [8, 128], strides = [1, 1]} : vector<8x256xf32> to vector<8x128xf32>
    %197 = vector.extract_strided_slice %183 {offsets = [0, 256], sizes = [8, 128], strides = [1, 1]} : vector<8x384xf32> to vector<8x128xf32>
    %198 = vector.extract_strided_slice %186 {offsets = [0, 256], sizes = [8, 128], strides = [1, 1]} : vector<8x384xf32> to vector<8x128xf32>
    %199 = arith.addf %198, %9 : vector<8x128xf32>
    %200 = arith.mulf %195, %199 : vector<8x128xf32>
    %201 = arith.addf %197, %200 : vector<8x128xf32>
    %202 = math.tanh %201 : vector<8x128xf32>
    %203 = arith.subf %177, %202 : vector<8x128xf32>
    %204 = arith.mulf %196, %203 : vector<8x128xf32>
    %205 = arith.addf %202, %204 : vector<8x128xf32>
    %206 = arith.index_cast %181 : i32 to index
    %c0_59 = arith.constant 0 : index
    %207 = vector.load %arg15[%206, %c0_59] : memref<64x128xf32, #tpu.memory_space<vmem>>, vector<8x128xf32>
    tpu.vector_store %arg15[%206, %c0_59], %205 {strides = array<i32>} : memref<64x128xf32, #tpu.memory_space<vmem>>, vector<8x128xf32>,
    %c7_i32 = arith.constant 7 : i32
    %c8_i32_60 = arith.constant 8 : i32
    %208 = arith.muli %c7_i32, %c8_i32_60 : i32
    %209 = tpu.assume_multiple %208, 8 : i32
    %210 = arith.index_cast %209 : i32 to index
    %c0_61 = arith.constant 0 : index
    %211 = vector.load %arg14[%210, %c0_61] : memref<64x384xf32, #tpu.memory_space<vmem>>, vector<8x384xf32>
    %212 = arith.truncf %205 : vector<8x128xf32> to vector<8x128xbf16>
    %c0_62 = arith.constant 0 : index
    %c0_63 = arith.constant 0 : index
    %213 = vector.load %arg3[%c0_62, %c0_63] : memref<128x384xbf16, #tpu.memory_space<vmem>>, vector<128x384xbf16>
    %cst_64 = arith.constant dense<0.000000e+00> : vector<8x384xf32>
    %214 = tpu.matmul %212, %213, %cst_64 {dimension_numbers = #tpu.dot_dimension_numbers<[1], [0], [0], [1], [0, 0, 1, 1], [], []>} : vector<8x128xbf16>, vector<128x384xbf16>, vector<8x384xf32> -> vector<8x384xf32>
    %215 = vector.extract_strided_slice %211 {offsets = [0, 0], sizes = [8, 256], strides = [1, 1]} : vector<8x384xf32> to vector<8x256xf32>
    %216 = vector.extract_strided_slice %214 {offsets = [0, 0], sizes = [8, 256], strides = [1, 1]} : vector<8x384xf32> to vector<8x256xf32>
    %217 = arith.addf %215, %216 : vector<8x256xf32>
    %218 = arith.negf %217 : vector<8x256xf32>
    %219 = math.exp %218 : vector<8x256xf32>
    %cst_65 = arith.constant 1.000000e+00 : f32
    %220 = vector.broadcast %cst_65 : f32 to vector<8x256xf32>
    %221 = arith.addf %220, %219 : vector<8x256xf32>
    %222 = arith.divf %220, %221 : vector<8x256xf32>
    %223 = vector.extract_strided_slice %222 {offsets = [0, 0], sizes = [8, 128], strides = [1, 1]} : vector<8x256xf32> to vector<8x128xf32>
    %224 = vector.extract_strided_slice %222 {offsets = [0, 128], sizes = [8, 128], strides = [1, 1]} : vector<8x256xf32> to vector<8x128xf32>
    %225 = vector.extract_strided_slice %211 {offsets = [0, 256], sizes = [8, 128], strides = [1, 1]} : vector<8x384xf32> to vector<8x128xf32>
    %226 = vector.extract_strided_slice %214 {offsets = [0, 256], sizes = [8, 128], strides = [1, 1]} : vector<8x384xf32> to vector<8x128xf32>
    %227 = arith.addf %226, %9 : vector<8x128xf32>
    %228 = arith.mulf %223, %227 : vector<8x128xf32>
    %229 = arith.addf %225, %228 : vector<8x128xf32>
    %230 = math.tanh %229 : vector<8x128xf32>
    %231 = arith.subf %205, %230 : vector<8x128xf32>
    %232 = arith.mulf %224, %231 : vector<8x128xf32>
    %233 = arith.addf %230, %232 : vector<8x128xf32>
    %234 = arith.index_cast %209 : i32 to index
    %c0_66 = arith.constant 0 : index
    %235 = vector.load %arg15[%234, %c0_66] : memref<64x128xf32, #tpu.memory_space<vmem>>, vector<8x128xf32>
    tpu.vector_store %arg15[%234, %c0_66], %233 {strides = array<i32>} : memref<64x128xf32, #tpu.memory_space<vmem>>, vector<8x128xf32>,
    %c8_i32_67 = arith.constant 8 : i32
    %c0_68 = arith.constant 0 : index
    %c0_69 = arith.constant 0 : index
    %c0_70 = arith.constant 0 : index
    %236 = vector.load %arg13[%c0_68, %c0_69, %c0_70] : memref<2x8x128xf32, #tpu.memory_space<vmem>>, vector<1x8x128xf32>
    %237 = vector.shape_cast %236 : vector<1x8x128xf32> to vector<8x128xf32>
    %238 = vector.shape_cast %233 : vector<8x128xf32> to vector<1x8x128xf32>
    tpu.vector_store %arg13[%c0_68, %c0_69, %c0_70], %238 {strides = array<i32>} : memref<2x8x128xf32, #tpu.memory_space<vmem>>, vector<1x8x128xf32>,
    %c0_71 = arith.constant 0 : index
    %c0_72 = arith.constant 0 : index
    %239 = vector.load %arg15[%c0_71, %c0_72] : memref<64x128xf32, #tpu.memory_space<vmem>>, vector<64x128xf32>
    %240 = arith.truncf %239 : vector<64x128xf32> to vector<64x128xbf16>
    %c0_73 = arith.constant 0 : index
    %c0_74 = arith.constant 0 : index
    %241 = vector.load %arg6[%c0_73, %c0_74] : memref<128x384xbf16, #tpu.memory_space<vmem>>, vector<128x384xbf16>
    %cst_75 = arith.constant dense<0.000000e+00> : vector<64x384xf32>
    %242 = tpu.matmul %240, %241, %cst_75 {dimension_numbers = #tpu.dot_dimension_numbers<[1], [0], [0], [1], [0, 0, 1, 1], [], []>} : vector<64x128xbf16>, vector<128x384xbf16>, vector<64x384xf32> -> vector<64x384xf32>
    %c0_76 = arith.constant 0 : index
    %c0_77 = arith.constant 0 : index
    %243 = vector.load %arg8[%c0_76, %c0_77] : memref<1x384xf32, #tpu.memory_space<vmem>>, vector<1x384xf32>
    %244 = vector.broadcast %243 : vector<1x384xf32> to vector<64x384xf32>
    %245 = arith.addf %242, %244 : vector<64x384xf32>
    %c0_78 = arith.constant 0 : index
    %c0_79 = arith.constant 0 : index
    %246 = vector.load %arg14[%c0_78, %c0_79] : memref<64x384xf32, #tpu.memory_space<vmem>>, vector<64x384xf32>
    tpu.vector_store %arg14[%c0_78, %c0_79], %245 {strides = array<i32>} : memref<64x384xf32, #tpu.memory_space<vmem>>, vector<64x384xf32>,
    %c0_80 = arith.constant 0 : index
    %c0_81 = arith.constant 0 : index
    %247 = vector.load %arg9[%c0_80, %c0_81] : memref<1x128xf32, #tpu.memory_space<vmem>>, vector<1x128xf32>
    %248 = vector.shape_cast %247 : vector<1x128xf32> to vector<1x128xf32>
    %249 = vector.broadcast %248 : vector<1x128xf32> to vector<8x128xf32>
    %c1 = arith.constant 1 : index
    %c0_82 = arith.constant 0 : index
    %c0_83 = arith.constant 0 : index
    %250 = vector.load %arg1[%c1, %c0_82, %c0_83] : memref<2x8x128xf32, #tpu.memory_space<vmem>>, vector<1x8x128xf32>
    %251 = vector.shape_cast %250 : vector<1x8x128xf32> to vector<8x128xf32>
    %c0_i32_84 = arith.constant 0 : i32
    %c8_i32_85 = arith.constant 8 : i32
    %252 = arith.muli %c0_i32_84, %c8_i32_85 : i32
    %253 = tpu.assume_multiple %252, 8 : i32
    %254 = arith.index_cast %253 : i32 to index
    %c0_86 = arith.constant 0 : index
    %255 = vector.load %arg14[%254, %c0_86] : memref<64x384xf32, #tpu.memory_space<vmem>>, vector<8x384xf32>
    %256 = arith.truncf %251 : vector<8x128xf32> to vector<8x128xbf16>
    %c0_87 = arith.constant 0 : index
    %c0_88 = arith.constant 0 : index
    %257 = vector.load %arg7[%c0_87, %c0_88] : memref<128x384xbf16, #tpu.memory_space<vmem>>, vector<128x384xbf16>
    %cst_89 = arith.constant dense<0.000000e+00> : vector<8x384xf32>
    %258 = tpu.matmul %256, %257, %cst_89 {dimension_numbers = #tpu.dot_dimension_numbers<[1], [0], [0], [1], [0, 0, 1, 1], [], []>} : vector<8x128xbf16>, vector<128x384xbf16>, vector<8x384xf32> -> vector<8x384xf32>
    %259 = vector.extract_strided_slice %255 {offsets = [0, 0], sizes = [8, 256], strides = [1, 1]} : vector<8x384xf32> to vector<8x256xf32>
    %260 = vector.extract_strided_slice %258 {offsets = [0, 0], sizes = [8, 256], strides = [1, 1]} : vector<8x384xf32> to vector<8x256xf32>
    %261 = arith.addf %259, %260 : vector<8x256xf32>
    %262 = arith.negf %261 : vector<8x256xf32>
    %263 = math.exp %262 : vector<8x256xf32>
    %cst_90 = arith.constant 1.000000e+00 : f32
    %264 = vector.broadcast %cst_90 : f32 to vector<8x256xf32>
    %265 = arith.addf %264, %263 : vector<8x256xf32>
    %266 = arith.divf %264, %265 : vector<8x256xf32>
    %267 = vector.extract_strided_slice %266 {offsets = [0, 0], sizes = [8, 128], strides = [1, 1]} : vector<8x256xf32> to vector<8x128xf32>
    %268 = vector.extract_strided_slice %266 {offsets = [0, 128], sizes = [8, 128], strides = [1, 1]} : vector<8x256xf32> to vector<8x128xf32>
    %269 = vector.extract_strided_slice %255 {offsets = [0, 256], sizes = [8, 128], strides = [1, 1]} : vector<8x384xf32> to vector<8x128xf32>
    %270 = vector.extract_strided_slice %258 {offsets = [0, 256], sizes = [8, 128], strides = [1, 1]} : vector<8x384xf32> to vector<8x128xf32>
    %271 = arith.addf %270, %249 : vector<8x128xf32>
    %272 = arith.mulf %267, %271 : vector<8x128xf32>
    %273 = arith.addf %269, %272 : vector<8x128xf32>
    %274 = math.tanh %273 : vector<8x128xf32>
    %275 = arith.subf %251, %274 : vector<8x128xf32>
    %276 = arith.mulf %268, %275 : vector<8x128xf32>
    %277 = arith.addf %274, %276 : vector<8x128xf32>
    %278 = arith.index_cast %253 : i32 to index
    %c0_91 = arith.constant 0 : index
    %279 = vector.load %arg16[%278, %c0_91] : memref<64x128xf32, #tpu.memory_space<vmem>>, vector<8x128xf32>
    tpu.vector_store %arg16[%278, %c0_91], %277 {strides = array<i32>} : memref<64x128xf32, #tpu.memory_space<vmem>>, vector<8x128xf32>,
    %c1_i32_92 = arith.constant 1 : i32
    %c8_i32_93 = arith.constant 8 : i32
    %280 = arith.muli %c1_i32_92, %c8_i32_93 : i32
    %281 = tpu.assume_multiple %280, 8 : i32
    %282 = arith.index_cast %281 : i32 to index
    %c0_94 = arith.constant 0 : index
    %283 = vector.load %arg14[%282, %c0_94] : memref<64x384xf32, #tpu.memory_space<vmem>>, vector<8x384xf32>
    %284 = arith.truncf %277 : vector<8x128xf32> to vector<8x128xbf16>
    %c0_95 = arith.constant 0 : index
    %c0_96 = arith.constant 0 : index
    %285 = vector.load %arg7[%c0_95, %c0_96] : memref<128x384xbf16, #tpu.memory_space<vmem>>, vector<128x384xbf16>
    %cst_97 = arith.constant dense<0.000000e+00> : vector<8x384xf32>
    %286 = tpu.matmul %284, %285, %cst_97 {dimension_numbers = #tpu.dot_dimension_numbers<[1], [0], [0], [1], [0, 0, 1, 1], [], []>} : vector<8x128xbf16>, vector<128x384xbf16>, vector<8x384xf32> -> vector<8x384xf32>
    %287 = vector.extract_strided_slice %283 {offsets = [0, 0], sizes = [8, 256], strides = [1, 1]} : vector<8x384xf32> to vector<8x256xf32>
    %288 = vector.extract_strided_slice %286 {offsets = [0, 0], sizes = [8, 256], strides = [1, 1]} : vector<8x384xf32> to vector<8x256xf32>
    %289 = arith.addf %287, %288 : vector<8x256xf32>
    %290 = arith.negf %289 : vector<8x256xf32>
    %291 = math.exp %290 : vector<8x256xf32>
    %cst_98 = arith.constant 1.000000e+00 : f32
    %292 = vector.broadcast %cst_98 : f32 to vector<8x256xf32>
    %293 = arith.addf %292, %291 : vector<8x256xf32>
    %294 = arith.divf %292, %293 : vector<8x256xf32>
    %295 = vector.extract_strided_slice %294 {offsets = [0, 0], sizes = [8, 128], strides = [1, 1]} : vector<8x256xf32> to vector<8x128xf32>
    %296 = vector.extract_strided_slice %294 {offsets = [0, 128], sizes = [8, 128], strides = [1, 1]} : vector<8x256xf32> to vector<8x128xf32>
    %297 = vector.extract_strided_slice %283 {offsets = [0, 256], sizes = [8, 128], strides = [1, 1]} : vector<8x384xf32> to vector<8x128xf32>
    %298 = vector.extract_strided_slice %286 {offsets = [0, 256], sizes = [8, 128], strides = [1, 1]} : vector<8x384xf32> to vector<8x128xf32>
    %299 = arith.addf %298, %249 : vector<8x128xf32>
    %300 = arith.mulf %295, %299 : vector<8x128xf32>
    %301 = arith.addf %297, %300 : vector<8x128xf32>
    %302 = math.tanh %301 : vector<8x128xf32>
    %303 = arith.subf %277, %302 : vector<8x128xf32>
    %304 = arith.mulf %296, %303 : vector<8x128xf32>
    %305 = arith.addf %302, %304 : vector<8x128xf32>
    %306 = arith.index_cast %281 : i32 to index
    %c0_99 = arith.constant 0 : index
    %307 = vector.load %arg16[%306, %c0_99] : memref<64x128xf32, #tpu.memory_space<vmem>>, vector<8x128xf32>
    tpu.vector_store %arg16[%306, %c0_99], %305 {strides = array<i32>} : memref<64x128xf32, #tpu.memory_space<vmem>>, vector<8x128xf32>,
    %c2_i32_100 = arith.constant 2 : i32
    %c8_i32_101 = arith.constant 8 : i32
    %308 = arith.muli %c2_i32_100, %c8_i32_101 : i32
    %309 = tpu.assume_multiple %308, 8 : i32
    %310 = arith.index_cast %309 : i32 to index
    %c0_102 = arith.constant 0 : index
    %311 = vector.load %arg14[%310, %c0_102] : memref<64x384xf32, #tpu.memory_space<vmem>>, vector<8x384xf32>
    %312 = arith.truncf %305 : vector<8x128xf32> to vector<8x128xbf16>
    %c0_103 = arith.constant 0 : index
    %c0_104 = arith.constant 0 : index
    %313 = vector.load %arg7[%c0_103, %c0_104] : memref<128x384xbf16, #tpu.memory_space<vmem>>, vector<128x384xbf16>
    %cst_105 = arith.constant dense<0.000000e+00> : vector<8x384xf32>
    %314 = tpu.matmul %312, %313, %cst_105 {dimension_numbers = #tpu.dot_dimension_numbers<[1], [0], [0], [1], [0, 0, 1, 1], [], []>} : vector<8x128xbf16>, vector<128x384xbf16>, vector<8x384xf32> -> vector<8x384xf32>
    %315 = vector.extract_strided_slice %311 {offsets = [0, 0], sizes = [8, 256], strides = [1, 1]} : vector<8x384xf32> to vector<8x256xf32>
    %316 = vector.extract_strided_slice %314 {offsets = [0, 0], sizes = [8, 256], strides = [1, 1]} : vector<8x384xf32> to vector<8x256xf32>
    %317 = arith.addf %315, %316 : vector<8x256xf32>
    %318 = arith.negf %317 : vector<8x256xf32>
    %319 = math.exp %318 : vector<8x256xf32>
    %cst_106 = arith.constant 1.000000e+00 : f32
    %320 = vector.broadcast %cst_106 : f32 to vector<8x256xf32>
    %321 = arith.addf %320, %319 : vector<8x256xf32>
    %322 = arith.divf %320, %321 : vector<8x256xf32>
    %323 = vector.extract_strided_slice %322 {offsets = [0, 0], sizes = [8, 128], strides = [1, 1]} : vector<8x256xf32> to vector<8x128xf32>
    %324 = vector.extract_strided_slice %322 {offsets = [0, 128], sizes = [8, 128], strides = [1, 1]} : vector<8x256xf32> to vector<8x128xf32>
    %325 = vector.extract_strided_slice %311 {offsets = [0, 256], sizes = [8, 128], strides = [1, 1]} : vector<8x384xf32> to vector<8x128xf32>
    %326 = vector.extract_strided_slice %314 {offsets = [0, 256], sizes = [8, 128], strides = [1, 1]} : vector<8x384xf32> to vector<8x128xf32>
    %327 = arith.addf %326, %249 : vector<8x128xf32>
    %328 = arith.mulf %323, %327 : vector<8x128xf32>
    %329 = arith.addf %325, %328 : vector<8x128xf32>
    %330 = math.tanh %329 : vector<8x128xf32>
    %331 = arith.subf %305, %330 : vector<8x128xf32>
    %332 = arith.mulf %324, %331 : vector<8x128xf32>
    %333 = arith.addf %330, %332 : vector<8x128xf32>
    %334 = arith.index_cast %309 : i32 to index
    %c0_107 = arith.constant 0 : index
    %335 = vector.load %arg16[%334, %c0_107] : memref<64x128xf32, #tpu.memory_space<vmem>>, vector<8x128xf32>
    tpu.vector_store %arg16[%334, %c0_107], %333 {strides = array<i32>} : memref<64x128xf32, #tpu.memory_space<vmem>>, vector<8x128xf32>,
    %c3_i32_108 = arith.constant 3 : i32
    %c8_i32_109 = arith.constant 8 : i32
    %336 = arith.muli %c3_i32_108, %c8_i32_109 : i32
    %337 = tpu.assume_multiple %336, 8 : i32
    %338 = arith.index_cast %337 : i32 to index
    %c0_110 = arith.constant 0 : index
    %339 = vector.load %arg14[%338, %c0_110] : memref<64x384xf32, #tpu.memory_space<vmem>>, vector<8x384xf32>
    %340 = arith.truncf %333 : vector<8x128xf32> to vector<8x128xbf16>
    %c0_111 = arith.constant 0 : index
    %c0_112 = arith.constant 0 : index
    %341 = vector.load %arg7[%c0_111, %c0_112] : memref<128x384xbf16, #tpu.memory_space<vmem>>, vector<128x384xbf16>
    %cst_113 = arith.constant dense<0.000000e+00> : vector<8x384xf32>
    %342 = tpu.matmul %340, %341, %cst_113 {dimension_numbers = #tpu.dot_dimension_numbers<[1], [0], [0], [1], [0, 0, 1, 1], [], []>} : vector<8x128xbf16>, vector<128x384xbf16>, vector<8x384xf32> -> vector<8x384xf32>
    %343 = vector.extract_strided_slice %339 {offsets = [0, 0], sizes = [8, 256], strides = [1, 1]} : vector<8x384xf32> to vector<8x256xf32>
    %344 = vector.extract_strided_slice %342 {offsets = [0, 0], sizes = [8, 256], strides = [1, 1]} : vector<8x384xf32> to vector<8x256xf32>
    %345 = arith.addf %343, %344 : vector<8x256xf32>
    %346 = arith.negf %345 : vector<8x256xf32>
    %347 = math.exp %346 : vector<8x256xf32>
    %cst_114 = arith.constant 1.000000e+00 : f32
    %348 = vector.broadcast %cst_114 : f32 to vector<8x256xf32>
    %349 = arith.addf %348, %347 : vector<8x256xf32>
    %350 = arith.divf %348, %349 : vector<8x256xf32>
    %351 = vector.extract_strided_slice %350 {offsets = [0, 0], sizes = [8, 128], strides = [1, 1]} : vector<8x256xf32> to vector<8x128xf32>
    %352 = vector.extract_strided_slice %350 {offsets = [0, 128], sizes = [8, 128], strides = [1, 1]} : vector<8x256xf32> to vector<8x128xf32>
    %353 = vector.extract_strided_slice %339 {offsets = [0, 256], sizes = [8, 128], strides = [1, 1]} : vector<8x384xf32> to vector<8x128xf32>
    %354 = vector.extract_strided_slice %342 {offsets = [0, 256], sizes = [8, 128], strides = [1, 1]} : vector<8x384xf32> to vector<8x128xf32>
    %355 = arith.addf %354, %249 : vector<8x128xf32>
    %356 = arith.mulf %351, %355 : vector<8x128xf32>
    %357 = arith.addf %353, %356 : vector<8x128xf32>
    %358 = math.tanh %357 : vector<8x128xf32>
    %359 = arith.subf %333, %358 : vector<8x128xf32>
    %360 = arith.mulf %352, %359 : vector<8x128xf32>
    %361 = arith.addf %358, %360 : vector<8x128xf32>
    %362 = arith.index_cast %337 : i32 to index
    %c0_115 = arith.constant 0 : index
    %363 = vector.load %arg16[%362, %c0_115] : memref<64x128xf32, #tpu.memory_space<vmem>>, vector<8x128xf32>
    tpu.vector_store %arg16[%362, %c0_115], %361 {strides = array<i32>} : memref<64x128xf32, #tpu.memory_space<vmem>>, vector<8x128xf32>,
    %c4_i32_116 = arith.constant 4 : i32
    %c8_i32_117 = arith.constant 8 : i32
    %364 = arith.muli %c4_i32_116, %c8_i32_117 : i32
    %365 = tpu.assume_multiple %364, 8 : i32
    %366 = arith.index_cast %365 : i32 to index
    %c0_118 = arith.constant 0 : index
    %367 = vector.load %arg14[%366, %c0_118] : memref<64x384xf32, #tpu.memory_space<vmem>>, vector<8x384xf32>
    %368 = arith.truncf %361 : vector<8x128xf32> to vector<8x128xbf16>
    %c0_119 = arith.constant 0 : index
    %c0_120 = arith.constant 0 : index
    %369 = vector.load %arg7[%c0_119, %c0_120] : memref<128x384xbf16, #tpu.memory_space<vmem>>, vector<128x384xbf16>
    %cst_121 = arith.constant dense<0.000000e+00> : vector<8x384xf32>
    %370 = tpu.matmul %368, %369, %cst_121 {dimension_numbers = #tpu.dot_dimension_numbers<[1], [0], [0], [1], [0, 0, 1, 1], [], []>} : vector<8x128xbf16>, vector<128x384xbf16>, vector<8x384xf32> -> vector<8x384xf32>
    %371 = vector.extract_strided_slice %367 {offsets = [0, 0], sizes = [8, 256], strides = [1, 1]} : vector<8x384xf32> to vector<8x256xf32>
    %372 = vector.extract_strided_slice %370 {offsets = [0, 0], sizes = [8, 256], strides = [1, 1]} : vector<8x384xf32> to vector<8x256xf32>
    %373 = arith.addf %371, %372 : vector<8x256xf32>
    %374 = arith.negf %373 : vector<8x256xf32>
    %375 = math.exp %374 : vector<8x256xf32>
    %cst_122 = arith.constant 1.000000e+00 : f32
    %376 = vector.broadcast %cst_122 : f32 to vector<8x256xf32>
    %377 = arith.addf %376, %375 : vector<8x256xf32>
    %378 = arith.divf %376, %377 : vector<8x256xf32>
    %379 = vector.extract_strided_slice %378 {offsets = [0, 0], sizes = [8, 128], strides = [1, 1]} : vector<8x256xf32> to vector<8x128xf32>
    %380 = vector.extract_strided_slice %378 {offsets = [0, 128], sizes = [8, 128], strides = [1, 1]} : vector<8x256xf32> to vector<8x128xf32>
    %381 = vector.extract_strided_slice %367 {offsets = [0, 256], sizes = [8, 128], strides = [1, 1]} : vector<8x384xf32> to vector<8x128xf32>
    %382 = vector.extract_strided_slice %370 {offsets = [0, 256], sizes = [8, 128], strides = [1, 1]} : vector<8x384xf32> to vector<8x128xf32>
    %383 = arith.addf %382, %249 : vector<8x128xf32>
    %384 = arith.mulf %379, %383 : vector<8x128xf32>
    %385 = arith.addf %381, %384 : vector<8x128xf32>
    %386 = math.tanh %385 : vector<8x128xf32>
    %387 = arith.subf %361, %386 : vector<8x128xf32>
    %388 = arith.mulf %380, %387 : vector<8x128xf32>
    %389 = arith.addf %386, %388 : vector<8x128xf32>
    %390 = arith.index_cast %365 : i32 to index
    %c0_123 = arith.constant 0 : index
    %391 = vector.load %arg16[%390, %c0_123] : memref<64x128xf32, #tpu.memory_space<vmem>>, vector<8x128xf32>
    tpu.vector_store %arg16[%390, %c0_123], %389 {strides = array<i32>} : memref<64x128xf32, #tpu.memory_space<vmem>>, vector<8x128xf32>,
    %c5_i32_124 = arith.constant 5 : i32
    %c8_i32_125 = arith.constant 8 : i32
    %392 = arith.muli %c5_i32_124, %c8_i32_125 : i32
    %393 = tpu.assume_multiple %392, 8 : i32
    %394 = arith.index_cast %393 : i32 to index
    %c0_126 = arith.constant 0 : index
    %395 = vector.load %arg14[%394, %c0_126] : memref<64x384xf32, #tpu.memory_space<vmem>>, vector<8x384xf32>
    %396 = arith.truncf %389 : vector<8x128xf32> to vector<8x128xbf16>
    %c0_127 = arith.constant 0 : index
    %c0_128 = arith.constant 0 : index
    %397 = vector.load %arg7[%c0_127, %c0_128] : memref<128x384xbf16, #tpu.memory_space<vmem>>, vector<128x384xbf16>
    %cst_129 = arith.constant dense<0.000000e+00> : vector<8x384xf32>
    %398 = tpu.matmul %396, %397, %cst_129 {dimension_numbers = #tpu.dot_dimension_numbers<[1], [0], [0], [1], [0, 0, 1, 1], [], []>} : vector<8x128xbf16>, vector<128x384xbf16>, vector<8x384xf32> -> vector<8x384xf32>
    %399 = vector.extract_strided_slice %395 {offsets = [0, 0], sizes = [8, 256], strides = [1, 1]} : vector<8x384xf32> to vector<8x256xf32>
    %400 = vector.extract_strided_slice %398 {offsets = [0, 0], sizes = [8, 256], strides = [1, 1]} : vector<8x384xf32> to vector<8x256xf32>
    %401 = arith.addf %399, %400 : vector<8x256xf32>
    %402 = arith.negf %401 : vector<8x256xf32>
    %403 = math.exp %402 : vector<8x256xf32>
    %cst_130 = arith.constant 1.000000e+00 : f32
    %404 = vector.broadcast %cst_130 : f32 to vector<8x256xf32>
    %405 = arith.addf %404, %403 : vector<8x256xf32>
    %406 = arith.divf %404, %405 : vector<8x256xf32>
    %407 = vector.extract_strided_slice %406 {offsets = [0, 0], sizes = [8, 128], strides = [1, 1]} : vector<8x256xf32> to vector<8x128xf32>
    %408 = vector.extract_strided_slice %406 {offsets = [0, 128], sizes = [8, 128], strides = [1, 1]} : vector<8x256xf32> to vector<8x128xf32>
    %409 = vector.extract_strided_slice %395 {offsets = [0, 256], sizes = [8, 128], strides = [1, 1]} : vector<8x384xf32> to vector<8x128xf32>
    %410 = vector.extract_strided_slice %398 {offsets = [0, 256], sizes = [8, 128], strides = [1, 1]} : vector<8x384xf32> to vector<8x128xf32>
    %411 = arith.addf %410, %249 : vector<8x128xf32>
    %412 = arith.mulf %407, %411 : vector<8x128xf32>
    %413 = arith.addf %409, %412 : vector<8x128xf32>
    %414 = math.tanh %413 : vector<8x128xf32>
    %415 = arith.subf %389, %414 : vector<8x128xf32>
    %416 = arith.mulf %408, %415 : vector<8x128xf32>
    %417 = arith.addf %414, %416 : vector<8x128xf32>
    %418 = arith.index_cast %393 : i32 to index
    %c0_131 = arith.constant 0 : index
    %419 = vector.load %arg16[%418, %c0_131] : memref<64x128xf32, #tpu.memory_space<vmem>>, vector<8x128xf32>
    tpu.vector_store %arg16[%418, %c0_131], %417 {strides = array<i32>} : memref<64x128xf32, #tpu.memory_space<vmem>>, vector<8x128xf32>,
    %c6_i32_132 = arith.constant 6 : i32
    %c8_i32_133 = arith.constant 8 : i32
    %420 = arith.muli %c6_i32_132, %c8_i32_133 : i32
    %421 = tpu.assume_multiple %420, 8 : i32
    %422 = arith.index_cast %421 : i32 to index
    %c0_134 = arith.constant 0 : index
    %423 = vector.load %arg14[%422, %c0_134] : memref<64x384xf32, #tpu.memory_space<vmem>>, vector<8x384xf32>
    %424 = arith.truncf %417 : vector<8x128xf32> to vector<8x128xbf16>
    %c0_135 = arith.constant 0 : index
    %c0_136 = arith.constant 0 : index
    %425 = vector.load %arg7[%c0_135, %c0_136] : memref<128x384xbf16, #tpu.memory_space<vmem>>, vector<128x384xbf16>
    %cst_137 = arith.constant dense<0.000000e+00> : vector<8x384xf32>
    %426 = tpu.matmul %424, %425, %cst_137 {dimension_numbers = #tpu.dot_dimension_numbers<[1], [0], [0], [1], [0, 0, 1, 1], [], []>} : vector<8x128xbf16>, vector<128x384xbf16>, vector<8x384xf32> -> vector<8x384xf32>
    %427 = vector.extract_strided_slice %423 {offsets = [0, 0], sizes = [8, 256], strides = [1, 1]} : vector<8x384xf32> to vector<8x256xf32>
    %428 = vector.extract_strided_slice %426 {offsets = [0, 0], sizes = [8, 256], strides = [1, 1]} : vector<8x384xf32> to vector<8x256xf32>
    %429 = arith.addf %427, %428 : vector<8x256xf32>
    %430 = arith.negf %429 : vector<8x256xf32>
    %431 = math.exp %430 : vector<8x256xf32>
    %cst_138 = arith.constant 1.000000e+00 : f32
    %432 = vector.broadcast %cst_138 : f32 to vector<8x256xf32>
    %433 = arith.addf %432, %431 : vector<8x256xf32>
    %434 = arith.divf %432, %433 : vector<8x256xf32>
    %435 = vector.extract_strided_slice %434 {offsets = [0, 0], sizes = [8, 128], strides = [1, 1]} : vector<8x256xf32> to vector<8x128xf32>
    %436 = vector.extract_strided_slice %434 {offsets = [0, 128], sizes = [8, 128], strides = [1, 1]} : vector<8x256xf32> to vector<8x128xf32>
    %437 = vector.extract_strided_slice %423 {offsets = [0, 256], sizes = [8, 128], strides = [1, 1]} : vector<8x384xf32> to vector<8x128xf32>
    %438 = vector.extract_strided_slice %426 {offsets = [0, 256], sizes = [8, 128], strides = [1, 1]} : vector<8x384xf32> to vector<8x128xf32>
    %439 = arith.addf %438, %249 : vector<8x128xf32>
    %440 = arith.mulf %435, %439 : vector<8x128xf32>
    %441 = arith.addf %437, %440 : vector<8x128xf32>
    %442 = math.tanh %441 : vector<8x128xf32>
    %443 = arith.subf %417, %442 : vector<8x128xf32>
    %444 = arith.mulf %436, %443 : vector<8x128xf32>
    %445 = arith.addf %442, %444 : vector<8x128xf32>
    %446 = arith.index_cast %421 : i32 to index
    %c0_139 = arith.constant 0 : index
    %447 = vector.load %arg16[%446, %c0_139] : memref<64x128xf32, #tpu.memory_space<vmem>>, vector<8x128xf32>
    tpu.vector_store %arg16[%446, %c0_139], %445 {strides = array<i32>} : memref<64x128xf32, #tpu.memory_space<vmem>>, vector<8x128xf32>,
    %c7_i32_140 = arith.constant 7 : i32
    %c8_i32_141 = arith.constant 8 : i32
    %448 = arith.muli %c7_i32_140, %c8_i32_141 : i32
    %449 = tpu.assume_multiple %448, 8 : i32
    %450 = arith.index_cast %449 : i32 to index
    %c0_142 = arith.constant 0 : index
    %451 = vector.load %arg14[%450, %c0_142] : memref<64x384xf32, #tpu.memory_space<vmem>>, vector<8x384xf32>
    %452 = arith.truncf %445 : vector<8x128xf32> to vector<8x128xbf16>
    %c0_143 = arith.constant 0 : index
    %c0_144 = arith.constant 0 : index
    %453 = vector.load %arg7[%c0_143, %c0_144] : memref<128x384xbf16, #tpu.memory_space<vmem>>, vector<128x384xbf16>
    %cst_145 = arith.constant dense<0.000000e+00> : vector<8x384xf32>
    %454 = tpu.matmul %452, %453, %cst_145 {dimension_numbers = #tpu.dot_dimension_numbers<[1], [0], [0], [1], [0, 0, 1, 1], [], []>} : vector<8x128xbf16>, vector<128x384xbf16>, vector<8x384xf32> -> vector<8x384xf32>
    %455 = vector.extract_strided_slice %451 {offsets = [0, 0], sizes = [8, 256], strides = [1, 1]} : vector<8x384xf32> to vector<8x256xf32>
    %456 = vector.extract_strided_slice %454 {offsets = [0, 0], sizes = [8, 256], strides = [1, 1]} : vector<8x384xf32> to vector<8x256xf32>
    %457 = arith.addf %455, %456 : vector<8x256xf32>
    %458 = arith.negf %457 : vector<8x256xf32>
    %459 = math.exp %458 : vector<8x256xf32>
    %cst_146 = arith.constant 1.000000e+00 : f32
    %460 = vector.broadcast %cst_146 : f32 to vector<8x256xf32>
    %461 = arith.addf %460, %459 : vector<8x256xf32>
    %462 = arith.divf %460, %461 : vector<8x256xf32>
    %463 = vector.extract_strided_slice %462 {offsets = [0, 0], sizes = [8, 128], strides = [1, 1]} : vector<8x256xf32> to vector<8x128xf32>
    %464 = vector.extract_strided_slice %462 {offsets = [0, 128], sizes = [8, 128], strides = [1, 1]} : vector<8x256xf32> to vector<8x128xf32>
    %465 = vector.extract_strided_slice %451 {offsets = [0, 256], sizes = [8, 128], strides = [1, 1]} : vector<8x384xf32> to vector<8x128xf32>
    %466 = vector.extract_strided_slice %454 {offsets = [0, 256], sizes = [8, 128], strides = [1, 1]} : vector<8x384xf32> to vector<8x128xf32>
    %467 = arith.addf %466, %249 : vector<8x128xf32>
    %468 = arith.mulf %463, %467 : vector<8x128xf32>
    %469 = arith.addf %465, %468 : vector<8x128xf32>
    %470 = math.tanh %469 : vector<8x128xf32>
    %471 = arith.subf %445, %470 : vector<8x128xf32>
    %472 = arith.mulf %464, %471 : vector<8x128xf32>
    %473 = arith.addf %470, %472 : vector<8x128xf32>
    %474 = arith.index_cast %449 : i32 to index
    %c0_147 = arith.constant 0 : index
    %475 = vector.load %arg16[%474, %c0_147] : memref<64x128xf32, #tpu.memory_space<vmem>>, vector<8x128xf32>
    tpu.vector_store %arg16[%474, %c0_147], %473 {strides = array<i32>} : memref<64x128xf32, #tpu.memory_space<vmem>>, vector<8x128xf32>,
    %c8_i32_148 = arith.constant 8 : i32
    %c1_149 = arith.constant 1 : index
    %c0_150 = arith.constant 0 : index
    %c0_151 = arith.constant 0 : index
    %476 = vector.load %arg13[%c1_149, %c0_150, %c0_151] : memref<2x8x128xf32, #tpu.memory_space<vmem>>, vector<1x8x128xf32>
    %477 = vector.shape_cast %476 : vector<1x8x128xf32> to vector<8x128xf32>
    %478 = vector.shape_cast %473 : vector<8x128xf32> to vector<1x8x128xf32>
    tpu.vector_store %arg13[%c1_149, %c0_150, %c0_151], %478 {strides = array<i32>} : memref<2x8x128xf32, #tpu.memory_space<vmem>>, vector<1x8x128xf32>,
    %c0_152 = arith.constant 0 : index
    %c0_153 = arith.constant 0 : index
    %479 = vector.load %arg16[%c0_152, %c0_153] : memref<64x128xf32, #tpu.memory_space<vmem>>, vector<64x128xf32>
    %480 = arith.truncf %479 : vector<64x128xf32> to vector<64x128xbf16>
    %c0_154 = arith.constant 0 : index
    %c0_155 = arith.constant 0 : index
    %481 = vector.load %arg10[%c0_154, %c0_155] : memref<128x128xbf16, #tpu.memory_space<vmem>>, vector<128x128xbf16>
    %cst_156 = arith.constant dense<0.000000e+00> : vector<64x128xf32>
    %482 = tpu.matmul %480, %481, %cst_156 {dimension_numbers = #tpu.dot_dimension_numbers<[1], [0], [0], [1], [0, 0, 1, 1], [], []>} : vector<64x128xbf16>, vector<128x128xbf16>, vector<64x128xf32> -> vector<64x128xf32>
    %c0_157 = arith.constant 0 : index
    %c0_158 = arith.constant 0 : index
    %483 = vector.load %arg11[%c0_157, %c0_158] : memref<1x128xf32, #tpu.memory_space<vmem>>, vector<1x128xf32>
    %484 = vector.broadcast %483 : vector<1x128xf32> to vector<64x128xf32>
    %485 = arith.addf %482, %484 : vector<64x128xf32>
    %c0_159 = arith.constant 0 : index
    %c0_160 = arith.constant 0 : index
    %486 = vector.load %arg12[%c0_159, %c0_160] : memref<64x128xf32, #tpu.memory_space<vmem>>, vector<64x128xf32>
    tpu.vector_store %arg12[%c0_159, %c0_160], %485 {strides = array<i32>} : memref<64x128xf32, #tpu.memory_space<vmem>>, vector<64x128xf32>,
    return
  }
}

</mosaic_0001>

<bundles_post_ra>
// kernel: tpu_custom_call.1
= control target key start
LH: loop header
LB: loop body
LE: loop exit
PB: predicated region body
PF: predicated region fallthrough
CT: control target
= control target key end

     0   :  { %19 = vsyncpa [#allocation6], 0  ;;  %s8132_s0 = inlined_call_operand.hbm [shape: bf16[64,128], index: 0, kind: input, shape index: {}]   ;;  %s8133_s1 = inlined_call_operand.hbm [shape: f32[2,8,128], index: 1, kind: input, shape index: {}]   ;;  %s8134_s2 = inlined_call_operand.hbm [shape: bf16[128,384], index: 2, kind: input, shape index: {}]   ;;  %s8135_s3 = inlined_call_operand.hbm [shape: bf16[128,384], index: 3, kind: input, shape index: {}]   ;;  %s8136_s4 = inlined_call_operand.vmem [shape: f32[1,384], index: 4, kind: input, shape index: {}]   ;;  %s8137_s5 = inlined_call_operand.vmem [shape: f32[1,128], index: 5, kind: input, shape index: {}]   ;;  %s8138_s6 = inlined_call_operand.hbm [shape: bf16[128,384], index: 6, kind: input, shape index: {}]   ;;  %s8139_s7 = inlined_call_operand.hbm [shape: bf16[128,384], index: 7, kind: input, shape index: {}]   ;;  %s8140_s8 = inlined_call_operand.vmem [shape: f32[1,384], index: 8, kind: input, shape index: {}]   ;;  %s8141_s9 = inlined_call_operand.vmem [shape: f32[1,128], index: 9, kind: input, shape index: {}]   ;;  %s8142_s10 = inlined_call_operand.hbm [shape: bf16[128,128], index: 10, kind: input, shape index: {}]   ;;  %s8143_s11 = inlined_call_operand.vmem [shape: f32[1,128], index: 11, kind: input, shape index: {}]   ;;  %s8144_s12 = inlined_call_operand.hbm [shape: f32[64,128], index: 12, kind: output, shape index: {0}]   ;;  %s8145_s13 = inlined_call_operand.hbm [shape: f32[2,8,128], index: 13, kind: output, shape index: {1}]  }
   0x1   :  { %20 = vsyncpa [#allocation9], 0 }
   0x2   :  { %21 = vsyncpa [#allocation12], 0 }
   0x3   :  { %22 = vsyncpa [#allocation15], 0 }
   0x4   :  { %23 = vsyncpa [#allocation7], 0 }
   0x5   :  { %24 = vsyncpa [#allocation19], 0  ;;  %s7131_s25 = smov [#allocation8]  }
   0x6   :  { %s42_s26 = sshll.u32 %s7131_s25, 4  ;;  %s43_s26 = int_to_ptr.vmem [resolvable:$true] %s42_s26 }
   0x7   :  { %s6947_s27 = scalar_lea.vmem %s43_s26, 256  ;;  %p6952_p1 = scmp.lt.s32.totalorder %s43_s26, %s43_s26 }
   0x8   :  { %p6948_p0 = scmp.ne.s32.totalorder %s43_s26, %s6947_s27  ;;  %p6953_p2 = scmp.lt.s32.totalorder %s6947_s27, %s6947_s27 }
   0xa   :  { %p6954_p3 = por %p6953_p2, %p6952_p1 }
   0xc   :  { %p6955_p4 = pnand %p6954_p3, %p6948_p0 }
   0xe   :  { %6958 = shalt.err (!%p6955_p4)
}
   0xf   :  { %s7132_s28 = smov 128   ;;  %s7133_s29 = smov 8  }
  0x10   :  { %48 = dma.hbm_to_vmem [thread:$0]  %s8133_s1, 256, %s43_s26, [#allocation9], %s7132_s28, %s7132_s28, %s7133_s29  }
  0x11   :  { %s7134_s15 = smov [#allocation11]   ;;  %s7135_s17 = smov [#allocation14]  }
  0x12   :  { %s66_s16 = sshll.u32 %s7134_s15, 4  ;;  %s94_s18 = sshll.u32 %s7135_s17, 4  ;;  %s67_s16 = int_to_ptr.vmem [resolvable:$true] %s66_s16  ;;  %s95_s18 = int_to_ptr.vmem [resolvable:$true] %s94_s18 }
  0x13   :  { %s6967_s19 = scalar_lea.vmem %s67_s16, 3072  ;;  %p6972_p6 = scmp.lt.s32.totalorder %s67_s16, %s67_s16 }
  0x14   :  { %p6968_p5 = scmp.ne.s32.totalorder %s67_s16, %s6967_s19  ;;  %p6973_p7 = scmp.lt.s32.totalorder %s6967_s19, %s6967_s19 }
  0x16   :  { %p6974_p8 = por %p6973_p7, %p6972_p6 }
  0x18   :  { %p6975_p9 = pnand %p6974_p8, %p6968_p5 }
  0x1a   :  { %6978 = shalt.err (!%p6975_p9)
}
  0x1b   :  { %s7136_s20 = smov 192   ;;  %s7137_s21 = smov 12  }
  0x1c   :  { %72 = dma.hbm_to_vmem [thread:$0]  %s8135_s3, 3072, %s67_s16, [#allocation12], %s7136_s20, %s7136_s20, %s7137_s21  }
  0x1d   :  { %s6987_s1 = scalar_lea.vmem %s95_s18, 3072  ;;  %p6992_p11 = scmp.lt.s32.totalorder %s95_s18, %s95_s18 }
  0x1e   :  { %p6988_p10 = scmp.ne.s32.totalorder %s95_s18, %s6987_s1  ;;  %p6993_p12 = scmp.lt.s32.totalorder %s6987_s1, %s6987_s1 }
  0x20   :  { %p6994_p13 = por %p6993_p12, %p6992_p11 }
  0x22   :  { %p6995_p0 = pnand %p6994_p13, %p6988_p10 }
  0x24   :  { %6998 = shalt.err (!%p6995_p0)
}
  0x25   :  { %100 = dma.hbm_to_vmem [thread:$0]  %s8139_s7, 3072, %s95_s18, [#allocation15], %s7136_s20, %s7136_s20, %s7137_s21  }
  0x26   :  { %s7138_s26 = smov [#allocation5]  }
  0x27   :  { %s30_s27 = sshll.u32 %s7138_s26, 4  ;;  %s31_s27 = int_to_ptr.vmem [resolvable:$true] %s30_s27 }
  0x28   :  { %s7007_s30 = scalar_lea.vmem %s31_s27, 512  ;;  %p7012_p2 = scmp.lt.s32.totalorder %s31_s27, %s31_s27 }
  0x29   :  { %p7008_p1 = scmp.ne.s32.totalorder %s31_s27, %s7007_s30  ;;  %p7013_p3 = scmp.lt.s32.totalorder %s7007_s30, %s7007_s30 }
  0x2b   :  { %p7014_p4 = por %p7013_p3, %p7012_p2 }
  0x2d   :  { %p7015_p5 = pnand %p7014_p4, %p7008_p1 }
  0x2f   :  { %7018 = shalt.err (!%p7015_p5)
}
  0x30   :  { %s7139_s3 = smov 64   ;;  %s7140_s14 = smov 4  }
  0x31   :  { %36 = dma.hbm_to_vmem [thread:$0]  %s8132_s0, 512, %s31_s27, [#allocation6], %s7139_s3, %s7139_s3, %s7140_s14  }
  0x32   :  { %s7141_s7 = smov [#allocation10]   ;;  %s7142_s18 = smov [#allocation13]  }
  0x33   :  { %s54_s17 = sshll.u32 %s7141_s7, 4  ;;  %s82_s19 = sshll.u32 %s7142_s18, 4  ;;  %s55_s17 = int_to_ptr.vmem [resolvable:$true] %s54_s17  ;;  %s83_s19 = int_to_ptr.vmem [resolvable:$true] %s82_s19 }
  0x34   :  { %s7027_s22 = scalar_lea.vmem %s55_s17, 3072  ;;  %p7032_p7 = scmp.lt.s32.totalorder %s55_s17, %s55_s17 }
  0x35   :  { %p7028_p6 = scmp.ne.s32.totalorder %s55_s17, %s7027_s22  ;;  %p7033_p8 = scmp.lt.s32.totalorder %s7027_s22, %s7027_s22 }
  0x37   :  { %p7034_p9 = por %p7033_p8, %p7032_p7 }
  0x39   :  { %p7035_p10 = pnand %p7034_p9, %p7028_p6 }
  0x3b   :  { %7038 = shalt.err (!%p7035_p10)
}
  0x3c   :  { %60 = dma.hbm_to_vmem [thread:$0]  %s8134_s2, 3072, %s55_s17, [#allocation9], %s7136_s20, %s7136_s20, %s7137_s21  }
  0x3d   :  { %s7047_s0 = scalar_lea.vmem %s83_s19, 3072  ;;  %p7052_p12 = scmp.lt.s32.totalorder %s83_s19, %s83_s19 }
  0x3e   :  { %p7048_p11 = scmp.ne.s32.totalorder %s83_s19, %s7047_s0  ;;  %p7053_p13 = scmp.lt.s32.totalorder %s7047_s0, %s7047_s0 }
  0x40   :  { %p7054_p0 = por %p7053_p13, %p7052_p12 }
  0x42   :  { %p7055_p1 = pnand %p7054_p0, %p7048_p11 }
  0x44   :  { %7058 = shalt.err (!%p7055_p1)
}
  0x45   :  { %88 = dma.hbm_to_vmem [thread:$0]  %s8138_s6, 3072, %s83_s19, [#allocation12], %s7136_s20, %s7136_s20, %s7137_s21  }
  0x46   :  { %s7143_s26 = smov [#allocation16]  }
  0x47   :  { %s110_s27 = sshll.u32 %s7143_s26, 4  ;;  %s111_s27 = int_to_ptr.vmem [resolvable:$true] %s110_s27 }
  0x48   :  { %s7067_s30 = scalar_lea.vmem %s111_s27, 1024  ;;  %p7072_p3 = scmp.lt.s32.totalorder %s111_s27, %s111_s27 }
  0x49   :  { %p7068_p2 = scmp.ne.s32.totalorder %s111_s27, %s7067_s30  ;;  %p7073_p4 = scmp.lt.s32.totalorder %s7067_s30, %s7067_s30 }
  0x4b   :  { %p7074_p5 = por %p7073_p4, %p7072_p3 }
  0x4d   :  { %p7075_p6 = pnand %p7074_p5, %p7068_p2 }
  0x4f   :  { %7078 = shalt.err (!%p7075_p6)
}
  0x50   :  { %116 = dma.hbm_to_vmem [thread:$0]  %s8142_s10, 1024, %s111_s27, [#allocation15], %s7139_s3, %s7139_s3, %s7140_s14  }
  0x51   :  { %7119 = dma.done.wait [#allocation6], 512  }
  0x52   :  { %7120 = vsyncadd [#allocation6], 4294966784 }
  0x53   :  { %7121 = dma.done.wait [#allocation9], 3328  }
  0x54   :  { %7122 = vsyncadd [#allocation9], 4294963968 }
  0x55   :  { %7123 = dma.done.wait [#allocation12], 6144  }
  0x56   :  { %7124 = vsyncadd [#allocation12], 4294961152 }
  0x57   :  { %7125 = dma.done.wait [#allocation15], 4096  }
  0x58   :  { %7126 = vsyncadd [#allocation15], 4294963200  ;;  %v7144_v0 = vmov 0   ;;  %v6461_v1 = vld [vmem:[#allocation10 + $0xac] ss:$12 sps:$4 sm:$0xff]   ;;  %v527_v28 = vld [vmem:[#allocation11] sm:$0xff] }
  0x59   :  { %382 = vmatprep.mubr.bf16.mxu1 %v7144_v0  ;;  %719 = vmatprep.mubr.bf16.mxu0 %v7144_v0  ;;  %v6463_v2 = vld [vmem:[#allocation10 + $0xa8] ss:$12 sps:$4 sm:$0xff]   ;;  %v7263_v3 = vld [vmem:[#allocation11 + $0xac] ss:$12 sps:$4 sm:$0xff]   ;;  %v6469_v6 = vld [vmem:[#allocation10 + $0x90] ss:$12 sps:$4 sm:$0xff]  }
  0x5a   :  { %350 = vmatprep.subr.bf16.mxu1 %v6461_v1  ;;  %v7265_v4 = vld [vmem:[#allocation11 + $0xa8] ss:$12 sps:$4 sm:$0xff]   ;;  %687 = vmatprep.subr.bf16.mxu0 %v7263_v3  ;;  %v7271_v8 = vld [vmem:[#allocation11 + $0x90] ss:$12 sps:$4 sm:$0xff]   ;;  %v6475_v10 = vld [vmem:[#allocation10 + $0x78] ss:$12 sps:$4 sm:$0xff]  }
  0x5b   :  { %351 = vmatpush1.bf16.msra.mxu1 %v6463_v2  ;;  %v6467_v5 = vld [vmem:[#allocation10 + $0x94] ss:$12 sps:$4 sm:$0xff]   ;;  %688 = vmatpush1.bf16.msra.mxu0 %v7265_v4  ;;  %v6473_v9 = vld [vmem:[#allocation10 + $0x7c] ss:$12 sps:$4 sm:$0xff]   ;;  %v6479_v12 = vld [vmem:[#allocation10 + $0x64] ss:$12 sps:$4 sm:$0xff]  }
  0x5c   :  { %v7268_v7 = vld [vmem:[#allocation11 + $0x94] ss:$12 sps:$4 sm:$0xff]   ;;  %352 = vmatprep.subr.bf16.mxu1 %v6467_v5  ;;  %v7274_v11 = vld [vmem:[#allocation11 + $0x7c] ss:$12 sps:$4 sm:$0xff]   ;;  %v7277_v13 = vld [vmem:[#allocation11 + $0x78] ss:$12 sps:$4 sm:$0xff]  }
  0x5d   :  { %689 = vmatprep.subr.bf16.mxu0 %v7268_v7  ;;  %v7280_v14 = vld [vmem:[#allocation11 + $0x64] ss:$12 sps:$4 sm:$0xff]   ;;  %v6481_v15 = vld [vmem:[#allocation10 + $0x60] ss:$12 sps:$4 sm:$0xff]   ;;  %v6487_v19 = vld [vmem:[#allocation10 + $0x48] ss:$12 sps:$4 sm:$0xff]  }
  0x5e   :  { %v6485_v16 = vld [vmem:[#allocation10 + $0x4c] ss:$12 sps:$4 sm:$0xff]   ;;  %v6491_v20 = vld [vmem:[#allocation10 + $0x34] ss:$12 sps:$4 sm:$0xff]   ;;  %v6493_v23 = vld [vmem:[#allocation10 + $0x30] ss:$12 sps:$4 sm:$0xff]  }
  0x5f   :  { %353 = vmatpush1.bf16.msra.mxu1 %v6469_v6  ;;  %690 = vmatpush1.bf16.msra.mxu0 %v7271_v8  ;;  %v7283_v17 = vld [vmem:[#allocation11 + $0x60] ss:$12 sps:$4 sm:$0xff]   ;;  %v7289_v21 = vld [vmem:[#allocation11 + $0x48] ss:$12 sps:$4 sm:$0xff]   ;;  %v7294_v24 = vld [vmem:[#allocation11 + $0x30] ss:$12 sps:$4 sm:$0xff]  }
  0x60   :  { %354 = vmatprep.subr.bf16.mxu1 %v6473_v9  ;;  %691 = vmatprep.subr.bf16.mxu0 %v7274_v11  ;;  %v7286_v18 = vld [vmem:[#allocation11 + $0x4c] ss:$12 sps:$4 sm:$0xff]   ;;  %v7292_v22 = vld [vmem:[#allocation11 + $0x34] ss:$12 sps:$4 sm:$0xff]   ;;  %v6497_v25 = vld [vmem:[#allocation10 + $0x1c] ss:$12 sps:$4 sm:$0xff]  }
  0x61   :  { %v6499_v26 = vld [vmem:[#allocation10 + $0x18] ss:$12 sps:$4 sm:$0xff]   ;;  %v7298_v27 = vld [vmem:[#allocation11 + $0x1c] ss:$12 sps:$4 sm:$0xff]   ;;  %v529_v29 = vld [vmem:[#allocation11 + $0xc] sm:$0xff]  ;;  %v7145_v50 = vmov 0.0  }
  0x62   :  { %v6503_v30 = vld [vmem:[#allocation10 + $0x4] ss:$12 sps:$4 sm:$0xff]   ;;  %v7304_v32 = vcombine.high %v527_v28, %v529_v29  ;;  %v6505_v33 = vld [vmem:[#allocation10] ss:$12 sps:$4 sm:$0xff]   ;;  %v7307_v35 = vcombine.low %v527_v28, %v529_v29  ;;  %v6511_v41 = vld [vmem:[#allocation5 + $0x8] sm:$0xff]   ;;  %vm7146_vm0 = vmmov 0  }
  0x63   :  { %355 = vmatpush1.bf16.msra.mxu1 %v6475_v10  ;;  %692 = vmatpush1.bf16.msra.mxu0 %v7277_v13  ;;  %v7301_v31 = vld [vmem:[#allocation11 + $0x18] ss:$12 sps:$4 sm:$0xff]   ;;  %v6509_v34 = vld [vmem:[#allocation10 + $0xb0] ss:$12 sps:$4 sm:$0xff]   ;;  %v6512_v40 = vld [vmem:[#allocation10 + $0x80] ss:$12 sps:$4 sm:$0xff]  }
  0x64   :  { %356 = vmatprep.subr.bf16.mxu1 %v6479_v12  ;;  %693 = vmatprep.subr.bf16.mxu0 %v7280_v14  ;;  %v519_v36 = vld [vmem:[#allocation8] sm:$0xff]  ;;  %v6510_v39 = vld [vmem:[#allocation10 + $0x98] ss:$12 sps:$4 sm:$0xff]   ;;  %v6518_v46 = vld [vmem:[#allocation10 + $0x20] ss:$12 sps:$4 sm:$0xff]  }
  0x65   :  { %v6508_v37 = vld [vmem:[#allocation5] sm:$0xff]   ;;  %v7310_v38 = vpack.c.bf16 %v519_v36, %v519_v36  ;;  %v6514_v44 = vld [vmem:[#allocation5 + $0x10] sm:$0xff]   ;;  %v6517_v47 = vld [vmem:[#allocation5 + $0x18] sm:$0xff]  }
  0x66   :  { %v6513_v42 = vld [vmem:[#allocation10 + $0x68] ss:$12 sps:$4 sm:$0xff]   ;;  %v6515_v43 = vld [vmem:[#allocation10 + $0x50] ss:$12 sps:$4 sm:$0xff]   ;;  %v6516_v45 = vld [vmem:[#allocation10 + $0x38] ss:$12 sps:$4 sm:$0xff]  }
  0x67   :  { %357 = vmatpush1.bf16.msra.mxu1 %v6481_v15  ;;  %694 = vmatpush1.bf16.msra.mxu0 %v7283_v17  ;;  %v6519_v48 = vld [vmem:[#allocation10 + $0x8] ss:$12 sps:$4 sm:$0xff]   ;;  %v6520_v49 = vld [vmem:[#allocation11 + $0xb0] ss:$12 sps:$4 sm:$0xff]   ;;  %v6521_v51 = vld [vmem:[#allocation11 + $0x98] ss:$12 sps:$4 sm:$0xff]  }
  0x68   :  { %358 = vmatprep.subr.bf16.mxu1 %v6485_v16  ;;  %695 = vmatprep.subr.bf16.mxu0 %v7286_v18  ;;  %v6522_v52 = vld [vmem:[#allocation11 + $0x80] ss:$12 sps:$4 sm:$0xff]   ;;  %v6523_v53 = vld [vmem:[#allocation11 + $0x68] ss:$12 sps:$4 sm:$0xff]   ;;  %v6524_v54 = vld [vmem:[#allocation11 + $0x50] ss:$12 sps:$4 sm:$0xff]  }
  0x69   :  { %v6525_v55 = vld [vmem:[#allocation11 + $0x38] ss:$12 sps:$4 sm:$0xff]   ;;  %v6526_v56 = vld [vmem:[#allocation11 + $0x20] ss:$12 sps:$4 sm:$0xff]   ;;  %v6527_v57 = vld [vmem:[#allocation11 + $0x8] ss:$12 sps:$4 sm:$0xff]  }
  0x6a   :  { %v6528_v58 = vld [vmem:[#allocation11 + $0xb0] ss:$12 sps:$4 sm:$0xff]   ;;  %v6529_v59 = vld [vmem:[#allocation11 + $0x98] ss:$12 sps:$4 sm:$0xff]   ;;  %v6530_v60 = vld [vmem:[#allocation11 + $0x80] ss:$12 sps:$4 sm:$0xff]  }
  0x6b   :  { %359 = vmatpush1.bf16.msra.mxu1 %v6487_v19  ;;  %696 = vmatpush1.bf16.msra.mxu0 %v7289_v21  ;;  %v6531_v61 = vld [vmem:[#allocation11 + $0x68] ss:$12 sps:$4 sm:$0xff]   ;;  %v6532_v62 = vld [vmem:[#allocation11 + $0x50] ss:$12 sps:$4 sm:$0xff]   ;;  %v6533_v63 = vld [vmem:[#allocation11 + $0x38] ss:$12 sps:$4 sm:$0xff]  }
  0x6c   :  { %360 = vmatprep.subr.bf16.mxu1 %v6491_v20  ;;  %697 = vmatprep.subr.bf16.mxu0 %v7292_v22  ;;  %v6534_v1 = vld [vmem:[#allocation11 + $0x20] ss:$12 sps:$4 sm:$0xff]   ;;  %v6535_v2 = vld [vmem:[#allocation11 + $0x8] ss:$12 sps:$4 sm:$0xff]   ;;  %v181_v6 = vld [vmem:[%s8136_s4] sm:$0x7] }
  0x6f   :  { %361 = vmatpush1.bf16.msra.mxu1 %v6493_v23  ;;  %698 = vmatpush1.bf16.msra.mxu0 %v7294_v24 }
  0x70   :  { %362 = vmatprep.subr.bf16.mxu1 %v6497_v25  ;;  %699 = vmatprep.subr.bf16.mxu0 %v7298_v27 }
  0x73   :  { %363 = vmatpush1.bf16.msra.mxu1 %v6499_v26  ;;  %700 = vmatpush1.bf16.msra.mxu0 %v7301_v31 }
  0x74   :  { %364 = vmatprep.subr.bf16.mxu1 %v6503_v30  ;;  %701 = vmatprep.subr.bf16.mxu0 %v7304_v32 }
  0x77   :  { %365 = vmatpush1.bf16.msra.mxu1 %v6505_v33  ;;  %702 = vmatpush1.bf16.msra.mxu0 %v7307_v35 }
  0x78   :  { %6051 = vmatprep.subr.bf16.mxu1 %v6509_v34  ;;  %957 = vmatprep.subr.bf16.mxu0 %v7263_v3 }
  0x7a   :  { %383 = vmatmul.mubr.bf16.vlgmr.msra.gmra.mxu1 %v6508_v37  ;;  %720 = vmatmul.mubr.bf16.vlgmr.msra.gmra.mxu0 %v7310_v38 }
  0x7b   :  { %6052 = vmatpush3.bf16.msra.mxu1 %v6509_v34  ;;  %392 = vmatprep.mubr.bf16.mxu1 %v7144_v0 }
  0x7c   :  { %6053 = vmatprep.subr.bf16.mxu1 %v6510_v39  ;;  %958 = vmatpush1.bf16.msra.mxu0 %v7265_v4 }
  0x7d   :  { %989 = vmatprep.mubr.bf16.mxu0 %v7144_v0  ;;  %959 = vmatprep.subr.bf16.mxu0 %v7268_v7 }
  0x7f   :  { %6054 = vmatpush3.bf16.msra.mxu1 %v6510_v39 }
  0x80   :  { %6055 = vmatprep.subr.bf16.mxu1 %v6512_v40  ;;  %960 = vmatpush1.bf16.msra.mxu0 %v7271_v8 }
  0x81   :  { %961 = vmatprep.subr.bf16.mxu0 %v7274_v11 }
  0x82   :  { %393 = vmatmul.mubr.bf16.gmra.mxu1 %v6511_v41 }
  0x83   :  { %6056 = vmatpush3.bf16.msra.mxu1 %v6512_v40  ;;  %402 = vmatprep.mubr.bf16.mxu1 %v7144_v0 }
  0x84   :  { %6057 = vmatprep.subr.bf16.mxu1 %v6513_v42  ;;  %962 = vmatpush1.bf16.msra.mxu0 %v7277_v13 }
  0x85   :  { %963 = vmatprep.subr.bf16.mxu0 %v7280_v14 }
  0x87   :  { %6058 = vmatpush3.bf16.msra.mxu1 %v6513_v42 }
  0x88   :  { %6059 = vmatprep.subr.bf16.mxu1 %v6515_v43  ;;  %964 = vmatpush1.bf16.msra.mxu0 %v7283_v17 }
  0x89   :  { %965 = vmatprep.subr.bf16.mxu0 %v7286_v18 }
  0x8a   :  { %403 = vmatmul.mubr.bf16.gmra.mxu1 %v6514_v44 }
  0x8b   :  { %6060 = vmatpush3.bf16.msra.mxu1 %v6515_v43  ;;  %412 = vmatprep.mubr.bf16.mxu1 %v7144_v0 }
  0x8c   :  { %6061 = vmatprep.subr.bf16.mxu1 %v6516_v45  ;;  %966 = vmatpush1.bf16.msra.mxu0 %v7289_v21 }
  0x8d   :  { %967 = vmatprep.subr.bf16.mxu0 %v7292_v22 }
  0x8f   :  { %6062 = vmatpush3.bf16.msra.mxu1 %v6516_v45 }
  0x90   :  { %6063 = vmatprep.subr.bf16.mxu1 %v6518_v46  ;;  %968 = vmatpush1.bf16.msra.mxu0 %v7294_v24 }
  0x91   :  { %969 = vmatprep.subr.bf16.mxu0 %v7298_v27 }
  0x92   :  { %413 = vmatmul.mubr.bf16.gmra.mxu1 %v6517_v47 }
  0x93   :  { %6064 = vmatpush3.bf16.msra.mxu1 %v6518_v46  ;;  %6067 = vmatprep.mubr.bf16.mxu1 %v6508_v37 }
  0x94   :  { %6065 = vmatprep.subr.bf16.mxu1 %v6519_v48  ;;  %970 = vmatpush1.bf16.msra.mxu0 %v7301_v31 }
  0x95   :  { %971 = vmatprep.subr.bf16.mxu0 %v7304_v32 }
  0x97   :  { %6066 = vmatpush3.bf16.msra.mxu1 %v6519_v48 }
  0x98   :  { %6075 = vmatprep.subr.bf16.mxu1 %v7145_v50  ;;  %972 = vmatpush1.bf16.msra.mxu0 %v7307_v35 }
  0x99   :  { %1228 = vmatprep.subr.bf16.mxu0 %v7263_v3  ;;  %v183_v3 = vlaneseq }
  0x9a   :  { %6068 = vmatmul.mubr.bf16.vlgmr.msra.gmra.mxu1 %v6511_v41 }
  0x9b   :  { %6076 = vmatpush3.bf16.msra.mxu1 %v6520_v49  ;;  %6071 = vmatprep.mubr.bf16.mxu1 %v6514_v44  ;;  %v7357_v4 = vshrl.u32 %v183_v3, 7 }
  0x9c   :  { %6077 = vmatprep.subr.bf16.mxu1 %v7145_v50 }
  0x9d   :  { %v185_v5 = vsub.s32 0, %v7357_v4  ;;  %v189_v8 = vsub.s32 1, %v7357_v4  ;;  %v193_v42 = vsub.s32 2, %v7357_v4 }
  0x9f   :  { %6078 = vmatpush3.bf16.msra.mxu1 %v6521_v51  ;;  %v186_v11 = vrot.slane %v181_v6, %v185_v5  ;;  %v190_v14 = vrot.slane %v181_v6, %v189_v8  ;;  %v194_v48 = vrot.slane %v181_v6, %v193_v42 }
  0xa0   :  { %6079 = vmatprep.subr.bf16.mxu1 %v7145_v50 }
  0xa2   :  { %6072 = vmatmul.mubr.bf16.gmra.mxu1 %v6517_v47 }
  0xa3   :  { %6080 = vmatpush3.bf16.msra.mxu1 %v6522_v52  ;;  %6091 = vmatprep.mubr.msk.bf16.mxu1 %vm7146_vm0, %v7145_v50 }
  0xa4   :  { %6081 = vmatprep.subr.bf16.mxu1 %v7145_v50 }
  0xa7   :  { %6082 = vmatpush3.bf16.msra.mxu1 %v6523_v53 }
  0xa8   :  { %6083 = vmatprep.subr.bf16.mxu1 %v7145_v50 }
  0xab   :  { %6084 = vmatpush3.bf16.msra.mxu1 %v6524_v54 }
  0xac   :  { %6085 = vmatprep.subr.bf16.mxu1 %v7145_v50 }
  0xaf   :  { %6086 = vmatpush3.bf16.msra.mxu1 %v6525_v55 }
  0xb0   :  { %6087 = vmatprep.subr.bf16.mxu1 %v7145_v50 }
  0xb3   :  { %6088 = vmatpush3.bf16.msra.mxu1 %v6526_v56 }
  0xb4   :  { %6089 = vmatprep.subr.bf16.mxu1 %v7145_v50 }
  0xb7   :  { %6090 = vmatpush3.bf16.msra.mxu1 %v6527_v57 }
  0xb8   :  { %6095 = vmatprep.subr.bf16.mxu1 %v7145_v50 }
  0xba   :  { %6092 = vmatmul.mubr.bf16.vlgmr.msra.gmra.mxu1 %v7310_v38 }
  0xbb   :  { %6111 = vmatprep.mubr.msk.bf16.mxu1 %vm7146_vm0, %v7145_v50  ;;  %6096 = vmatpush3.bf16.msra.mxu1 %v6528_v58 }
  0xbc   :  { %6097 = vmatprep.subr.bf16.mxu1 %v7145_v50 }
  0xbf   :  { %6098 = vmatpush3.bf16.msra.mxu1 %v6529_v59 }
  0xc0   :  { %6099 = vmatprep.subr.bf16.mxu1 %v7145_v50 }
  0xc3   :  { %6100 = vmatpush3.bf16.msra.mxu1 %v6530_v60 }
  0xc4   :  { %6101 = vmatprep.subr.bf16.mxu1 %v7145_v50 }
  0xc7   :  { %6102 = vmatpush3.bf16.msra.mxu1 %v6531_v61 }
  0xc8   :  { %6103 = vmatprep.subr.bf16.mxu1 %v7145_v50 }
  0xcb   :  { %6104 = vmatpush3.bf16.msra.mxu1 %v6532_v62 }
  0xcc   :  { %6105 = vmatprep.subr.bf16.mxu1 %v7145_v50 }
  0xcf   :  { %6106 = vmatpush3.bf16.msra.mxu1 %v6533_v63 }
  0xd0   :  { %6107 = vmatprep.subr.bf16.mxu1 %v7145_v50 }
  0xd3   :  { %6108 = vmatpush3.bf16.msra.mxu1 %v6534_v1 }
  0xd4   :  { %6109 = vmatprep.subr.bf16.mxu1 %v7145_v50 }
  0xd7   :  { %6110 = vmatpush3.bf16.msra.mxu1 %v6535_v2 }
  0xd8   :  { %6115 = vmatprep.subr.bf16.mxu1 %v7145_v50 }
 0x13a   :  { %v384_v7 = vpop.f32.mrf.mxu1  ;;  %v721_v10 = vpop.f32.mrf.mxu0 }
 0x13b   :  { %v385_v34 = vadd.f32 %v384_v7, %v186_v11 }
 0x13c   :  { %v386_v9 = vpop.f32.mrf.mxu1  ;;  %v723_v13 = vpop.f32.mrf.mxu0 }
 0x13d   :  { %v768_v40 = vadd.f32 %v721_v10, %v385_v34  ;;  %v387_v59 = vadd.f32 %v386_v9, %v190_v14  ;;  %v7416_v9 = vld [vmem:[%s8137_s5] ss:$0 sm:$0xff] }
 0x13e   :  { %v388_v12 = vpop.f32.mrf.mxu1  ;;  %v725_v17 = vpop.f32.mrf.mxu0  ;;  %v6921_v34 = vld [vmem:[#allocation8] sm:$0xff] }
 0x13f   :  { %v7368_v15 = vadd.f32 %v388_v12, %v186_v11  ;;  %v5445_v46 = vmul.f32 -1.442695, %v768_v40  ;;  %v769_v1 = vadd.f32 %v723_v13, %v387_v59  ;;  %v6929_v59 = vld [vmem:[#allocation11 + $0x4c] ss:$12 sps:$4 sm:$0xff]  }
 0x140   :  { %v390_v16 = vpop.f32.mrf.mxu1  ;;  %v726_v20 = vpop.f32.mrf.mxu0 }
 0x141   :  { %v7370_v18 = vadd.f32 %v390_v16, %v190_v14  ;;  %6761 = vpow2.f32 %v5445_v46  ;;  %v6922_v46 = vld [vmem:[#allocation11 + $0xa8] ss:$12 sps:$4 sm:$0xff]  }
 0x142   :  { %v394_v19 = vpop.f32.mrf.mxu1 }
 0x143   :  { %v7372_v21 = vadd.f32 %v394_v19, %v186_v11 }
 0x144   :  { %v396_v22 = vpop.f32.mrf.mxu1 }
 0x145   :  { %v7374_v23 = vadd.f32 %v396_v22, %v190_v14 }
 0x146   :  { %v398_v24 = vpop.f32.mrf.mxu1 }
 0x147   :  { %v7376_v25 = vadd.f32 %v398_v24, %v186_v11 }
 0x148   :  { %v400_v26 = vpop.f32.mrf.mxu1 }
 0x149   :  { %v7378_v27 = vadd.f32 %v400_v26, %v190_v14 }
 0x14a   :  { %v404_v28 = vpop.f32.mrf.mxu1 }
 0x14b   :  { %v7380_v29 = vadd.f32 %v404_v28, %v186_v11 }
 0x14c   :  { %v406_v30 = vpop.f32.mrf.mxu1 }
 0x14d   :  { %v7382_v31 = vadd.f32 %v406_v30, %v190_v14 }
 0x14e   :  { %v408_v33 = vpop.f32.mrf.mxu1  ;;  %v6762_v6 = vpop.eup %6761 }
 0x14f   :  { %v7384_v36 = vadd.f32 %v408_v33, %v186_v11  ;;  %v776_v12 = vadd.f32 1.0, %v6762_v6  ;;  %v6934_v6 = vld [vmem:[#allocation11 + $0x18] ss:$12 sps:$4 sm:$0xff]  }
 0x150   :  { %v410_v37 = vpop.f32.mrf.mxu1 }
 0x151   :  { %v7386_v38 = vadd.f32 %v410_v37, %v190_v14 }
 0x152   :  { %v414_v39 = vpop.f32.mrf.mxu1 }
 0x153   :  { %v7388_v41 = vadd.f32 %v414_v39, %v186_v11 }
 0x154   :  { %v416_v43 = vpop.f32.mrf.mxu1 }
 0x155   :  { %v7391_v44 = vadd.f32 %v416_v43, %v190_v14 }
 0x156   :  { %v418_v45 = vpop.f32.mrf.mxu1 }
 0x157   :  { %v7393_v47 = vadd.f32 %v418_v45, %v186_v11  ;;  %v5446_v11 = vmul.f32 -1.442695, %v769_v1  ;;  %v6932_v1 = vld [vmem:[#allocation11 + $0x30] ss:$12 sps:$4 sm:$0xff]  }
 0x158   :  { %v420_v49 = vpop.f32.mrf.mxu1 }
 0x159   :  { %v7397_v51 = vadd.f32 %v420_v49, %v190_v14  ;;  %6763 = vpow2.f32 %v5446_v11  ;;  %v6924_v49 = vld [vmem:[#allocation11 + $0x90] ss:$12 sps:$4 sm:$0xff]   ;;  %v6537_v11 = vld [vmem:[#allocation11 + $0x98] ss:$12 sps:$4 sm:$0xff]  }
 0x15a   :  { %v6069_v52 = vpop.f32.mrf.mxu1  ;;  %6765 = vrcp.f32 %v776_v12  ;;  %v6538_v12 = vld [vmem:[#allocation11 + $0x80] ss:$12 sps:$4 sm:$0xff]  }
 0x15b   :  { %v7399_v53 = vadd.f32 %v6069_v52, %v194_v48  ;;  %v6925_v52 = vld [vmem:[#allocation11 + $0x7c] ss:$12 sps:$4 sm:$0xff]  }
 0x15c   :  { %v457_v54 = vpop.f32.mrf.mxu1 }
 0x15d   :  { %v458_v20 = vadd.f32 %v457_v54, %v194_v48  ;;  %v6926_v54 = vld [vmem:[#allocation11 + $0x78] ss:$12 sps:$4 sm:$0xff]  }
 0x15e   :  { %v6070_v55 = vpop.f32.mrf.mxu1 }
 0x15f   :  { %v7401_v56 = vadd.f32 %v6070_v55, %v194_v48  ;;  %v6927_v55 = vld [vmem:[#allocation11 + $0x64] ss:$12 sps:$4 sm:$0xff]  }
 0x160   :  { %v460_v57 = vpop.f32.mrf.mxu1 }
 0x161   :  { %v7403_v58 = vadd.f32 %v460_v57, %v194_v48  ;;  %v6928_v57 = vld [vmem:[#allocation11 + $0x60] ss:$12 sps:$4 sm:$0xff]  }
 0x162   :  { %v6073_v60 = vpop.f32.mrf.mxu1 }
 0x163   :  { %v7405_v61 = vadd.f32 %v6073_v60, %v194_v48  ;;  %v6930_v60 = vld [vmem:[#allocation11 + $0x48] ss:$12 sps:$4 sm:$0xff]  }
 0x164   :  { %v473_v62 = vpop.f32.mrf.mxu1 }
 0x165   :  { %v7407_v63 = vadd.f32 %v473_v62, %v194_v48  ;;  %v6931_v62 = vld [vmem:[#allocation11 + $0x34] ss:$12 sps:$4 sm:$0xff]  }
 0x166   :  { %v6074_v2 = vpop.f32.mrf.mxu1  ;;  %v6764_v16 = vpop.eup %6763 }
 0x167   :  { %v7409_v3 = vadd.f32 %v6074_v2, %v194_v48  ;;  %v6766_v17 = vpop.eup %6765  ;;  %v777_v26 = vadd.f32 1.0, %v6764_v16  ;;  %v6933_v2 = vld [vmem:[#allocation11 + $0x1c] ss:$12 sps:$4 sm:$0xff]  }
 0x168   :  { %v476_v7 = vpop.f32.mrf.mxu1  ;;  %v6540_v16 = vld [vmem:[#allocation11 + $0x50] ss:$12 sps:$4 sm:$0xff]  }
 0x169   :  { %v7411_v10 = vadd.f32 %v476_v7, %v194_v48  ;;  %v6923_v48 = vld [vmem:[#allocation11 + $0x94] ss:$12 sps:$4 sm:$0xff]   ;;  %v6536_v7 = vld [vmem:[#allocation11 + $0xb0] ss:$12 sps:$4 sm:$0xff]  }
 0x17a   :  { %v762_v14 = vpop.f32.mrf.mxu1 }
 0x17b   :  { %v782_v13 = vadd.f32 %v7416_v9, %v762_v14  ;;  %v6539_v14 = vld [vmem:[#allocation11 + $0x68] ss:$12 sps:$4 sm:$0xff]  }
 0x17c   :  { %v6093_v19 = vpop.f32.mrf.mxu1 }
 0x17d   :  { %v783_v22 = vmul.f32 %v6766_v17, %v782_v13  ;;  %v6542_v13 = vld [vmem:[#allocation11 + $0x20] ss:$12 sps:$4 sm:$0xff]   ;;  %v6543_v17 = vld [vmem:[#allocation11 + $0x8] ss:$12 sps:$4 sm:$0xff]  }
 0x17e   :  { %v765_v24 = vpop.f32.mrf.mxu1 }
 0x17f   :  { %v784_v28 = vadd.f32 %v783_v22, %v458_v20 }
 0x180   :  { %v6094_v30 = vpop.f32.mrf.mxu1 }
 0x181   :  { %6767 = vtanh.f32 %v784_v28 }
 0x182   :  { %6769 = vrcp.f32 %v777_v26 }
 0x18e   :  { %v6768_v33 = vpop.eup %6767 }
 0x18f   :  { %v786_v37 = vsub.f32 %v6921_v34, %v6768_v33  ;;  %v6770_v39 = vpop.eup %6769 }
 0x191   :  { %v787_v40 = vmul.f32 %v6770_v39, %v786_v37 }
 0x193   :  { %v7419_v43 = vadd.f32 %v6768_v33, %v787_v40 }
 0x195   :  { %v796_v45 = vpack.c.bf16 %v7419_v43, %v7419_v43 }
 0x197   :  { %990 = vmatmul.mubr.bf16.vlgmr.msra.gmra.mxu0 %v796_v45  ;;  %6112 = vmatmul.mubr.bf16.vlgmr.msra.gmra.mxu1 %v796_v45 }
 0x198   :  { %1229 = vmatpush1.bf16.msra.mxu0 %v6922_v46  ;;  %1260 = vmatprep.mubr.bf16.mxu0 %v7144_v0 }
 0x199   :  { %1230 = vmatprep.subr.bf16.mxu0 %v6923_v48  ;;  %6131 = vmatprep.mubr.msk.bf16.mxu1 %vm7146_vm0, %v7145_v50 }
 0x19a   :  { %6116 = vmatpush3.bf16.msra.mxu1 %v6536_v7  ;;  %v7454_v7 = vld [vmem:[#allocation11 + $0x94] ss:$12 sps:$4 sm:$0xff]  }
 0x19b   :  { %6117 = vmatprep.subr.bf16.mxu1 %v7145_v50 }
 0x19c   :  { %1231 = vmatpush1.bf16.msra.mxu0 %v6924_v49 }
 0x19d   :  { %1232 = vmatprep.subr.bf16.mxu0 %v6925_v52 }
 0x19e   :  { %6118 = vmatpush3.bf16.msra.mxu1 %v6537_v11  ;;  %v7457_v11 = vld [vmem:[#allocation11 + $0x90] ss:$12 sps:$4 sm:$0xff]  }
 0x19f   :  { %6119 = vmatprep.subr.bf16.mxu1 %v7145_v50 }
 0x1a0   :  { %1233 = vmatpush1.bf16.msra.mxu0 %v6926_v54 }
 0x1a1   :  { %1234 = vmatprep.subr.bf16.mxu0 %v6927_v55 }
 0x1a2   :  { %6120 = vmatpush3.bf16.msra.mxu1 %v6538_v12  ;;  %v6551_v12 = vld [vmem:[#allocation11 + $0x98] ss:$12 sps:$4 sm:$0xff]  }
 0x1a3   :  { %6121 = vmatprep.subr.bf16.mxu1 %v7145_v50 }
 0x1a4   :  { %1235 = vmatpush1.bf16.msra.mxu0 %v6928_v57 }
 0x1a5   :  { %1236 = vmatprep.subr.bf16.mxu0 %v6929_v59 }
 0x1a6   :  { %6122 = vmatpush3.bf16.msra.mxu1 %v6539_v14  ;;  %v7461_v14 = vld [vmem:[#allocation11 + $0x7c] ss:$12 sps:$4 sm:$0xff]  }
 0x1a7   :  { %6123 = vmatprep.subr.bf16.mxu1 %v7145_v50 }
 0x1a8   :  { %1237 = vmatpush1.bf16.msra.mxu0 %v6930_v60 }
 0x1a9   :  { %1238 = vmatprep.subr.bf16.mxu0 %v6931_v62 }
 0x1aa   :  { %6124 = vmatpush3.bf16.msra.mxu1 %v6540_v16  ;;  %v7464_v16 = vld [vmem:[#allocation11 + $0x78] ss:$12 sps:$4 sm:$0xff]  }
 0x1ab   :  { %6125 = vmatprep.subr.bf16.mxu1 %v7145_v50 }
 0x1ac   :  { %1239 = vmatpush1.bf16.msra.mxu0 %v6932_v1 }
 0x1ad   :  { %1240 = vmatprep.subr.bf16.mxu0 %v6933_v2  ;;  %v7450_v2 = vld [vmem:[#allocation11 + $0xa8] ss:$12 sps:$4 sm:$0xff]  }
 0x1b0   :  { %1241 = vmatpush1.bf16.msra.mxu0 %v6934_v6  ;;  %v6547_v6 = vld [vmem:[#allocation11 + $0xb0] ss:$12 sps:$4 sm:$0xff]  }
 0x1b1   :  { %1242 = vmatprep.subr.bf16.mxu0 %v7304_v32  ;;  %v6541_v32 = vld [vmem:[#allocation11 + $0x38] ss:$12 sps:$4 sm:$0xff]  }
 0x1b2   :  { %6126 = vmatpush3.bf16.msra.mxu1 %v6541_v32  ;;  %v6555_v32 = vld [vmem:[#allocation11 + $0x80] ss:$12 sps:$4 sm:$0xff]  }
 0x1b3   :  { %6127 = vmatprep.subr.bf16.mxu1 %v7145_v50 }
 0x1b4   :  { %1243 = vmatpush1.bf16.msra.mxu0 %v7307_v35 }
 0x1b6   :  { %6128 = vmatpush3.bf16.msra.mxu1 %v6542_v13  ;;  %v7468_v13 = vld [vmem:[#allocation11 + $0x60] ss:$12 sps:$4 sm:$0xff]  }
 0x1b7   :  { %6129 = vmatprep.subr.bf16.mxu1 %v7145_v50 }
 0x1ba   :  { %6130 = vmatpush3.bf16.msra.mxu1 %v6543_v17  ;;  %v7470_v17 = vld [vmem:[#allocation11 + $0x64] ss:$12 sps:$4 sm:$0xff]  }
 0x1bb   :  { %6135 = vmatprep.subr.bf16.mxu1 %v7145_v50 }
 0x257   :  { %v991_v19 = vpop.f32.mrf.mxu0  ;;  %v1032_v20 = vpop.f32.mrf.mxu1 }
 0x258   :  { %v1038_v22 = vadd.f32 %v991_v19, %v7368_v15  ;;  %v1052_v49 = vadd.f32 %v7416_v9, %v1032_v20  ;;  %v6559_v19 = vld [vmem:[#allocation11 + $0x68] ss:$12 sps:$4 sm:$0xff]   ;;  %v7473_v20 = vld [vmem:[#allocation11 + $0x4c] ss:$12 sps:$4 sm:$0xff]  }
 0x259   :  { %v993_v24 = vpop.f32.mrf.mxu0  ;;  %v6113_v26 = vpop.f32.mrf.mxu1 }
 0x25a   :  { %v5471_v28 = vmul.f32 -1.442695, %v1038_v22  ;;  %v1039_v39 = vadd.f32 %v993_v24, %v7370_v18  ;;  %v7477_v22 = vld [vmem:[#allocation11 + $0x48] ss:$12 sps:$4 sm:$0xff]   ;;  %v6563_v24 = vld [vmem:[#allocation11 + $0x50] ss:$12 sps:$4 sm:$0xff]  }
 0x25b   :  { %v995_v30 = vpop.f32.mrf.mxu0  ;;  %v1035_v33 = vpop.f32.mrf.mxu1  ;;  %v7481_v26 = vld [vmem:[#allocation11 + $0x34] ss:$12 sps:$4 sm:$0xff]  }
 0x25c   :  { %6771 = vpow2.f32 %v5471_v28  ;;  %v5472_v40 = vmul.f32 -1.442695, %v1039_v39  ;;  %v7484_v28 = vld [vmem:[#allocation11 + $0x30] ss:$12 sps:$4 sm:$0xff]   ;;  %v6567_v30 = vld [vmem:[#allocation11 + $0x38] ss:$12 sps:$4 sm:$0xff]  }
 0x25d   :  { %v996_v34 = vpop.f32.mrf.mxu0  ;;  %v6114_v37 = vpop.f32.mrf.mxu1  ;;  %v7488_v33 = vld [vmem:[#allocation11 + $0x1c] ss:$12 sps:$4 sm:$0xff]   ;;  %v6935_v39 = vld [vmem:[#allocation11] sm:$0xff] }
 0x25e   :  { %6773 = vpow2.f32 %v5472_v40  ;;  %v7491_v34 = vld [vmem:[#allocation11 + $0x18] ss:$12 sps:$4 sm:$0xff]   ;;  %v6571_v37 = vld [vmem:[#allocation11 + $0x20] ss:$12 sps:$4 sm:$0xff]  }
 0x25f   :  { %v6936_v40 = vld [vmem:[#allocation11 + $0xc] sm:$0xff] }
 0x269   :  { %v6772_v45 = vpop.eup %6771 }
 0x26a   :  { %v1046_v46 = vadd.f32 1.0, %v6772_v45  ;;  %v5500_v45 = vcombine.high %v6935_v39, %v6936_v40 }
 0x26b   :  { %v6774_v48 = vpop.eup %6773 }
 0x26c   :  { %6775 = vrcp.f32 %v1046_v46  ;;  %v1047_v55 = vadd.f32 1.0, %v6774_v48  ;;  %v6573_v46 = vld [vmem:[#allocation11 + $0x8] ss:$12 sps:$4 sm:$0xff]  }
 0x279   :  { %v6776_v52 = vpop.eup %6775 }
 0x27a   :  { %v1053_v15 = vmul.f32 %v6776_v52, %v1052_v49 }
 0x27c   :  { %v1054_v54 = vadd.f32 %v1053_v15, %v7403_v58  ;;  %v7448_v58 = vld [vmem:[#allocation11 + $0xac] ss:$12 sps:$4 sm:$0xff]  }
 0x27d   :  { %1499 = vmatprep.subr.bf16.mxu0 %v7448_v58 }
 0x27e   :  { %6777 = vtanh.f32 %v1054_v54 }
 0x27f   :  { %6779 = vrcp.f32 %v1047_v55 }
 0x28b   :  { %v6778_v57 = vpop.eup %6777 }
 0x28c   :  { %v1056_v59 = vsub.f32 %v7419_v43, %v6778_v57  ;;  %v6780_v60 = vpop.eup %6779 }
 0x28e   :  { %v1057_v18 = vmul.f32 %v6780_v60, %v1056_v59 }
 0x290   :  { %v7441_v62 = vadd.f32 %v6778_v57, %v1057_v18 }
 0x292   :  { %v1067_v1 = vpack.c.bf16 %v7441_v62, %v7441_v62 }
 0x294   :  { %1261 = vmatmul.mubr.bf16.vlgmr.msra.gmra.mxu0 %v1067_v1  ;;  %6132 = vmatmul.mubr.bf16.vlgmr.msra.gmra.mxu1 %v1067_v1 }
 0x295   :  { %1531 = vmatprep.mubr.bf16.mxu0 %v7144_v0  ;;  %6151 = vmatprep.mubr.msk.bf16.mxu1 %vm7146_vm0, %v7145_v50 }
 0x296   :  { %1500 = vmatpush1.bf16.msra.mxu0 %v7450_v2  ;;  %6136 = vmatpush3.bf16.msra.mxu1 %v6547_v6 }
 0x297   :  { %6137 = vmatprep.subr.bf16.mxu1 %v7145_v50  ;;  %1501 = vmatprep.subr.bf16.mxu0 %v7454_v7 }
 0x29a   :  { %1502 = vmatpush1.bf16.msra.mxu0 %v7457_v11  ;;  %6138 = vmatpush3.bf16.msra.mxu1 %v6551_v12 }
 0x29b   :  { %6139 = vmatprep.subr.bf16.mxu1 %v7145_v50  ;;  %1503 = vmatprep.subr.bf16.mxu0 %v7461_v14 }
 0x29e   :  { %1504 = vmatpush1.bf16.msra.mxu0 %v7464_v16  ;;  %6140 = vmatpush3.bf16.msra.mxu1 %v6555_v32 }
 0x29f   :  { %6141 = vmatprep.subr.bf16.mxu1 %v7145_v50  ;;  %1505 = vmatprep.subr.bf16.mxu0 %v7470_v17 }
 0x2a2   :  { %1506 = vmatpush1.bf16.msra.mxu0 %v7468_v13  ;;  %6142 = vmatpush3.bf16.msra.mxu1 %v6559_v19 }
 0x2a3   :  { %1507 = vmatprep.subr.bf16.mxu0 %v7473_v20  ;;  %6143 = vmatprep.subr.bf16.mxu1 %v7145_v50 }
 0x2a6   :  { %1508 = vmatpush1.bf16.msra.mxu0 %v7477_v22  ;;  %6144 = vmatpush3.bf16.msra.mxu1 %v6563_v24 }
 0x2a7   :  { %1509 = vmatprep.subr.bf16.mxu0 %v7481_v26  ;;  %6145 = vmatprep.subr.bf16.mxu1 %v7145_v50 }
 0x2aa   :  { %1510 = vmatpush1.bf16.msra.mxu0 %v7484_v28  ;;  %6146 = vmatpush3.bf16.msra.mxu1 %v6567_v30 }
 0x2ab   :  { %1511 = vmatprep.subr.bf16.mxu0 %v7488_v33  ;;  %6147 = vmatprep.subr.bf16.mxu1 %v7145_v50 }
 0x2ae   :  { %1512 = vmatpush1.bf16.msra.mxu0 %v7491_v34  ;;  %6148 = vmatpush3.bf16.msra.mxu1 %v6571_v37 }
 0x2af   :  { %1513 = vmatprep.subr.bf16.mxu0 %v5500_v45  ;;  %6149 = vmatprep.subr.bf16.mxu1 %v7145_v50 }
 0x2b2   :  { %1514 = vmatpush1.bf16.msra.mxu0 %v7307_v35  ;;  %6150 = vmatpush3.bf16.msra.mxu1 %v6573_v46 }
 0x2b3   :  { %1770 = vmatprep.subr.bf16.mxu0 %v7448_v58  ;;  %6155 = vmatprep.subr.bf16.mxu1 %v7145_v50 }
 0x354   :  { %v1262_v48 = vpop.f32.mrf.mxu0  ;;  %v1303_v49 = vpop.f32.mrf.mxu1 }
 0x355   :  { %v1309_v52 = vadd.f32 %v1262_v48, %v7372_v21  ;;  %v1323_v19 = vadd.f32 %v7416_v9, %v1303_v49  ;;  %v6575_v49 = vld [vmem:[#allocation11 + $0x98] ss:$12 sps:$4 sm:$0xff]  }
 0x356   :  { %v1264_v15 = vpop.f32.mrf.mxu0  ;;  %v6133_v54 = vpop.f32.mrf.mxu1 }
 0x357   :  { %v5497_v55 = vmul.f32 -1.442695, %v1309_v52  ;;  %v1310_v1 = vadd.f32 %v1264_v15, %v7374_v23  ;;  %v6576_v52 = vld [vmem:[#allocation11 + $0x80] ss:$12 sps:$4 sm:$0xff]   ;;  %v6577_v15 = vld [vmem:[#allocation11 + $0x68] ss:$12 sps:$4 sm:$0xff]  }
 0x358   :  { %v1266_v57 = vpop.f32.mrf.mxu0  ;;  %v1306_v59 = vpop.f32.mrf.mxu1  ;;  %v7528_v54 = vld [vmem:[#allocation11] ss:$12 sps:$4 sm:$0xff]  }
 0x359   :  { %6781 = vpow2.f32 %v5497_v55  ;;  %v5498_v35 = vmul.f32 -1.442695, %v1310_v1  ;;  %v7530_v55 = vld [vmem:[#allocation11 + $0x4] ss:$12 sps:$4 sm:$0xff]  }
 0x35a   :  { %v1267_v60 = vpop.f32.mrf.mxu0  ;;  %v6134_v18 = vpop.f32.mrf.mxu1  ;;  %v6578_v57 = vld [vmem:[#allocation11 + $0x50] ss:$12 sps:$4 sm:$0xff]   ;;  %v6579_v59 = vld [vmem:[#allocation11 + $0x38] ss:$12 sps:$4 sm:$0xff]  }
 0x35b   :  { %6783 = vpow2.f32 %v5498_v35  ;;  %v6580_v60 = vld [vmem:[#allocation11 + $0x20] ss:$12 sps:$4 sm:$0xff]   ;;  %v6584_v18 = vld [vmem:[#allocation11 + $0x8] ss:$12 sps:$4 sm:$0xff]  }
 0x366   :  { %v6782_v6 = vpop.eup %6781 }
 0x367   :  { %v1317_v12 = vadd.f32 1.0, %v6782_v6 }
 0x368   :  { %v6784_v32 = vpop.eup %6783 }
 0x369   :  { %6785 = vrcp.f32 %v1317_v12  ;;  %v1318_v37 = vadd.f32 1.0, %v6784_v32 }
 0x376   :  { %v6786_v24 = vpop.eup %6785 }
 0x377   :  { %v1324_v21 = vmul.f32 %v6786_v24, %v1323_v19 }
 0x379   :  { %v1325_v30 = vadd.f32 %v1324_v21, %v7399_v53  ;;  %v6574_v53 = vld [vmem:[#allocation11 + $0xb0] ss:$12 sps:$4 sm:$0xff]  }
 0x37b   :  { %6787 = vtanh.f32 %v1325_v30 }
 0x37c   :  { %6789 = vrcp.f32 %v1318_v37 }
 0x388   :  { %v6788_v39 = vpop.eup %6787 }
 0x389   :  { %v1327_v40 = vsub.f32 %v7441_v62, %v6788_v39  ;;  %v6790_v45 = vpop.eup %6789 }
 0x38b   :  { %v1328_v23 = vmul.f32 %v6790_v45, %v1327_v40 }
 0x38d   :  { %v7505_v46 = vadd.f32 %v6788_v39, %v1328_v23 }
 0x38f   :  { %v1338_v48 = vpack.c.bf16 %v7505_v46, %v7505_v46 }
 0x391   :  { %1532 = vmatmul.mubr.bf16.vlgmr.msra.gmra.mxu0 %v1338_v48  ;;  %6152 = vmatmul.mubr.bf16.vlgmr.msra.gmra.mxu1 %v1338_v48 }
 0x392   :  { %1771 = vmatpush1.bf16.msra.mxu0 %v7450_v2  ;;  %1802 = vmatprep.mubr.bf16.mxu0 %v7144_v0 }
 0x393   :  { %1772 = vmatprep.subr.bf16.mxu0 %v7454_v7  ;;  %6171 = vmatprep.mubr.msk.bf16.mxu1 %vm7146_vm0, %v7145_v50 }
 0x394   :  { %6156 = vmatpush3.bf16.msra.mxu1 %v6574_v53 }
 0x395   :  { %6157 = vmatprep.subr.bf16.mxu1 %v7145_v50 }
 0x396   :  { %1773 = vmatpush1.bf16.msra.mxu0 %v7457_v11 }
 0x397   :  { %1774 = vmatprep.subr.bf16.mxu0 %v7461_v14 }
 0x398   :  { %6158 = vmatpush3.bf16.msra.mxu1 %v6575_v49 }
 0x399   :  { %6159 = vmatprep.subr.bf16.mxu1 %v7145_v50 }
 0x39a   :  { %1775 = vmatpush1.bf16.msra.mxu0 %v7464_v16 }
 0x39b   :  { %1776 = vmatprep.subr.bf16.mxu0 %v7470_v17 }
 0x39c   :  { %6160 = vmatpush3.bf16.msra.mxu1 %v6576_v52 }
 0x39d   :  { %6161 = vmatprep.subr.bf16.mxu1 %v7145_v50 }
 0x39e   :  { %1777 = vmatpush1.bf16.msra.mxu0 %v7468_v13 }
 0x39f   :  { %1778 = vmatprep.subr.bf16.mxu0 %v7473_v20 }
 0x3a0   :  { %6162 = vmatpush3.bf16.msra.mxu1 %v6577_v15 }
 0x3a1   :  { %6163 = vmatprep.subr.bf16.mxu1 %v7145_v50 }
 0x3a2   :  { %1779 = vmatpush1.bf16.msra.mxu0 %v7477_v22 }
 0x3a3   :  { %1780 = vmatprep.subr.bf16.mxu0 %v7481_v26 }
 0x3a4   :  { %6164 = vmatpush3.bf16.msra.mxu1 %v6578_v57 }
 0x3a5   :  { %6165 = vmatprep.subr.bf16.mxu1 %v7145_v50 }
 0x3a6   :  { %1781 = vmatpush1.bf16.msra.mxu0 %v7484_v28 }
 0x3a7   :  { %1782 = vmatprep.subr.bf16.mxu0 %v7488_v33 }
 0x3a8   :  { %6166 = vmatpush3.bf16.msra.mxu1 %v6579_v59 }
 0x3a9   :  { %6167 = vmatprep.subr.bf16.mxu1 %v7145_v50 }
 0x3aa   :  { %1783 = vmatpush1.bf16.msra.mxu0 %v7491_v34 }
 0x3ab   :  { %1784 = vmatprep.subr.bf16.mxu0 %v7530_v55 }
 0x3ac   :  { %6168 = vmatpush3.bf16.msra.mxu1 %v6580_v60 }
 0x3ad   :  { %6169 = vmatprep.subr.bf16.mxu1 %v7145_v50 }
 0x3ae   :  { %1785 = vmatpush1.bf16.msra.mxu0 %v7528_v54 }
 0x3af   :  { %2041 = vmatprep.subr.bf16.mxu0 %v7448_v58 }
 0x3b0   :  { %6170 = vmatpush3.bf16.msra.mxu1 %v6584_v18 }
 0x3b1   :  { %6175 = vmatprep.subr.bf16.mxu1 %v7145_v50 }
 0x451   :  { %v1533_v1 = vpop.f32.mrf.mxu0  ;;  %v1574_v35 = vpop.f32.mrf.mxu1 }
 0x452   :  { %v1580_v6 = vadd.f32 %v1533_v1, %v7376_v25  ;;  %v1594_v53 = vadd.f32 %v7416_v9, %v1574_v35  ;;  %v6586_v35 = vld [vmem:[#allocation11 + $0x98] ss:$12 sps:$4 sm:$0xff]  }
 0x453   :  { %v1535_v12 = vpop.f32.mrf.mxu0  ;;  %v6153_v32 = vpop.f32.mrf.mxu1 }
 0x454   :  { %v5523_v19 = vmul.f32 -1.442695, %v1580_v6  ;;  %v1581_v39 = vadd.f32 %v1535_v12, %v7378_v27  ;;  %v6587_v6 = vld [vmem:[#allocation11 + $0x80] ss:$12 sps:$4 sm:$0xff]   ;;  %v6588_v12 = vld [vmem:[#allocation11 + $0x68] ss:$12 sps:$4 sm:$0xff]  }
 0x455   :  { %v1537_v24 = vpop.f32.mrf.mxu0  ;;  %v1577_v21 = vpop.f32.mrf.mxu1  ;;  %v6589_v32 = vld [vmem:[#allocation11 + $0x50] ss:$12 sps:$4 sm:$0xff]  }
 0x456   :  { %6791 = vpow2.f32 %v5523_v19  ;;  %v5524_v40 = vmul.f32 -1.442695, %v1581_v39  ;;  %v6590_v19 = vld [vmem:[#allocation11 + $0x38] ss:$12 sps:$4 sm:$0xff]   ;;  %v6591_v24 = vld [vmem:[#allocation11 + $0x20] ss:$12 sps:$4 sm:$0xff]  }
 0x457   :  { %v1538_v30 = vpop.f32.mrf.mxu0  ;;  %v6154_v37 = vpop.f32.mrf.mxu1  ;;  %v6592_v21 = vld [vmem:[#allocation11 + $0x8] ss:$12 sps:$4 sm:$0xff]  }
 0x458   :  { %6793 = vpow2.f32 %v5524_v40 }
 0x463   :  { %v6792_v45 = vpop.eup %6791 }
 0x464   :  { %v1588_v23 = vadd.f32 1.0, %v6792_v45 }
 0x465   :  { %v6794_v48 = vpop.eup %6793 }
 0x466   :  { %6795 = vrcp.f32 %v1588_v23  ;;  %v1589_v15 = vadd.f32 1.0, %v6794_v48 }
 0x473   :  { %v6796_v49 = vpop.eup %6795 }
 0x474   :  { %v1595_v25 = vmul.f32 %v6796_v49, %v1594_v53 }
 0x476   :  { %v1596_v52 = vadd.f32 %v1595_v25, %v7401_v56  ;;  %v6585_v56 = vld [vmem:[#allocation11 + $0xb0] ss:$12 sps:$4 sm:$0xff]  }
 0x478   :  { %6797 = vtanh.f32 %v1596_v52 }
 0x479   :  { %6799 = vrcp.f32 %v1589_v15 }
 0x485   :  { %v6798_v57 = vpop.eup %6797 }
 0x486   :  { %v1598_v59 = vsub.f32 %v7505_v46, %v6798_v57  ;;  %v6800_v60 = vpop.eup %6799 }
 0x488   :  { %v1599_v27 = vmul.f32 %v6800_v60, %v1598_v59 }
 0x48a   :  { %v7545_v18 = vadd.f32 %v6798_v57, %v1599_v27 }
 0x48c   :  { %v1609_v1 = vpack.c.bf16 %v7545_v18, %v7545_v18 }
 0x48e   :  { %1803 = vmatmul.mubr.bf16.vlgmr.msra.gmra.mxu0 %v1609_v1  ;;  %6172 = vmatmul.mubr.bf16.vlgmr.msra.gmra.mxu1 %v1609_v1 }
 0x48f   :  { %2042 = vmatpush1.bf16.msra.mxu0 %v7450_v2  ;;  %2073 = vmatprep.mubr.bf16.mxu0 %v7144_v0 }
 0x490   :  { %2043 = vmatprep.subr.bf16.mxu0 %v7454_v7  ;;  %6191 = vmatprep.mubr.msk.bf16.mxu1 %vm7146_vm0, %v7145_v50 }
 0x491   :  { %6176 = vmatpush3.bf16.msra.mxu1 %v6585_v56 }
 0x492   :  { %6177 = vmatprep.subr.bf16.mxu1 %v7145_v50 }
 0x493   :  { %2044 = vmatpush1.bf16.msra.mxu0 %v7457_v11 }
 0x494   :  { %2045 = vmatprep.subr.bf16.mxu0 %v7461_v14 }
 0x495   :  { %6178 = vmatpush3.bf16.msra.mxu1 %v6586_v35 }
 0x496   :  { %6179 = vmatprep.subr.bf16.mxu1 %v7145_v50 }
 0x497   :  { %2046 = vmatpush1.bf16.msra.mxu0 %v7464_v16 }
 0x498   :  { %2047 = vmatprep.subr.bf16.mxu0 %v7470_v17 }
 0x499   :  { %6180 = vmatpush3.bf16.msra.mxu1 %v6587_v6 }
 0x49a   :  { %6181 = vmatprep.subr.bf16.mxu1 %v7145_v50 }
 0x49b   :  { %2048 = vmatpush1.bf16.msra.mxu0 %v7468_v13 }
 0x49c   :  { %2049 = vmatprep.subr.bf16.mxu0 %v7473_v20 }
 0x49d   :  { %6182 = vmatpush3.bf16.msra.mxu1 %v6588_v12 }
 0x49e   :  { %6183 = vmatprep.subr.bf16.mxu1 %v7145_v50 }
 0x49f   :  { %2050 = vmatpush1.bf16.msra.mxu0 %v7477_v22 }
 0x4a0   :  { %2051 = vmatprep.subr.bf16.mxu0 %v7481_v26 }
 0x4a1   :  { %6184 = vmatpush3.bf16.msra.mxu1 %v6589_v32 }
 0x4a2   :  { %6185 = vmatprep.subr.bf16.mxu1 %v7145_v50 }
 0x4a3   :  { %2052 = vmatpush1.bf16.msra.mxu0 %v7484_v28 }
 0x4a4   :  { %2053 = vmatprep.subr.bf16.mxu0 %v7488_v33 }
 0x4a5   :  { %6186 = vmatpush3.bf16.msra.mxu1 %v6590_v19 }
 0x4a6   :  { %6187 = vmatprep.subr.bf16.mxu1 %v7145_v50 }
 0x4a7   :  { %2054 = vmatpush1.bf16.msra.mxu0 %v7491_v34 }
 0x4a8   :  { %2055 = vmatprep.subr.bf16.mxu0 %v7530_v55 }
 0x4a9   :  { %6188 = vmatpush3.bf16.msra.mxu1 %v6591_v24 }
 0x4aa   :  { %6189 = vmatprep.subr.bf16.mxu1 %v7145_v50 }
 0x4ab   :  { %2056 = vmatpush1.bf16.msra.mxu0 %v7528_v54 }
 0x4ac   :  { %2312 = vmatprep.subr.bf16.mxu0 %v7448_v58 }
 0x4ad   :  { %6190 = vmatpush3.bf16.msra.mxu1 %v6592_v21  ;;  %v6594_v21 = vld [vmem:[#allocation11 + $0x98] ss:$12 sps:$4 sm:$0xff]  }
 0x4ae   :  { %6195 = vmatprep.subr.bf16.mxu1 %v7145_v50 }
 0x54e   :  { %v1804_v30 = vpop.f32.mrf.mxu0  ;;  %v1845_v37 = vpop.f32.mrf.mxu1 }
 0x54f   :  { %v1851_v39 = vadd.f32 %v1804_v30, %v7380_v29  ;;  %v1865_v27 = vadd.f32 %v7416_v9, %v1845_v37  ;;  %v6595_v30 = vld [vmem:[#allocation11 + $0x80] ss:$12 sps:$4 sm:$0xff]   ;;  %v6596_v37 = vld [vmem:[#allocation11 + $0x68] ss:$12 sps:$4 sm:$0xff]  }
 0x550   :  { %v1806_v40 = vpop.f32.mrf.mxu0  ;;  %v6173_v45 = vpop.f32.mrf.mxu1 }
 0x551   :  { %v5549_v23 = vmul.f32 -1.442695, %v1851_v39  ;;  %v1852_v52 = vadd.f32 %v1806_v40, %v7382_v31  ;;  %v6597_v39 = vld [vmem:[#allocation11 + $0x50] ss:$12 sps:$4 sm:$0xff]   ;;  %v6598_v40 = vld [vmem:[#allocation11 + $0x38] ss:$12 sps:$4 sm:$0xff]  }
 0x552   :  { %v1808_v48 = vpop.f32.mrf.mxu0  ;;  %v1848_v53 = vpop.f32.mrf.mxu1  ;;  %v6600_v45 = vld [vmem:[#allocation11 + $0x8] ss:$12 sps:$4 sm:$0xff]  }
 0x553   :  { %6801 = vpow2.f32 %v5549_v23  ;;  %v5550_v15 = vmul.f32 -1.442695, %v1852_v52 }
 0x554   :  { %v1809_v49 = vpop.f32.mrf.mxu0  ;;  %v6174_v25 = vpop.f32.mrf.mxu1 }
 0x555   :  { %6803 = vpow2.f32 %v5550_v15 }
 0x560   :  { %v6802_v57 = vpop.eup %6801 }
 0x561   :  { %v1859_v59 = vadd.f32 1.0, %v6802_v57 }
 0x562   :  { %v6804_v60 = vpop.eup %6803 }
 0x563   :  { %6805 = vrcp.f32 %v1859_v59  ;;  %v1860_v35 = vadd.f32 1.0, %v6804_v60 }
 0x570   :  { %v6806_v1 = vpop.eup %6805 }
 0x571   :  { %v1866_v29 = vmul.f32 %v6806_v1, %v1865_v27 }
 0x573   :  { %v1867_v56 = vadd.f32 %v1866_v29, %v7407_v63  ;;  %v6593_v63 = vld [vmem:[#allocation11 + $0xb0] ss:$12 sps:$4 sm:$0xff]  }
 0x575   :  { %6807 = vtanh.f32 %v1867_v56 }
 0x576   :  { %6809 = vrcp.f32 %v1860_v35 }
 0x582   :  { %v6808_v6 = vpop.eup %6807 }
 0x583   :  { %v1869_v12 = vsub.f32 %v7545_v18, %v6808_v6  ;;  %v6810_v32 = vpop.eup %6809 }
 0x585   :  { %v1870_v31 = vmul.f32 %v6810_v32, %v1869_v12 }
 0x587   :  { %v7581_v19 = vadd.f32 %v6808_v6, %v1870_v31 }
 0x589   :  { %v1880_v24 = vpack.c.bf16 %v7581_v19, %v7581_v19 }
 0x58b   :  { %2074 = vmatmul.mubr.bf16.vlgmr.msra.gmra.mxu0 %v1880_v24  ;;  %6192 = vmatmul.mubr.bf16.vlgmr.msra.gmra.mxu1 %v1880_v24 }
 0x58c   :  { %2313 = vmatpush1.bf16.msra.mxu0 %v7450_v2  ;;  %2344 = vmatprep.mubr.bf16.mxu0 %v7144_v0 }
 0x58d   :  { %2314 = vmatprep.subr.bf16.mxu0 %v7454_v7  ;;  %6211 = vmatprep.mubr.msk.bf16.mxu1 %vm7146_vm0, %v7145_v50 }
 0x58e   :  { %6196 = vmatpush3.bf16.msra.mxu1 %v6593_v63 }
 0x58f   :  { %6197 = vmatprep.subr.bf16.mxu1 %v7145_v50 }
 0x590   :  { %2315 = vmatpush1.bf16.msra.mxu0 %v7457_v11 }
 0x591   :  { %2316 = vmatprep.subr.bf16.mxu0 %v7461_v14 }
 0x592   :  { %6198 = vmatpush3.bf16.msra.mxu1 %v6594_v21 }
 0x593   :  { %6199 = vmatprep.subr.bf16.mxu1 %v7145_v50 }
 0x594   :  { %2317 = vmatpush1.bf16.msra.mxu0 %v7464_v16 }
 0x595   :  { %2318 = vmatprep.subr.bf16.mxu0 %v7470_v17 }
 0x596   :  { %6200 = vmatpush3.bf16.msra.mxu1 %v6595_v30 }
 0x597   :  { %6201 = vmatprep.subr.bf16.mxu1 %v7145_v50 }
 0x598   :  { %2319 = vmatpush1.bf16.msra.mxu0 %v7468_v13 }
 0x599   :  { %2320 = vmatprep.subr.bf16.mxu0 %v7473_v20 }
 0x59a   :  { %6202 = vmatpush3.bf16.msra.mxu1 %v6596_v37 }
 0x59b   :  { %6203 = vmatprep.subr.bf16.mxu1 %v7145_v50 }
 0x59c   :  { %2321 = vmatpush1.bf16.msra.mxu0 %v7477_v22 }
 0x59d   :  { %2322 = vmatprep.subr.bf16.mxu0 %v7481_v26 }
 0x59e   :  { %6204 = vmatpush3.bf16.msra.mxu1 %v6597_v39 }
 0x59f   :  { %6205 = vmatprep.subr.bf16.mxu1 %v7145_v50 }
 0x5a0   :  { %2323 = vmatpush1.bf16.msra.mxu0 %v7484_v28 }
 0x5a1   :  { %2324 = vmatprep.subr.bf16.mxu0 %v7488_v33 }
 0x5a2   :  { %6206 = vmatpush3.bf16.msra.mxu1 %v6598_v40 }
 0x5a3   :  { %6207 = vmatprep.subr.bf16.mxu1 %v7145_v50 }
 0x5a4   :  { %2325 = vmatpush1.bf16.msra.mxu0 %v7491_v34 }
 0x5a5   :  { %2326 = vmatprep.subr.bf16.mxu0 %v7530_v55 }
 0x5a8   :  { %2327 = vmatpush1.bf16.msra.mxu0 %v7528_v54 }
 0x5a9   :  { %2583 = vmatprep.subr.bf16.mxu0 %v7448_v58  ;;  %v6599_v58 = vld [vmem:[#allocation11 + $0x20] ss:$12 sps:$4 sm:$0xff]  }
 0x5aa   :  { %6208 = vmatpush3.bf16.msra.mxu1 %v6599_v58 }
 0x5ab   :  { %6209 = vmatprep.subr.bf16.mxu1 %v7145_v50 }
 0x5ae   :  { %6210 = vmatpush3.bf16.msra.mxu1 %v6600_v45 }
 0x5af   :  { %6215 = vmatprep.subr.bf16.mxu1 %v7145_v50 }
 0x64b   :  { %v2075_v23 = vpop.f32.mrf.mxu0  ;;  %v2116_v48 = vpop.f32.mrf.mxu1 }
 0x64c   :  { %v2122_v53 = vadd.f32 %v2075_v23, %v7384_v36  ;;  %v2136_v6 = vadd.f32 %v7416_v9, %v2116_v48 }
 0x64d   :  { %v2077_v49 = vpop.f32.mrf.mxu0  ;;  %v6193_v25 = vpop.f32.mrf.mxu1 }
 0x64e   :  { %v5575_v52 = vmul.f32 -1.442695, %v2122_v53  ;;  %v2123_v27 = vadd.f32 %v2077_v49, %v7386_v38 }
 0x64f   :  { %v2079_v15 = vpop.f32.mrf.mxu0  ;;  %v2119_v57 = vpop.f32.mrf.mxu1 }
 0x650   :  { %6811 = vpow2.f32 %v5575_v52  ;;  %v5576_v1 = vmul.f32 -1.442695, %v2123_v27 }
 0x651   :  { %v2080_v59 = vpop.f32.mrf.mxu0  ;;  %v6194_v60 = vpop.f32.mrf.mxu1 }
 0x652   :  { %6813 = vpow2.f32 %v5576_v1 }
 0x65d   :  { %v6812_v29 = vpop.eup %6811 }
 0x65e   :  { %v2130_v56 = vadd.f32 1.0, %v6812_v29 }
 0x65f   :  { %v6814_v35 = vpop.eup %6813 }
 0x660   :  { %6815 = vrcp.f32 %v2130_v56  ;;  %v2131_v31 = vadd.f32 1.0, %v6814_v35  ;;  %v6609_v56 = vld [vmem:[#allocation13 + $0xa8] ss:$12 sps:$4 sm:$0xff]  }
 0x66d   :  { %v6816_v12 = vpop.eup %6815 }
 0x66e   :  { %v2137_v36 = vmul.f32 %v6816_v12, %v2136_v6  ;;  %v6615_v6 = vld [vmem:[#allocation13 + $0x94] ss:$12 sps:$4 sm:$0xff]   ;;  %v6613_v12 = vld [vmem:[#allocation13 + $0x90] ss:$12 sps:$4 sm:$0xff]  }
 0x670   :  { %v2138_v32 = vadd.f32 %v2137_v36, %v7411_v10  ;;  %v6601_v10 = vld [vmem:[#allocation11 + $0xb0] ss:$12 sps:$4 sm:$0xff]  }
 0x671   :  { %v6619_v36 = vld [vmem:[#allocation13 + $0x7c] ss:$12 sps:$4 sm:$0xff]  }
 0x672   :  { %6817 = vtanh.f32 %v2138_v32  ;;  %v6620_v32 = vld [vmem:[#allocation13 + $0x80] ss:$12 sps:$4 sm:$0xff]  }
 0x673   :  { %6819 = vrcp.f32 %v2131_v31  ;;  %v6617_v31 = vld [vmem:[#allocation13 + $0x78] ss:$12 sps:$4 sm:$0xff]  }
 0x67f   :  { %v6818_v24 = vpop.eup %6817 }
 0x680   :  { %v2140_v63 = vsub.f32 %v7581_v19, %v6818_v24  ;;  %v6820_v21 = vpop.eup %6819 }
 0x682   :  { %v2141_v38 = vmul.f32 %v6820_v21, %v2140_v63  ;;  %v6624_v63 = vld [vmem:[#allocation13 + $0x68] ss:$12 sps:$4 sm:$0xff]   ;;  %v6628_v21 = vld [vmem:[#allocation13 + $0x50] ss:$12 sps:$4 sm:$0xff]  }
 0x684   :  { %v7617_v30 = vadd.f32 %v6818_v24, %v2141_v38  ;;  %v6623_v24 = vld [vmem:[#allocation13 + $0x64] ss:$12 sps:$4 sm:$0xff]   ;;  %v6625_v38 = vld [vmem:[#allocation13 + $0x48] ss:$12 sps:$4 sm:$0xff]  }
 0x686   :  { %v2151_v37 = vpack.c.bf16 %v7617_v30, %v7617_v30 }
 0x688   :  { %2345 = vmatmul.mubr.bf16.vlgmr.msra.gmra.mxu0 %v2151_v37  ;;  %6212 = vmatmul.mubr.bf16.vlgmr.msra.gmra.mxu1 %v2151_v37  ;;  %v6631_v37 = vld [vmem:[#allocation13 + $0x34] ss:$12 sps:$4 sm:$0xff]  }
 0x689   :  { %2584 = vmatpush1.bf16.msra.mxu0 %v7450_v2  ;;  %2615 = vmatprep.mubr.bf16.mxu0 %v7144_v0  ;;  %v6602_v2 = vld [vmem:[#allocation11 + $0x98] ss:$12 sps:$4 sm:$0xff]  }
 0x68a   :  { %2585 = vmatprep.subr.bf16.mxu0 %v7454_v7  ;;  %6231 = vmatprep.mubr.msk.bf16.mxu1 %vm7146_vm0, %v7145_v50  ;;  %v6603_v7 = vld [vmem:[#allocation11 + $0x80] ss:$12 sps:$4 sm:$0xff]  }
 0x68b   :  { %6216 = vmatpush3.bf16.msra.mxu1 %v6601_v10  ;;  %v6632_v10 = vld [vmem:[#allocation13 + $0x38] ss:$12 sps:$4 sm:$0xff]  }
 0x68c   :  { %6217 = vmatprep.subr.bf16.mxu1 %v7145_v50 }
 0x68d   :  { %2586 = vmatpush1.bf16.msra.mxu0 %v7457_v11  ;;  %v6604_v11 = vld [vmem:[#allocation11 + $0x68] ss:$12 sps:$4 sm:$0xff]  }
 0x68e   :  { %2587 = vmatprep.subr.bf16.mxu0 %v7461_v14  ;;  %v6605_v14 = vld [vmem:[#allocation11 + $0x50] ss:$12 sps:$4 sm:$0xff]  }
 0x68f   :  { %6218 = vmatpush3.bf16.msra.mxu1 %v6602_v2  ;;  %v6629_v2 = vld [vmem:[#allocation13 + $0x30] ss:$12 sps:$4 sm:$0xff]  }
 0x690   :  { %6219 = vmatprep.subr.bf16.mxu1 %v7145_v50 }
 0x691   :  { %2588 = vmatpush1.bf16.msra.mxu0 %v7464_v16  ;;  %v6611_v16 = vld [vmem:[#allocation13 + $0xac] ss:$12 sps:$4 sm:$0xff]  }
 0x692   :  { %2589 = vmatprep.subr.bf16.mxu0 %v7470_v17  ;;  %v6607_v17 = vld [vmem:[#allocation11 + $0x20] ss:$12 sps:$4 sm:$0xff]  }
 0x693   :  { %6220 = vmatpush3.bf16.msra.mxu1 %v6603_v7  ;;  %v6635_v7 = vld [vmem:[#allocation13 + $0x1c] ss:$12 sps:$4 sm:$0xff]  }
 0x694   :  { %6221 = vmatprep.subr.bf16.mxu1 %v7145_v50 }
 0x695   :  { %2590 = vmatpush1.bf16.msra.mxu0 %v7468_v13  ;;  %v6606_v13 = vld [vmem:[#allocation11 + $0x38] ss:$12 sps:$4 sm:$0xff]  }
 0x696   :  { %2591 = vmatprep.subr.bf16.mxu0 %v7473_v20  ;;  %v6608_v20 = vld [vmem:[#allocation11 + $0x8] ss:$12 sps:$4 sm:$0xff]  }
 0x697   :  { %6222 = vmatpush3.bf16.msra.mxu1 %v6604_v11  ;;  %v6636_v11 = vld [vmem:[#allocation13 + $0x20] ss:$12 sps:$4 sm:$0xff]  }
 0x698   :  { %6223 = vmatprep.subr.bf16.mxu1 %v7145_v50 }
 0x699   :  { %2592 = vmatpush1.bf16.msra.mxu0 %v7477_v22  ;;  %v6612_v22 = vld [vmem:[#allocation13 + $0xb0] ss:$12 sps:$4 sm:$0xff]  }
 0x69a   :  { %2593 = vmatprep.subr.bf16.mxu0 %v7481_v26 }
 0x69b   :  { %6224 = vmatpush3.bf16.msra.mxu1 %v6605_v14  ;;  %v6633_v14 = vld [vmem:[#allocation13 + $0x18] ss:$12 sps:$4 sm:$0xff]  }
 0x69c   :  { %6225 = vmatprep.subr.bf16.mxu1 %v7145_v50 }
 0x69d   :  { %2594 = vmatpush1.bf16.msra.mxu0 %v7484_v28 }
 0x69e   :  { %2595 = vmatprep.subr.bf16.mxu0 %v7488_v33 }
 0x69f   :  { %6226 = vmatpush3.bf16.msra.mxu1 %v6606_v13  ;;  %v6640_v13 = vld [vmem:[#allocation13 + $0x8] ss:$12 sps:$4 sm:$0xff]  }
 0x6a0   :  { %6227 = vmatprep.subr.bf16.mxu1 %v7145_v50 }
 0x6a1   :  { %2596 = vmatpush1.bf16.msra.mxu0 %v7491_v34 }
 0x6a2   :  { %2597 = vmatprep.subr.bf16.mxu0 %v7530_v55 }
 0x6a3   :  { %6228 = vmatpush3.bf16.msra.mxu1 %v6607_v17  ;;  %v6637_v17 = vld [vmem:[#allocation13] ss:$12 sps:$4 sm:$0xff]  }
 0x6a4   :  { %6229 = vmatprep.subr.bf16.mxu1 %v7145_v50 }
 0x6a5   :  { %2598 = vmatpush1.bf16.msra.mxu0 %v7528_v54 }
 0x6a6   :  { %2877 = vmatprep.subr.bf16.mxu0 %v6611_v16  ;;  %v6639_v16 = vld [vmem:[#allocation13 + $0x4] ss:$12 sps:$4 sm:$0xff]  }
 0x6a7   :  { %6230 = vmatpush3.bf16.msra.mxu1 %v6608_v20  ;;  %v2697_v20 = vpack.c.bf16 %v7545_v18, %v7505_v46  ;;  %v7672_v46 = vld [vmem:[#allocation14 + $0x94] ss:$12 sps:$4 sm:$0xff]   ;;  %v7674_v18 = vld [vmem:[#allocation14 + $0x90] ss:$12 sps:$4 sm:$0xff]  }
 0x6a8   :  { %6235 = vmatprep.subr.bf16.mxu1 %v6612_v22 }
 0x748   :  { %v2346_v26 = vpop.f32.mrf.mxu0  ;;  %v2387_v28 = vpop.f32.mrf.mxu1 }
 0x749   :  { %v2393_v33 = vadd.f32 %v2346_v26, %v7388_v41  ;;  %v2407_v52 = vadd.f32 %v7416_v9, %v2387_v28  ;;  %v6616_v9 = vld [vmem:[#allocation13 + $0x98] ss:$12 sps:$4 sm:$0xff]   ;;  %v7668_v28 = vld [vmem:[#allocation14 + $0xa8] ss:$12 sps:$4 sm:$0xff]  }
 0x74a   :  { %v2348_v34 = vpop.f32.mrf.mxu0  ;;  %v6213_v54 = vpop.f32.mrf.mxu1  ;;  %v7666_v26 = vld [vmem:[#allocation14 + $0xac] ss:$12 sps:$4 sm:$0xff]  }
 0x74b   :  { %v5601_v55 = vmul.f32 -1.442695, %v2393_v33  ;;  %v2394_v23 = vadd.f32 %v2348_v34, %v7391_v44  ;;  %v7684_v33 = vld [vmem:[#allocation14 + $0x64] ss:$12 sps:$4 sm:$0xff]   ;;  %v7686_v34 = vld [vmem:[#allocation14 + $0x60] ss:$12 sps:$4 sm:$0xff]  }
 0x74c   :  { %v2350_v39 = vpop.f32.mrf.mxu0  ;;  %v2390_v40 = vpop.f32.mrf.mxu1  ;;  %v7690_v54 = vld [vmem:[#allocation14 + $0x4c] ss:$12 sps:$4 sm:$0xff]  }
 0x74d   :  { %6821 = vpow2.f32 %v5601_v55  ;;  %v5602_v48 = vmul.f32 -1.442695, %v2394_v23  ;;  %v7692_v55 = vld [vmem:[#allocation14 + $0x48] ss:$12 sps:$4 sm:$0xff]   ;;  %v7696_v39 = vld [vmem:[#allocation14 + $0x30] ss:$12 sps:$4 sm:$0xff]  }
 0x74e   :  { %v2351_v58 = vpop.f32.mrf.mxu0  ;;  %v6214_v45 = vpop.f32.mrf.mxu1  ;;  %v7698_v40 = vld [vmem:[#allocation14 + $0x34] ss:$12 sps:$4 sm:$0xff]   ;;  %v7707_v23 = vld [vmem:[#allocation14 + $0x4] ss:$12 sps:$4 sm:$0xff]  }
 0x74f   :  { %6823 = vpow2.f32 %v5602_v48  ;;  %v7700_v58 = vld [vmem:[#allocation14 + $0x1c] ss:$12 sps:$4 sm:$0xff]   ;;  %v7704_v45 = vld [vmem:[#allocation14 + $0x18] ss:$12 sps:$4 sm:$0xff]  }
 0x750   :  { %v6665_v48 = vld [vmem:[#allocation14 + $0xb0] ss:$12 sps:$4 sm:$0xff]  }
 0x75a   :  { %v6822_v53 = vpop.eup %6821 }
 0x75b   :  { %v2401_v49 = vadd.f32 1.0, %v6822_v53  ;;  %v7710_v53 = vld [vmem:[#allocation14] ss:$12 sps:$4 sm:$0xff]  }
 0x75c   :  { %v6824_v25 = vpop.eup %6823 }
 0x75d   :  { %6825 = vrcp.f32 %v2401_v49  ;;  %v2402_v59 = vadd.f32 1.0, %v6824_v25  ;;  %v6666_v49 = vld [vmem:[#allocation14 + $0x98] ss:$12 sps:$4 sm:$0xff]   ;;  %v6667_v25 = vld [vmem:[#allocation14 + $0x80] ss:$12 sps:$4 sm:$0xff]  }
 0x76a   :  { %v6826_v15 = vpop.eup %6825 }
 0x76b   :  { %v2408_v41 = vmul.f32 %v6826_v15, %v2407_v52  ;;  %v6668_v52 = vld [vmem:[#allocation14 + $0x68] ss:$12 sps:$4 sm:$0xff]   ;;  %v6669_v15 = vld [vmem:[#allocation14 + $0x50] ss:$12 sps:$4 sm:$0xff]  }
 0x76d   :  { %v2409_v57 = vadd.f32 %v2408_v41, %v7405_v61  ;;  %v2696_v61 = vpack.c.bf16 %v7441_v62, %v7419_v43  ;;  %v6621_v43 = vld [vmem:[#allocation13 + $0x60] ss:$12 sps:$4 sm:$0xff]   ;;  %v6670_v41 = vld [vmem:[#allocation14 + $0x38] ss:$12 sps:$4 sm:$0xff]  }
 0x76e   :  { %v6627_v62 = vld [vmem:[#allocation13 + $0x4c] ss:$12 sps:$4 sm:$0xff]  }
 0x76f   :  { %6827 = vtanh.f32 %v2409_v57  ;;  %v6671_v57 = vld [vmem:[#allocation14 + $0x20] ss:$12 sps:$4 sm:$0xff]  }
 0x770   :  { %6829 = vrcp.f32 %v2402_v59  ;;  %v6672_v59 = vld [vmem:[#allocation14 + $0x8] ss:$12 sps:$4 sm:$0xff]  }
 0x77c   :  { %v6828_v60 = vpop.eup %6827 }
 0x77d   :  { %v2411_v27 = vsub.f32 %v7617_v30, %v6828_v60  ;;  %v6830_v1 = vpop.eup %6829 }
 0x77f   :  { %v2412_v44 = vmul.f32 %v6830_v1, %v2411_v27 }
 0x781   :  { %v7651_v29 = vadd.f32 %v6828_v60, %v2412_v44 }
 0x783   :  { %v2422_v35 = vpack.c.bf16 %v7651_v29, %v7651_v29 }
 0x785   :  { %2616 = vmatmul.mubr.bf16.vlgmr.msra.gmra.mxu0 %v2422_v35  ;;  %6232 = vmatmul.mubr.bf16.vlgmr.msra.gmra.mxu1 %v2422_v35 }
 0x786   :  { %2878 = vmatpush1.bf16.msra.mxu0 %v6609_v56  ;;  %6236 = vmatpush3.bf16.msra.mxu1 %v6612_v22  ;;  %v2698_v22 = vpack.c.bf16 %v7617_v30, %v7581_v19  ;;  %v7678_v19 = vld [vmem:[#allocation14 + $0x7c] ss:$12 sps:$4 sm:$0xff]   ;;  %v7680_v30 = vld [vmem:[#allocation14 + $0x78] ss:$12 sps:$4 sm:$0xff]  }
 0x787   :  { %6251 = vmatprep.mubr.bf16.mxu1 %v2696_v61  ;;  %2879 = vmatprep.subr.bf16.mxu0 %v6615_v6 }
 0x788   :  { %6237 = vmatprep.subr.bf16.mxu1 %v6616_v9  ;;  %2909 = vmatprep.mubr.bf16.mxu0 %v7144_v0 }
 0x78a   :  { %2880 = vmatpush1.bf16.msra.mxu0 %v6613_v12  ;;  %6238 = vmatpush3.bf16.msra.mxu1 %v6616_v9 }
 0x78b   :  { %2881 = vmatprep.subr.bf16.mxu0 %v6619_v36  ;;  %6239 = vmatprep.subr.bf16.mxu1 %v6620_v32 }
 0x78e   :  { %2882 = vmatpush1.bf16.msra.mxu0 %v6617_v31  ;;  %6240 = vmatpush3.bf16.msra.mxu1 %v6620_v32 }
 0x78f   :  { %2883 = vmatprep.subr.bf16.mxu0 %v6623_v24  ;;  %6241 = vmatprep.subr.bf16.mxu1 %v6624_v63 }
 0x792   :  { %2884 = vmatpush1.bf16.msra.mxu0 %v6621_v43  ;;  %6242 = vmatpush3.bf16.msra.mxu1 %v6624_v63 }
 0x793   :  { %2885 = vmatprep.subr.bf16.mxu0 %v6627_v62  ;;  %6243 = vmatprep.subr.bf16.mxu1 %v6628_v21 }
 0x796   :  { %2886 = vmatpush1.bf16.msra.mxu0 %v6625_v38  ;;  %6244 = vmatpush3.bf16.msra.mxu1 %v6628_v21 }
 0x797   :  { %2887 = vmatprep.subr.bf16.mxu0 %v6631_v37  ;;  %6245 = vmatprep.subr.bf16.mxu1 %v6632_v10 }
 0x79a   :  { %2888 = vmatpush1.bf16.msra.mxu0 %v6629_v2  ;;  %6246 = vmatpush3.bf16.msra.mxu1 %v6632_v10 }
 0x79b   :  { %2889 = vmatprep.subr.bf16.mxu0 %v6635_v7  ;;  %6247 = vmatprep.subr.bf16.mxu1 %v6636_v11 }
 0x79e   :  { %2890 = vmatpush1.bf16.msra.mxu0 %v6633_v14  ;;  %6248 = vmatpush3.bf16.msra.mxu1 %v6636_v11 }
 0x79f   :  { %2891 = vmatprep.subr.bf16.mxu0 %v6639_v16  ;;  %6249 = vmatprep.subr.bf16.mxu1 %v6640_v13  ;;  %v7732_v16 = vld [vmem:[#allocation8 + $0x8] sm:$0xff] }
 0x7a2   :  { %2892 = vmatpush1.bf16.msra.mxu0 %v6637_v17  ;;  %6250 = vmatpush3.bf16.msra.mxu1 %v6640_v13  ;;  %v6674_v13 = vld [vmem:[#allocation14 + $0x98] ss:$12 sps:$4 sm:$0xff]   ;;  %v6675_v17 = vld [vmem:[#allocation14 + $0x80] ss:$12 sps:$4 sm:$0xff]  }
 0x7a3   :  { %6259 = vmatprep.subr.bf16.mxu1 %v7145_v50  ;;  %3212 = vmatprep.subr.bf16.mxu0 %v7666_v26 }
 0x7a5   :  { %2910 = vmatmul.mubr.bf16.vlgmr.msra.gmra.mxu0 %v2696_v61  ;;  %6252 = vmatmul.mubr.bf16.vlgmr.msra.gmra.mxu1 %v2697_v20 }
 0x7a6   :  { %6255 = vmatprep.mubr.bf16.mxu1 %v2698_v22  ;;  %2919 = vmatprep.mubr.bf16.mxu0 %v7144_v0 }
 0x7a7   :  { %3213 = vmatpush1.bf16.msra.mxu0 %v7668_v28  ;;  %6260 = vmatpush3.bf16.msra.mxu1 %v6665_v48  ;;  %v6678_v48 = vld [vmem:[#allocation14 + $0x38] ss:$12 sps:$4 sm:$0xff]  }
 0x7a8   :  { %3214 = vmatprep.subr.bf16.mxu0 %v7672_v46  ;;  %6261 = vmatprep.subr.bf16.mxu1 %v7145_v50 }
 0x7ab   :  { %3215 = vmatpush1.bf16.msra.mxu0 %v7674_v18  ;;  %6262 = vmatpush3.bf16.msra.mxu1 %v6666_v49  ;;  %v6679_v49 = vld [vmem:[#allocation14 + $0x20] ss:$12 sps:$4 sm:$0xff]  }
 0x7ac   :  { %3216 = vmatprep.subr.bf16.mxu0 %v7678_v19  ;;  %6263 = vmatprep.subr.bf16.mxu1 %v7145_v50 }
 0x7ad   :  { %2920 = vmatmul.mubr.bf16.gmra.mxu0 %v2697_v20  ;;  %v6676_v20 = vld [vmem:[#allocation14 + $0x68] ss:$12 sps:$4 sm:$0xff]  }
 0x7ae   :  { %2929 = vmatprep.mubr.bf16.mxu0 %v7144_v0 }
 0x7af   :  { %3217 = vmatpush1.bf16.msra.mxu0 %v7680_v30  ;;  %6264 = vmatpush3.bf16.msra.mxu1 %v6667_v25  ;;  %v6680_v25 = vld [vmem:[#allocation14 + $0x8] ss:$12 sps:$4 sm:$0xff]  }
 0x7b0   :  { %3218 = vmatprep.subr.bf16.mxu0 %v7684_v33  ;;  %6265 = vmatprep.subr.bf16.mxu1 %v7145_v50 }
 0x7b3   :  { %3219 = vmatpush1.bf16.msra.mxu0 %v7686_v34  ;;  %6266 = vmatpush3.bf16.msra.mxu1 %v6668_v52 }
 0x7b4   :  { %3220 = vmatprep.subr.bf16.mxu0 %v7690_v54  ;;  %6267 = vmatprep.subr.bf16.mxu1 %v7145_v50 }
 0x7b5   :  { %2930 = vmatmul.mubr.bf16.gmra.mxu0 %v2698_v22  ;;  %v6677_v22 = vld [vmem:[#allocation14 + $0x50] ss:$12 sps:$4 sm:$0xff]  }
 0x7b6   :  { %2939 = vmatprep.mubr.bf16.mxu0 %v7144_v0 }
 0x7b7   :  { %3221 = vmatpush1.bf16.msra.mxu0 %v7692_v55  ;;  %6268 = vmatpush3.bf16.msra.mxu1 %v6669_v15 }
 0x7b8   :  { %3222 = vmatprep.subr.bf16.mxu0 %v7698_v40  ;;  %6269 = vmatprep.subr.bf16.mxu1 %v7145_v50 }
 0x7bb   :  { %3223 = vmatpush1.bf16.msra.mxu0 %v7696_v39  ;;  %6270 = vmatpush3.bf16.msra.mxu1 %v6670_v41 }
 0x7bc   :  { %3224 = vmatprep.subr.bf16.mxu0 %v7700_v58  ;;  %6271 = vmatprep.subr.bf16.mxu1 %v7145_v50 }
 0x7bf   :  { %3225 = vmatpush1.bf16.msra.mxu0 %v7704_v45  ;;  %6272 = vmatpush3.bf16.msra.mxu1 %v6671_v57 }
 0x7c0   :  { %3226 = vmatprep.subr.bf16.mxu0 %v7707_v23  ;;  %6273 = vmatprep.subr.bf16.mxu1 %v7145_v50 }
 0x7c3   :  { %3227 = vmatpush1.bf16.msra.mxu0 %v7710_v53  ;;  %6274 = vmatpush3.bf16.msra.mxu1 %v6672_v59 }
 0x7c4   :  { %3479 = vmatprep.subr.bf16.mxu0 %v7666_v26  ;;  %6279 = vmatprep.subr.bf16.mxu1 %v7145_v50 }
 0x845   :  { %v2617_v60 = vpop.f32.mrf.mxu0  ;;  %v2658_v27 = vpop.f32.mrf.mxu1 }
 0x846   :  { %v2664_v1 = vadd.f32 %v2617_v60, %v7393_v47  ;;  %v6937_v47 = vld [vmem:[%s8137_s5] ss:$0 sm:$0xff] }
 0x847   :  { %v2619_v44 = vpop.f32.mrf.mxu0  ;;  %v6233_v56 = vpop.f32.mrf.mxu1  ;;  %v2678_v43 = vadd.f32 %v6937_v47, %v2658_v27 }
 0x848   :  { %v5627_v35 = vmul.f32 -1.442695, %v2664_v1  ;;  %v2665_v36 = vadd.f32 %v2619_v44, %v7397_v51 }
 0x849   :  { %v2621_v6 = vpop.f32.mrf.mxu0  ;;  %v2661_v9 = vpop.f32.mrf.mxu1 }
 0x84a   :  { %6831 = vpow2.f32 %v5627_v35  ;;  %v5628_v32 = vmul.f32 -1.442695, %v2665_v36 }
 0x84b   :  { %v2622_v61 = vpop.f32.mrf.mxu0  ;;  %v6234_v12 = vpop.f32.mrf.mxu1 }
 0x84c   :  { %6833 = vpow2.f32 %v5628_v32  ;;  %v2732_v32 = vld [vmem:[%s8140_s8] sm:$0x7] }
 0x857   :  { %v6832_v31 = vpop.eup %6831 }
 0x858   :  { %v2672_v24 = vadd.f32 1.0, %v6832_v31 }
 0x859   :  { %v6834_v63 = vpop.eup %6833 }
 0x85a   :  { %6835 = vrcp.f32 %v2672_v24  ;;  %v2673_v37 = vadd.f32 1.0, %v6834_v63 }
 0x865   :  { %v2911_v52 = vpop.f32.mrf.mxu0  ;;  %v7777_v44 = vpop.f32.mrf.mxu1 }
 0x867   :  { %v6836_v62 = vpop.eup %6835  ;;  %v2913_v15 = vpop.f32.mrf.mxu0 }
 0x868   :  { %v2679_v21 = vmul.f32 %v6836_v62, %v2678_v43  ;;  %v2984_v35 = vpop.f32.mrf.mxu1  ;;  %v7804_v43 = vrot.slane %v2732_v32, %v185_v5  ;;  %v7817_v5 = vrot.slane %v2732_v32, %v189_v8  ;;  %v7828_v8 = vrot.slane %v2732_v32, %v193_v42  ;;  %v6681_v42 = vld [vmem:[#allocation14 + $0xb0] ss:$12 sps:$4 sm:$0xff]   ;;  %v6684_v32 = vld [vmem:[#allocation14 + $0x68] ss:$12 sps:$4 sm:$0xff]  }
 0x869   :  { %v7765_v41 = vpop.f32.mrf.mxu0 }
 0x86a   :  { %v2680_v38 = vadd.f32 %v2679_v21, %v7409_v3  ;;  %v3051_v3 = vpack.c.bf16 %v7732_v16, %v7732_v16  ;;  %v7783_v9 = vpop.f32.mrf.mxu1 }
 0x86b   :  { %v7767_v57 = vpop.f32.mrf.mxu0 }
 0x86c   :  { %6837 = vtanh.f32 %v2680_v38  ;;  %v7787_v12 = vpop.f32.mrf.mxu1 }
 0x86d   :  { %6839 = vrcp.f32 %v2673_v37  ;;  %v7769_v59 = vpop.f32.mrf.mxu0 }
 0x86f   :  { %v7771_v60 = vpop.f32.mrf.mxu0 }
 0x871   :  { %v7773_v27 = vpop.f32.mrf.mxu0 }
 0x873   :  { %v7775_v1 = vpop.f32.mrf.mxu0 }
 0x875   :  { %v7779_v56 = vpop.f32.mrf.mxu0 }
 0x877   :  { %v7781_v6 = vpop.f32.mrf.mxu0 }
 0x879   :  { %v6838_v10 = vpop.eup %6837  ;;  %v7785_v61 = vpop.f32.mrf.mxu0 }
 0x87a   :  { %v2682_v51 = vsub.f32 %v7651_v29, %v6838_v10  ;;  %v6840_v2 = vpop.eup %6839 }
 0x87b   :  { %v7789_v36 = vpop.f32.mrf.mxu0 }
 0x87c   :  { %v2683_v7 = vmul.f32 %v6840_v2, %v2682_v51 }
 0x87e   :  { %v2684_v11 = vadd.f32 %v6838_v10, %v2683_v7  ;;  %v2912_v10 = vadd.f32 %v2911_v52, %v7804_v43 }
 0x880   :  { %v2699_v14 = vpack.c.bf16 %v2684_v11, %v7651_v29  ;;  %2687 = vst [vmem:[#allocation18] sm:$0xff] %v2684_v11  ;;  %v6673_v29 = vld [vmem:[#allocation14 + $0xb0] ss:$12 sps:$4 sm:$0xff]  }
 0x882   :  { %2940 = vmatmul.mubr.bf16.gmra.mxu0 %v2699_v14  ;;  %6256 = vmatmul.mubr.bf16.gmra.mxu1 %v2699_v14 }
 0x883   :  { %3244 = vmatprep.mubr.bf16.mxu0 %v7144_v0  ;;  %6275 = vmatprep.mubr.msk.bf16.mxu1 %vm7146_vm0, %v7145_v50 }
 0x88a   :  { %3245 = vmatmul.mubr.bf16.vlgmr.msra.gmra.mxu0 %v3051_v3  ;;  %6276 = vmatmul.mubr.bf16.vlgmr.msra.gmra.mxu1 %v3051_v3 }
 0x88b   :  { %3480 = vmatpush1.bf16.msra.mxu0 %v7668_v28  ;;  %3511 = vmatprep.mubr.bf16.mxu0 %v7144_v0 }
 0x88c   :  { %3481 = vmatprep.subr.bf16.mxu0 %v7672_v46  ;;  %6295 = vmatprep.mubr.msk.bf16.mxu1 %vm7146_vm0, %v7145_v50 }
 0x88d   :  { %6280 = vmatpush3.bf16.msra.mxu1 %v6673_v29 }
 0x88e   :  { %6281 = vmatprep.subr.bf16.mxu1 %v7145_v50 }
 0x88f   :  { %3482 = vmatpush1.bf16.msra.mxu0 %v7674_v18 }
 0x890   :  { %3483 = vmatprep.subr.bf16.mxu0 %v7678_v19 }
 0x891   :  { %6282 = vmatpush3.bf16.msra.mxu1 %v6674_v13 }
 0x892   :  { %6283 = vmatprep.subr.bf16.mxu1 %v7145_v50 }
 0x893   :  { %3484 = vmatpush1.bf16.msra.mxu0 %v7680_v30 }
 0x894   :  { %3485 = vmatprep.subr.bf16.mxu0 %v7684_v33 }
 0x895   :  { %6284 = vmatpush3.bf16.msra.mxu1 %v6675_v17 }
 0x896   :  { %6285 = vmatprep.subr.bf16.mxu1 %v7145_v50 }
 0x897   :  { %3486 = vmatpush1.bf16.msra.mxu0 %v7686_v34 }
 0x898   :  { %3487 = vmatprep.subr.bf16.mxu0 %v7690_v54 }
 0x899   :  { %6286 = vmatpush3.bf16.msra.mxu1 %v6676_v20 }
 0x89a   :  { %6287 = vmatprep.subr.bf16.mxu1 %v7145_v50 }
 0x89b   :  { %3488 = vmatpush1.bf16.msra.mxu0 %v7692_v55 }
 0x89c   :  { %3489 = vmatprep.subr.bf16.mxu0 %v7698_v40 }
 0x89d   :  { %6288 = vmatpush3.bf16.msra.mxu1 %v6677_v22  ;;  %v2914_v22 = vadd.f32 %v2913_v15, %v7817_v5  ;;  %v2985_v15 = vadd.f32 %v2984_v35, %v7828_v8  ;;  %v6683_v35 = vld [vmem:[#allocation14 + $0x80] ss:$12 sps:$4 sm:$0xff]  }
 0x89e   :  { %6289 = vmatprep.subr.bf16.mxu1 %v7145_v50 }
 0x89f   :  { %3490 = vmatpush1.bf16.msra.mxu0 %v7696_v39 }
 0x8a0   :  { %3491 = vmatprep.subr.bf16.mxu0 %v7700_v58 }
 0x8a1   :  { %6290 = vmatpush3.bf16.msra.mxu1 %v6678_v48 }
 0x8a2   :  { %6291 = vmatprep.subr.bf16.mxu1 %v7145_v50 }
 0x8a3   :  { %3492 = vmatpush1.bf16.msra.mxu0 %v7704_v45 }
 0x8a4   :  { %3493 = vmatprep.subr.bf16.mxu0 %v7707_v23 }
 0x8a5   :  { %6292 = vmatpush3.bf16.msra.mxu1 %v6679_v49 }
 0x8a6   :  { %6293 = vmatprep.subr.bf16.mxu1 %v7145_v50 }
 0x8a7   :  { %3494 = vmatpush1.bf16.msra.mxu0 %v7710_v53 }
 0x8a8   :  { %3747 = vmatprep.subr.bf16.mxu0 %v7666_v26 }
 0x8a9   :  { %6294 = vmatpush3.bf16.msra.mxu1 %v6680_v25 }
 0x8aa   :  { %6299 = vmatprep.subr.bf16.mxu1 %v7145_v50 }
 0x942   :  { %v7794_v31 = vpop.f32.mrf.mxu0  ;;  %v7796_v24 = vpop.f32.mrf.mxu1 }
 0x944   :  { %v7798_v63 = vpop.f32.mrf.mxu0  ;;  %v7800_v47 = vpop.f32.mrf.mxu1 }
 0x946   :  { %v7806_v62 = vpop.f32.mrf.mxu0  ;;  %v7808_v21 = vpop.f32.mrf.mxu1 }
 0x948   :  { %v7810_v38 = vpop.f32.mrf.mxu0  ;;  %v7812_v37 = vpop.f32.mrf.mxu1 }
 0x94a   :  { %v3246_v51 = vpop.f32.mrf.mxu0  ;;  %v3287_v2 = vpop.f32.mrf.mxu1 }
 0x94b   :  { %v3293_v7 = vadd.f32 %v3246_v51, %v2912_v10  ;;  %v7823_v10 = vld [vmem:[%s8141_s9] ss:$0 sm:$0xff] }
 0x94c   :  { %v3248_v11 = vpop.f32.mrf.mxu0  ;;  %v6277_v14 = vpop.f32.mrf.mxu1  ;;  %v3307_v51 = vadd.f32 %v7823_v10, %v3287_v2  ;;  %v6685_v2 = vld [vmem:[#allocation14 + $0x50] ss:$12 sps:$4 sm:$0xff]  }
 0x94d   :  { %v5678_v3 = vmul.f32 -1.442695, %v3293_v7  ;;  %v3294_v48 = vadd.f32 %v3248_v11, %v2914_v22 }
 0x94e   :  { %v3250_v29 = vpop.f32.mrf.mxu0  ;;  %v3290_v13 = vpop.f32.mrf.mxu1 }
 0x94f   :  { %6841 = vpow2.f32 %v5678_v3  ;;  %v5679_v49 = vmul.f32 -1.442695, %v3294_v48 }
 0x950   :  { %v3251_v17 = vpop.f32.mrf.mxu0  ;;  %v6278_v20 = vpop.f32.mrf.mxu1 }
 0x951   :  { %6843 = vpow2.f32 %v5679_v49  ;;  %v6686_v49 = vld [vmem:[#allocation14 + $0x38] ss:$12 sps:$4 sm:$0xff]  }
 0x95c   :  { %v6842_v25 = vpop.eup %6841 }
 0x95d   :  { %v3301_v52 = vadd.f32 1.0, %v6842_v25  ;;  %v6688_v25 = vld [vmem:[#allocation14 + $0x8] ss:$12 sps:$4 sm:$0xff]  }
 0x95e   :  { %v6844_v7 = vpop.eup %6843 }
 0x95f   :  { %6845 = vrcp.f32 %v3301_v52  ;;  %v3302_v3 = vadd.f32 1.0, %v6844_v7  ;;  %v2916_v52 = vadd.f32 %v7765_v41, %v7804_v43 }
 0x96c   :  { %v6846_v14 = vpop.eup %6845 }
 0x96d   :  { %v3308_v11 = vmul.f32 %v6846_v14, %v3307_v51 }
 0x96f   :  { %v3309_v29 = vadd.f32 %v3308_v11, %v2985_v15 }
 0x971   :  { %6847 = vtanh.f32 %v3309_v29 }
 0x972   :  { %6849 = vrcp.f32 %v3302_v3 }
 0x97e   :  { %v6848_v13 = vpop.eup %6847 }
 0x97f   :  { %v3311_v17 = vsub.f32 %v7732_v16, %v6848_v13  ;;  %v6850_v20 = vpop.eup %6849  ;;  %v6682_v16 = vld [vmem:[#allocation14 + $0x98] ss:$12 sps:$4 sm:$0xff]  }
 0x981   :  { %v3312_v22 = vmul.f32 %v6850_v20, %v3311_v17 }
 0x983   :  { %v7832_v48 = vadd.f32 %v6848_v13, %v3312_v22  ;;  %v2918_v22 = vadd.f32 %v7767_v57, %v7817_v5 }
 0x985   :  { %v3318_v4 = vpack.c.bf16 %v7832_v48, %v7832_v48 }
 0x987   :  { %3512 = vmatmul.mubr.bf16.vlgmr.msra.gmra.mxu0 %v3318_v4  ;;  %6296 = vmatmul.mubr.bf16.vlgmr.msra.gmra.mxu1 %v3318_v4 }
 0x988   :  { %3748 = vmatpush1.bf16.msra.mxu0 %v7668_v28  ;;  %3779 = vmatprep.mubr.bf16.mxu0 %v7144_v0 }
 0x989   :  { %3749 = vmatprep.subr.bf16.mxu0 %v7672_v46  ;;  %6315 = vmatprep.mubr.msk.bf16.mxu1 %vm7146_vm0, %v7145_v50 }
 0x98a   :  { %6300 = vmatpush3.bf16.msra.mxu1 %v6681_v42 }
 0x98b   :  { %6301 = vmatprep.subr.bf16.mxu1 %v7145_v50 }
 0x98c   :  { %3750 = vmatpush1.bf16.msra.mxu0 %v7674_v18 }
 0x98d   :  { %3751 = vmatprep.subr.bf16.mxu0 %v7678_v19 }
 0x98e   :  { %6302 = vmatpush3.bf16.msra.mxu1 %v6682_v16 }
 0x98f   :  { %6303 = vmatprep.subr.bf16.mxu1 %v7145_v50 }
 0x990   :  { %3752 = vmatpush1.bf16.msra.mxu0 %v7680_v30 }
 0x991   :  { %3753 = vmatprep.subr.bf16.mxu0 %v7684_v33 }
 0x992   :  { %6304 = vmatpush3.bf16.msra.mxu1 %v6683_v35 }
 0x993   :  { %6305 = vmatprep.subr.bf16.mxu1 %v7145_v50 }
 0x994   :  { %3754 = vmatpush1.bf16.msra.mxu0 %v7686_v34 }
 0x995   :  { %3755 = vmatprep.subr.bf16.mxu0 %v7690_v54 }
 0x996   :  { %6306 = vmatpush3.bf16.msra.mxu1 %v6684_v32 }
 0x997   :  { %6307 = vmatprep.subr.bf16.mxu1 %v7145_v50 }
 0x998   :  { %3756 = vmatpush1.bf16.msra.mxu0 %v7692_v55 }
 0x999   :  { %3757 = vmatprep.subr.bf16.mxu0 %v7698_v40 }
 0x99a   :  { %6308 = vmatpush3.bf16.msra.mxu1 %v6685_v2 }
 0x99b   :  { %6309 = vmatprep.subr.bf16.mxu1 %v7145_v50 }
 0x99c   :  { %3758 = vmatpush1.bf16.msra.mxu0 %v7696_v39 }
 0x99d   :  { %3759 = vmatprep.subr.bf16.mxu0 %v7700_v58 }
 0x99e   :  { %6310 = vmatpush3.bf16.msra.mxu1 %v6686_v49  ;;  %v2988_v49 = vadd.f32 %v7787_v12, %v7828_v8 }
 0x99f   :  { %6311 = vmatprep.subr.bf16.mxu1 %v7145_v50 }
 0x9a0   :  { %3760 = vmatpush1.bf16.msra.mxu0 %v7704_v45 }
 0x9a1   :  { %3761 = vmatprep.subr.bf16.mxu0 %v7707_v23 }
 0x9a4   :  { %3762 = vmatpush1.bf16.msra.mxu0 %v7710_v53 }
 0x9a5   :  { %4015 = vmatprep.subr.bf16.mxu0 %v7666_v26  ;;  %v6687_v26 = vld [vmem:[#allocation14 + $0x20] ss:$12 sps:$4 sm:$0xff]  }
 0x9a6   :  { %6312 = vmatpush3.bf16.msra.mxu1 %v6687_v26 }
 0x9a7   :  { %6313 = vmatprep.subr.bf16.mxu1 %v7145_v50 }
 0x9aa   :  { %6314 = vmatpush3.bf16.msra.mxu1 %v6688_v25 }
 0x9ab   :  { %6319 = vmatprep.subr.bf16.mxu1 %v7145_v50 }
 0xa47   :  { %v3513_v51 = vpop.f32.mrf.mxu0  ;;  %v3554_v7 = vpop.f32.mrf.mxu1 }
 0xa48   :  { %v3560_v14 = vadd.f32 %v3513_v51, %v2916_v52  ;;  %v3574_v32 = vadd.f32 %v7823_v10, %v3554_v7 }
 0xa49   :  { %v3515_v15 = vpop.f32.mrf.mxu0  ;;  %v6297_v11 = vpop.f32.mrf.mxu1 }
 0xa4a   :  { %v5704_v3 = vmul.f32 -1.442695, %v3560_v14  ;;  %v3561_v4 = vadd.f32 %v3515_v15, %v2918_v22 }
 0xa4b   :  { %v3517_v29 = vpop.f32.mrf.mxu0  ;;  %v3557_v13 = vpop.f32.mrf.mxu1 }
 0xa4c   :  { %6851 = vpow2.f32 %v5704_v3  ;;  %v5705_v42 = vmul.f32 -1.442695, %v3561_v4 }
 0xa4d   :  { %v3518_v17 = vpop.f32.mrf.mxu0  ;;  %v6298_v20 = vpop.f32.mrf.mxu1 }
 0xa4e   :  { %6853 = vpow2.f32 %v5705_v42  ;;  %v2924_v17 = vadd.f32 %v7771_v60, %v7817_v5 }
 0xa59   :  { %v6852_v16 = vpop.eup %6851 }
 0xa5a   :  { %v3568_v35 = vadd.f32 1.0, %v6852_v16 }
 0xa5b   :  { %v6854_v41 = vpop.eup %6853 }
 0xa5c   :  { %6855 = vrcp.f32 %v3568_v35  ;;  %v3569_v52 = vadd.f32 1.0, %v6854_v41  ;;  %v2993_v41 = vadd.f32 %v7777_v44, %v7828_v8  ;;  %v7916_v44 = vld [vmem:[#allocation14 + $0xac] ss:$12 sps:$4 sm:$0xff]  }
 0xa69   :  { %v6856_v2 = vpop.eup %6855 }
 0xa6a   :  { %v3575_v26 = vmul.f32 %v6856_v2, %v3574_v32 }
 0xa6c   :  { %v3576_v25 = vadd.f32 %v3575_v26, %v2988_v49 }
 0xa6e   :  { %6857 = vtanh.f32 %v3576_v25 }
 0xa6f   :  { %6859 = vrcp.f32 %v3569_v52 }
 0xa7b   :  { %v6858_v51 = vpop.eup %6857 }
 0xa7c   :  { %v3578_v57 = vsub.f32 %v7832_v48, %v6858_v51  ;;  %v6860_v14 = vpop.eup %6859 }
 0xa7e   :  { %v3579_v15 = vmul.f32 %v6860_v14, %v3578_v57  ;;  %v7918_v14 = vld [vmem:[#allocation14 + $0xa8] ss:$12 sps:$4 sm:$0xff]  }
 0xa80   :  { %v7871_v11 = vadd.f32 %v6858_v51, %v3579_v15  ;;  %v6700_v15 = vld [vmem:[#allocation14 + $0xb0] ss:$12 sps:$4 sm:$0xff]  }
 0xa82   :  { %v3586_v3 = vpack.c.bf16 %v7871_v11, %v7871_v11 }
 0xa84   :  { %3780 = vmatmul.mubr.bf16.vlgmr.msra.gmra.mxu0 %v3586_v3  ;;  %6316 = vmatmul.mubr.bf16.vlgmr.msra.gmra.mxu1 %v3586_v3  ;;  %v7922_v3 = vld [vmem:[#allocation14 + $0x94] ss:$12 sps:$4 sm:$0xff]  }
 0xa85   :  { %4016 = vmatpush1.bf16.msra.mxu0 %v7668_v28  ;;  %4047 = vmatprep.mubr.bf16.mxu0 %v7144_v0  ;;  %v6689_v28 = vld [vmem:[#allocation14 + $0xb0] ss:$12 sps:$4 sm:$0xff]  }
 0xa86   :  { %4017 = vmatprep.subr.bf16.mxu0 %v7672_v46  ;;  %6335 = vmatprep.mubr.msk.bf16.mxu1 %vm7146_vm0, %v7145_v50  ;;  %v6690_v46 = vld [vmem:[#allocation14 + $0x98] ss:$12 sps:$4 sm:$0xff]  }
 0xa87   :  { %6320 = vmatpush3.bf16.msra.mxu1 %v6689_v28  ;;  %v7925_v28 = vld [vmem:[#allocation14 + $0x90] ss:$12 sps:$4 sm:$0xff]  }
 0xa88   :  { %6321 = vmatprep.subr.bf16.mxu1 %v7145_v50 }
 0xa89   :  { %4018 = vmatpush1.bf16.msra.mxu0 %v7674_v18  ;;  %v6691_v18 = vld [vmem:[#allocation14 + $0x80] ss:$12 sps:$4 sm:$0xff]  }
 0xa8a   :  { %4019 = vmatprep.subr.bf16.mxu0 %v7678_v19  ;;  %v6692_v19 = vld [vmem:[#allocation14 + $0x68] ss:$12 sps:$4 sm:$0xff]  }
 0xa8b   :  { %6322 = vmatpush3.bf16.msra.mxu1 %v6690_v46  ;;  %v6704_v46 = vld [vmem:[#allocation14 + $0x98] ss:$12 sps:$4 sm:$0xff]  }
 0xa8c   :  { %6323 = vmatprep.subr.bf16.mxu1 %v7145_v50 }
 0xa8d   :  { %4020 = vmatpush1.bf16.msra.mxu0 %v7680_v30  ;;  %v6693_v30 = vld [vmem:[#allocation14 + $0x50] ss:$12 sps:$4 sm:$0xff]  }
 0xa8e   :  { %4021 = vmatprep.subr.bf16.mxu0 %v7684_v33  ;;  %v6694_v33 = vld [vmem:[#allocation14 + $0x38] ss:$12 sps:$4 sm:$0xff]  }
 0xa8f   :  { %6324 = vmatpush3.bf16.msra.mxu1 %v6691_v18  ;;  %v7929_v18 = vld [vmem:[#allocation14 + $0x7c] ss:$12 sps:$4 sm:$0xff]  }
 0xa90   :  { %6325 = vmatprep.subr.bf16.mxu1 %v7145_v50 }
 0xa91   :  { %4022 = vmatpush1.bf16.msra.mxu0 %v7686_v34  ;;  %v6695_v34 = vld [vmem:[#allocation14 + $0x20] ss:$12 sps:$4 sm:$0xff]  }
 0xa92   :  { %4023 = vmatprep.subr.bf16.mxu0 %v7690_v54  ;;  %v6696_v54 = vld [vmem:[#allocation14 + $0x8] ss:$12 sps:$4 sm:$0xff]  }
 0xa93   :  { %6326 = vmatpush3.bf16.msra.mxu1 %v6692_v19  ;;  %v7932_v19 = vld [vmem:[#allocation14 + $0x78] ss:$12 sps:$4 sm:$0xff]  }
 0xa94   :  { %6327 = vmatprep.subr.bf16.mxu1 %v7145_v50 }
 0xa95   :  { %4024 = vmatpush1.bf16.msra.mxu0 %v7692_v55  ;;  %v2922_v55 = vadd.f32 %v7769_v59, %v7804_v43 }
 0xa96   :  { %4025 = vmatprep.subr.bf16.mxu0 %v7698_v40 }
 0xa97   :  { %6328 = vmatpush3.bf16.msra.mxu1 %v6693_v30  ;;  %v6708_v30 = vld [vmem:[#allocation14 + $0x80] ss:$12 sps:$4 sm:$0xff]  }
 0xa98   :  { %6329 = vmatprep.subr.bf16.mxu1 %v7145_v50 }
 0xa99   :  { %4026 = vmatpush1.bf16.msra.mxu0 %v7696_v39 }
 0xa9a   :  { %4027 = vmatprep.subr.bf16.mxu0 %v7700_v58 }
 0xa9b   :  { %6330 = vmatpush3.bf16.msra.mxu1 %v6694_v33  ;;  %v7936_v33 = vld [vmem:[#allocation14 + $0x60] ss:$12 sps:$4 sm:$0xff]  }
 0xa9c   :  { %6331 = vmatprep.subr.bf16.mxu1 %v7145_v50 }
 0xa9d   :  { %4028 = vmatpush1.bf16.msra.mxu0 %v7704_v45 }
 0xa9e   :  { %4029 = vmatprep.subr.bf16.mxu0 %v7707_v23 }
 0xa9f   :  { %6332 = vmatpush3.bf16.msra.mxu1 %v6695_v34  ;;  %v7938_v34 = vld [vmem:[#allocation14 + $0x64] ss:$12 sps:$4 sm:$0xff]  }
 0xaa0   :  { %6333 = vmatprep.subr.bf16.mxu1 %v7145_v50 }
 0xaa1   :  { %4030 = vmatpush1.bf16.msra.mxu0 %v7710_v53 }
 0xaa2   :  { %4283 = vmatprep.subr.bf16.mxu0 %v7916_v44 }
 0xaa3   :  { %6334 = vmatpush3.bf16.msra.mxu1 %v6696_v54  ;;  %v6712_v54 = vld [vmem:[#allocation14 + $0x68] ss:$12 sps:$4 sm:$0xff]  }
 0xaa4   :  { %6339 = vmatprep.subr.bf16.mxu1 %v7145_v50 }
 0xb44   :  { %v3781_v39 = vpop.f32.mrf.mxu0  ;;  %v3822_v40 = vpop.f32.mrf.mxu1 }
 0xb45   :  { %v3828_v58 = vadd.f32 %v3781_v39, %v2922_v55  ;;  %v3842_v16 = vadd.f32 %v7823_v10, %v3822_v40  ;;  %v7941_v55 = vld [vmem:[#allocation14 + $0x4c] ss:$12 sps:$4 sm:$0xff]   ;;  %v7945_v39 = vld [vmem:[#allocation14 + $0x48] ss:$12 sps:$4 sm:$0xff]   ;;  %v6716_v40 = vld [vmem:[#allocation14 + $0x50] ss:$12 sps:$4 sm:$0xff]  }
 0xb46   :  { %v3783_v45 = vpop.f32.mrf.mxu0  ;;  %v6317_v23 = vpop.f32.mrf.mxu1 }
 0xb47   :  { %v5730_v53 = vmul.f32 -1.442695, %v3828_v58  ;;  %v3829_v20 = vadd.f32 %v3783_v45, %v2924_v17  ;;  %v7949_v58 = vld [vmem:[#allocation14 + $0x34] ss:$12 sps:$4 sm:$0xff]   ;;  %v7952_v45 = vld [vmem:[#allocation14 + $0x30] ss:$12 sps:$4 sm:$0xff]  }
 0xb48   :  { %v3785_v12 = vpop.f32.mrf.mxu0  ;;  %v3825_v7 = vpop.f32.mrf.mxu1  ;;  %v6720_v23 = vld [vmem:[#allocation14 + $0x38] ss:$12 sps:$4 sm:$0xff]   ;;  %v6728_v17 = vld [vmem:[#allocation14 + $0x8] ss:$12 sps:$4 sm:$0xff]  }
 0xb49   :  { %6861 = vpow2.f32 %v5730_v53  ;;  %v5731_v22 = vmul.f32 -1.442695, %v3829_v20  ;;  %v7956_v53 = vld [vmem:[#allocation14 + $0x1c] ss:$12 sps:$4 sm:$0xff]   ;;  %v7959_v12 = vld [vmem:[#allocation14 + $0x18] ss:$12 sps:$4 sm:$0xff]   ;;  %v2926_v20 = vadd.f32 %v7773_v27, %v7804_v43 }
 0xb4a   :  { %v3786_v29 = vpop.f32.mrf.mxu0  ;;  %v6318_v13 = vpop.f32.mrf.mxu1  ;;  %v6724_v7 = vld [vmem:[#allocation14 + $0x20] ss:$12 sps:$4 sm:$0xff]  }
 0xb4b   :  { %6863 = vpow2.f32 %v5731_v22  ;;  %v7963_v29 = vld [vmem:[#allocation14 + $0x4] ss:$12 sps:$4 sm:$0xff]   ;;  %v7966_v13 = vld [vmem:[#allocation14] ss:$12 sps:$4 sm:$0xff]  }
 0xb56   :  { %v6862_v4 = vpop.eup %6861 }
 0xb57   :  { %v3836_v42 = vadd.f32 1.0, %v6862_v4 }
 0xb58   :  { %v6864_v59 = vpop.eup %6863 }
 0xb59   :  { %6865 = vrcp.f32 %v3836_v42  ;;  %v3837_v49 = vadd.f32 1.0, %v6864_v59 }
 0xb66   :  { %v6866_v35 = vpop.eup %6865 }
 0xb67   :  { %v3843_v32 = vmul.f32 %v6866_v35, %v3842_v16 }
 0xb69   :  { %v3844_v2 = vadd.f32 %v3843_v32, %v2993_v41 }
 0xb6b   :  { %6867 = vtanh.f32 %v3844_v2 }
 0xb6c   :  { %6869 = vrcp.f32 %v3837_v49 }
 0xb78   :  { %v6868_v26 = vpop.eup %6867 }
 0xb79   :  { %v3846_v60 = vsub.f32 %v7871_v11, %v6868_v26  ;;  %v6870_v25 = vpop.eup %6869 }
 0xb7b   :  { %v3847_v52 = vmul.f32 %v6870_v25, %v3846_v60 }
 0xb7d   :  { %v7909_v51 = vadd.f32 %v6868_v26, %v3847_v52  ;;  %v2928_v26 = vadd.f32 %v7775_v1, %v7817_v5 }
 0xb7f   :  { %v3854_v57 = vpack.c.bf16 %v7909_v51, %v7909_v51 }
 0xb81   :  { %4048 = vmatmul.mubr.bf16.vlgmr.msra.gmra.mxu0 %v3854_v57  ;;  %6336 = vmatmul.mubr.bf16.vlgmr.msra.gmra.mxu1 %v3854_v57 }
 0xb82   :  { %4315 = vmatprep.mubr.bf16.mxu0 %v7144_v0  ;;  %6355 = vmatprep.mubr.msk.bf16.mxu1 %vm7146_vm0, %v7145_v50 }
 0xb83   :  { %4284 = vmatpush1.bf16.msra.mxu0 %v7918_v14  ;;  %6340 = vmatpush3.bf16.msra.mxu1 %v6700_v15 }
 0xb84   :  { %6341 = vmatprep.subr.bf16.mxu1 %v7145_v50  ;;  %4285 = vmatprep.subr.bf16.mxu0 %v7922_v3 }
 0xb87   :  { %4286 = vmatpush1.bf16.msra.mxu0 %v7925_v28  ;;  %6342 = vmatpush3.bf16.msra.mxu1 %v6704_v46 }
 0xb88   :  { %6343 = vmatprep.subr.bf16.mxu1 %v7145_v50  ;;  %4287 = vmatprep.subr.bf16.mxu0 %v7929_v18 }
 0xb8b   :  { %4288 = vmatpush1.bf16.msra.mxu0 %v7932_v19  ;;  %6344 = vmatpush3.bf16.msra.mxu1 %v6708_v30  ;;  %v2996_v30 = vadd.f32 %v7783_v9, %v7828_v8  ;;  %v6729_v9 = vld [vmem:[#allocation14 + $0xb0] ss:$12 sps:$4 sm:$0xff]  }
 0xb8c   :  { %6345 = vmatprep.subr.bf16.mxu1 %v7145_v50  ;;  %4289 = vmatprep.subr.bf16.mxu0 %v7938_v34 }
 0xb8f   :  { %4290 = vmatpush1.bf16.msra.mxu0 %v7936_v33  ;;  %6346 = vmatpush3.bf16.msra.mxu1 %v6712_v54 }
 0xb90   :  { %4291 = vmatprep.subr.bf16.mxu0 %v7941_v55  ;;  %6347 = vmatprep.subr.bf16.mxu1 %v7145_v50 }
 0xb93   :  { %4292 = vmatpush1.bf16.msra.mxu0 %v7945_v39  ;;  %6348 = vmatpush3.bf16.msra.mxu1 %v6716_v40 }
 0xb94   :  { %4293 = vmatprep.subr.bf16.mxu0 %v7949_v58  ;;  %6349 = vmatprep.subr.bf16.mxu1 %v7145_v50 }
 0xb97   :  { %4294 = vmatpush1.bf16.msra.mxu0 %v7952_v45  ;;  %6350 = vmatpush3.bf16.msra.mxu1 %v6720_v23 }
 0xb98   :  { %4295 = vmatprep.subr.bf16.mxu0 %v7956_v53  ;;  %6351 = vmatprep.subr.bf16.mxu1 %v7145_v50 }
 0xb9b   :  { %4296 = vmatpush1.bf16.msra.mxu0 %v7959_v12  ;;  %6352 = vmatpush3.bf16.msra.mxu1 %v6724_v7 }
 0xb9c   :  { %4297 = vmatprep.subr.bf16.mxu0 %v7963_v29  ;;  %6353 = vmatprep.subr.bf16.mxu1 %v7145_v50 }
 0xb9f   :  { %4298 = vmatpush1.bf16.msra.mxu0 %v7966_v13  ;;  %6354 = vmatpush3.bf16.msra.mxu1 %v6728_v17 }
 0xba0   :  { %4551 = vmatprep.subr.bf16.mxu0 %v7916_v44  ;;  %6359 = vmatprep.subr.bf16.mxu1 %v7145_v50 }
 0xc41   :  { %v4049_v22 = vpop.f32.mrf.mxu0  ;;  %v4090_v4 = vpop.f32.mrf.mxu1 }
 0xc42   :  { %v4096_v42 = vadd.f32 %v4049_v22, %v2926_v20  ;;  %v4110_v15 = vadd.f32 %v7823_v10, %v4090_v4  ;;  %v6730_v4 = vld [vmem:[#allocation14 + $0x98] ss:$12 sps:$4 sm:$0xff]  }
 0xc43   :  { %v4051_v59 = vpop.f32.mrf.mxu0  ;;  %v6337_v16 = vpop.f32.mrf.mxu1 }
 0xc44   :  { %v5756_v35 = vmul.f32 -1.442695, %v4096_v42  ;;  %v4097_v60 = vadd.f32 %v4051_v59, %v2928_v26  ;;  %v6731_v59 = vld [vmem:[#allocation14 + $0x80] ss:$12 sps:$4 sm:$0xff]   ;;  %v6732_v16 = vld [vmem:[#allocation14 + $0x68] ss:$12 sps:$4 sm:$0xff]  }
 0xc45   :  { %v4053_v41 = vpop.f32.mrf.mxu0  ;;  %v4093_v32 = vpop.f32.mrf.mxu1 }
 0xc46   :  { %6871 = vpow2.f32 %v5756_v35  ;;  %v5757_v25 = vmul.f32 -1.442695, %v4097_v60  ;;  %v6733_v35 = vld [vmem:[#allocation14 + $0x50] ss:$12 sps:$4 sm:$0xff]   ;;  %v6734_v41 = vld [vmem:[#allocation14 + $0x38] ss:$12 sps:$4 sm:$0xff]  }
 0xc47   :  { %v4054_v2 = vpop.f32.mrf.mxu0  ;;  %v6338_v49 = vpop.f32.mrf.mxu1  ;;  %v6735_v32 = vld [vmem:[#allocation14 + $0x20] ss:$12 sps:$4 sm:$0xff]  }
 0xc48   :  { %6873 = vpow2.f32 %v5757_v25  ;;  %v6736_v2 = vld [vmem:[#allocation14 + $0x8] ss:$12 sps:$4 sm:$0xff]   ;;  %v2932_v49 = vadd.f32 %v7779_v56, %v7804_v43 }
 0xc53   :  { %v6872_v52 = vpop.eup %6871 }
 0xc54   :  { %v4104_v57 = vadd.f32 1.0, %v6872_v52 }
 0xc55   :  { %v6874_v27 = vpop.eup %6873 }
 0xc56   :  { %6875 = vrcp.f32 %v4104_v57  ;;  %v4105_v23 = vadd.f32 1.0, %v6874_v27 }
 0xc63   :  { %v6876_v46 = vpop.eup %6875 }
 0xc64   :  { %v4111_v54 = vmul.f32 %v6876_v46, %v4110_v15 }
 0xc66   :  { %v4112_v40 = vadd.f32 %v4111_v54, %v2996_v30 }
 0xc68   :  { %6877 = vtanh.f32 %v4112_v40  ;;  %v2934_v40 = vadd.f32 %v7781_v6, %v7817_v5 }
 0xc69   :  { %6879 = vrcp.f32 %v4105_v23 }
 0xc75   :  { %v6878_v7 = vpop.eup %6877 }
 0xc76   :  { %v4114_v1 = vsub.f32 %v7909_v51, %v6878_v7  ;;  %v6880_v17 = vpop.eup %6879 }
 0xc78   :  { %v4115_v20 = vmul.f32 %v6880_v17, %v4114_v1 }
 0xc7a   :  { %v7981_v22 = vadd.f32 %v6878_v7, %v4115_v20 }
 0xc7c   :  { %v4122_v42 = vpack.c.bf16 %v7981_v22, %v7981_v22 }
 0xc7e   :  { %4316 = vmatmul.mubr.bf16.vlgmr.msra.gmra.mxu0 %v4122_v42  ;;  %6356 = vmatmul.mubr.bf16.vlgmr.msra.gmra.mxu1 %v4122_v42 }
 0xc7f   :  { %4552 = vmatpush1.bf16.msra.mxu0 %v7918_v14  ;;  %4583 = vmatprep.mubr.bf16.mxu0 %v7144_v0 }
 0xc80   :  { %4553 = vmatprep.subr.bf16.mxu0 %v7922_v3  ;;  %6375 = vmatprep.mubr.msk.bf16.mxu1 %vm7146_vm0, %v7145_v50 }
 0xc81   :  { %6360 = vmatpush3.bf16.msra.mxu1 %v6729_v9  ;;  %v3001_v9 = vadd.f32 %v7800_v47, %v7828_v8  ;;  %v6737_v47 = vld [vmem:[#allocation14 + $0xb0] ss:$12 sps:$4 sm:$0xff]  }
 0xc82   :  { %6361 = vmatprep.subr.bf16.mxu1 %v7145_v50 }
 0xc83   :  { %4554 = vmatpush1.bf16.msra.mxu0 %v7925_v28 }
 0xc84   :  { %4555 = vmatprep.subr.bf16.mxu0 %v7929_v18 }
 0xc85   :  { %6362 = vmatpush3.bf16.msra.mxu1 %v6730_v4 }
 0xc86   :  { %6363 = vmatprep.subr.bf16.mxu1 %v7145_v50 }
 0xc87   :  { %4556 = vmatpush1.bf16.msra.mxu0 %v7932_v19 }
 0xc88   :  { %4557 = vmatprep.subr.bf16.mxu0 %v7938_v34 }
 0xc89   :  { %6364 = vmatpush3.bf16.msra.mxu1 %v6731_v59 }
 0xc8a   :  { %6365 = vmatprep.subr.bf16.mxu1 %v7145_v50 }
 0xc8b   :  { %4558 = vmatpush1.bf16.msra.mxu0 %v7936_v33 }
 0xc8c   :  { %4559 = vmatprep.subr.bf16.mxu0 %v7941_v55 }
 0xc8d   :  { %6366 = vmatpush3.bf16.msra.mxu1 %v6732_v16 }
 0xc8e   :  { %6367 = vmatprep.subr.bf16.mxu1 %v7145_v50 }
 0xc8f   :  { %4560 = vmatpush1.bf16.msra.mxu0 %v7945_v39 }
 0xc90   :  { %4561 = vmatprep.subr.bf16.mxu0 %v7949_v58 }
 0xc91   :  { %6368 = vmatpush3.bf16.msra.mxu1 %v6733_v35 }
 0xc92   :  { %6369 = vmatprep.subr.bf16.mxu1 %v7145_v50 }
 0xc93   :  { %4562 = vmatpush1.bf16.msra.mxu0 %v7952_v45 }
 0xc94   :  { %4563 = vmatprep.subr.bf16.mxu0 %v7956_v53 }
 0xc95   :  { %6370 = vmatpush3.bf16.msra.mxu1 %v6734_v41 }
 0xc96   :  { %6371 = vmatprep.subr.bf16.mxu1 %v7145_v50 }
 0xc97   :  { %4564 = vmatpush1.bf16.msra.mxu0 %v7959_v12 }
 0xc98   :  { %4565 = vmatprep.subr.bf16.mxu0 %v7963_v29 }
 0xc99   :  { %6372 = vmatpush3.bf16.msra.mxu1 %v6735_v32 }
 0xc9a   :  { %6373 = vmatprep.subr.bf16.mxu1 %v7145_v50 }
 0xc9b   :  { %4566 = vmatpush1.bf16.msra.mxu0 %v7966_v13 }
 0xc9c   :  { %4819 = vmatprep.subr.bf16.mxu0 %v7916_v44 }
 0xc9d   :  { %6374 = vmatpush3.bf16.msra.mxu1 %v6736_v2 }
 0xc9e   :  { %6379 = vmatprep.subr.bf16.mxu1 %v7145_v50 }
 0xd3e   :  { %v4317_v26 = vpop.f32.mrf.mxu0  ;;  %v4358_v60 = vpop.f32.mrf.mxu1 }
 0xd3f   :  { %v4364_v25 = vadd.f32 %v4317_v26, %v2932_v49  ;;  %v4378_v20 = vadd.f32 %v7823_v10, %v4358_v60  ;;  %v6738_v26 = vld [vmem:[#allocation14 + $0x98] ss:$12 sps:$4 sm:$0xff]   ;;  %v6739_v60 = vld [vmem:[#allocation14 + $0x80] ss:$12 sps:$4 sm:$0xff]  }
 0xd40   :  { %v4319_v52 = vpop.f32.mrf.mxu0  ;;  %v6357_v57 = vpop.f32.mrf.mxu1 }
 0xd41   :  { %v5782_v27 = vmul.f32 -1.442695, %v4364_v25  ;;  %v4365_v23 = vadd.f32 %v4319_v52, %v2934_v40  ;;  %v6740_v25 = vld [vmem:[#allocation14 + $0x68] ss:$12 sps:$4 sm:$0xff]   ;;  %v6741_v52 = vld [vmem:[#allocation14 + $0x50] ss:$12 sps:$4 sm:$0xff]  }
 0xd42   :  { %v4321_v15 = vpop.f32.mrf.mxu0  ;;  %v4361_v46 = vpop.f32.mrf.mxu1  ;;  %v6742_v57 = vld [vmem:[#allocation14 + $0x38] ss:$12 sps:$4 sm:$0xff]  }
 0xd43   :  { %6881 = vpow2.f32 %v5782_v27  ;;  %v5783_v7 = vmul.f32 -1.442695, %v4365_v23  ;;  %v6744_v27 = vld [vmem:[#allocation14 + $0x8] ss:$12 sps:$4 sm:$0xff]   ;;  %v2936_v15 = vadd.f32 %v7785_v61, %v7804_v43 }
 0xd44   :  { %v4322_v30 = vpop.f32.mrf.mxu0  ;;  %v6358_v54 = vpop.f32.mrf.mxu1 }
 0xd45   :  { %6883 = vpow2.f32 %v5783_v7 }
 0xd50   :  { %v6882_v1 = vpop.eup %6881 }
 0xd51   :  { %v4372_v17 = vadd.f32 1.0, %v6882_v1 }
 0xd52   :  { %v6884_v56 = vpop.eup %6883 }
 0xd53   :  { %6885 = vrcp.f32 %v4372_v17  ;;  %v4373_v16 = vadd.f32 1.0, %v6884_v56 }
 0xd60   :  { %v6886_v42 = vpop.eup %6885 }
 0xd61   :  { %v4379_v4 = vmul.f32 %v6886_v42, %v4378_v20  ;;  %v2938_v42 = vadd.f32 %v7789_v36, %v7817_v5 }
 0xd63   :  { %v4380_v59 = vadd.f32 %v4379_v4, %v3001_v9 }
 0xd65   :  { %6887 = vtanh.f32 %v4380_v59 }
 0xd66   :  { %6889 = vrcp.f32 %v4373_v16 }
 0xd72   :  { %v6888_v35 = vpop.eup %6887 }
 0xd73   :  { %v4382_v6 = vsub.f32 %v7981_v22, %v6888_v35  ;;  %v6890_v41 = vpop.eup %6889 }
 0xd75   :  { %v4383_v32 = vmul.f32 %v6890_v41, %v4382_v6  ;;  %v3004_v41 = vadd.f32 %v7812_v37, %v7828_v8  ;;  %v6746_v37 = vld [vmem:[#allocation14 + $0x98] ss:$12 sps:$4 sm:$0xff]  }
 0xd77   :  { %v8020_v2 = vadd.f32 %v6888_v35, %v4383_v32 }
 0xd79   :  { %v4390_v49 = vpack.c.bf16 %v8020_v2, %v8020_v2 }
 0xd7b   :  { %4584 = vmatmul.mubr.bf16.vlgmr.msra.gmra.mxu0 %v4390_v49  ;;  %6376 = vmatmul.mubr.bf16.vlgmr.msra.gmra.mxu1 %v4390_v49 }
 0xd7c   :  { %4820 = vmatpush1.bf16.msra.mxu0 %v7918_v14  ;;  %4851 = vmatprep.mubr.bf16.mxu0 %v7144_v0 }
 0xd7d   :  { %4821 = vmatprep.subr.bf16.mxu0 %v7922_v3  ;;  %6395 = vmatprep.mubr.msk.bf16.mxu1 %vm7146_vm0, %v7145_v50 }
 0xd7e   :  { %6380 = vmatpush3.bf16.msra.mxu1 %v6737_v47 }
 0xd7f   :  { %6381 = vmatprep.subr.bf16.mxu1 %v7145_v50 }
 0xd80   :  { %4822 = vmatpush1.bf16.msra.mxu0 %v7925_v28 }
 0xd81   :  { %4823 = vmatprep.subr.bf16.mxu0 %v7929_v18 }
 0xd82   :  { %6382 = vmatpush3.bf16.msra.mxu1 %v6738_v26 }
 0xd83   :  { %6383 = vmatprep.subr.bf16.mxu1 %v7145_v50 }
 0xd84   :  { %4824 = vmatpush1.bf16.msra.mxu0 %v7932_v19 }
 0xd85   :  { %4825 = vmatprep.subr.bf16.mxu0 %v7938_v34 }
 0xd86   :  { %6384 = vmatpush3.bf16.msra.mxu1 %v6739_v60 }
 0xd87   :  { %6385 = vmatprep.subr.bf16.mxu1 %v7145_v50 }
 0xd88   :  { %4826 = vmatpush1.bf16.msra.mxu0 %v7936_v33 }
 0xd89   :  { %4827 = vmatprep.subr.bf16.mxu0 %v7941_v55 }
 0xd8a   :  { %6386 = vmatpush3.bf16.msra.mxu1 %v6740_v25 }
 0xd8b   :  { %6387 = vmatprep.subr.bf16.mxu1 %v7145_v50 }
 0xd8c   :  { %4828 = vmatpush1.bf16.msra.mxu0 %v7945_v39 }
 0xd8d   :  { %4829 = vmatprep.subr.bf16.mxu0 %v7949_v58 }
 0xd8e   :  { %6388 = vmatpush3.bf16.msra.mxu1 %v6741_v52 }
 0xd8f   :  { %6389 = vmatprep.subr.bf16.mxu1 %v7145_v50 }
 0xd90   :  { %4830 = vmatpush1.bf16.msra.mxu0 %v7952_v45 }
 0xd91   :  { %4831 = vmatprep.subr.bf16.mxu0 %v7956_v53 }
 0xd92   :  { %6390 = vmatpush3.bf16.msra.mxu1 %v6742_v57 }
 0xd93   :  { %6391 = vmatprep.subr.bf16.mxu1 %v7145_v50 }
 0xd94   :  { %4832 = vmatpush1.bf16.msra.mxu0 %v7959_v12 }
 0xd95   :  { %4833 = vmatprep.subr.bf16.mxu0 %v7963_v29 }
 0xd98   :  { %4834 = vmatpush1.bf16.msra.mxu0 %v7966_v13 }
 0xd99   :  { %5087 = vmatprep.subr.bf16.mxu0 %v7916_v44  ;;  %v6743_v44 = vld [vmem:[#allocation14 + $0x20] ss:$12 sps:$4 sm:$0xff]  }
 0xd9a   :  { %6392 = vmatpush3.bf16.msra.mxu1 %v6743_v44 }
 0xd9b   :  { %6393 = vmatprep.subr.bf16.mxu1 %v7145_v50 }
 0xd9e   :  { %6394 = vmatpush3.bf16.msra.mxu1 %v6744_v27 }
 0xd9f   :  { %6399 = vmatprep.subr.bf16.mxu1 %v7145_v50 }
 0xe3b   :  { %v4585_v46 = vpop.f32.mrf.mxu0  ;;  %v4626_v30 = vpop.f32.mrf.mxu1 }
 0xe3c   :  { %v4632_v54 = vadd.f32 %v4585_v46, %v2936_v15  ;;  %v4646_v35 = vadd.f32 %v7823_v10, %v4626_v30  ;;  %v2944_v46 = vadd.f32 %v7798_v63, %v7817_v5 }
 0xe3d   :  { %v4587_v40 = vpop.f32.mrf.mxu0  ;;  %v6377_v23 = vpop.f32.mrf.mxu1 }
 0xe3e   :  { %v5808_v7 = vmul.f32 -1.442695, %v4632_v54  ;;  %v4633_v9 = vadd.f32 %v4587_v40, %v2938_v42 }
 0xe3f   :  { %v4589_v1 = vpop.f32.mrf.mxu0  ;;  %v4629_v17 = vpop.f32.mrf.mxu1 }
 0xe40   :  { %6891 = vpow2.f32 %v5808_v7  ;;  %v5809_v4 = vmul.f32 -1.442695, %v4633_v9  ;;  %v3009_v1 = vadd.f32 %v7796_v24, %v7828_v8  ;;  %v6755_v24 = vld [vmem:[#allocation16 + $0x28] sm:$0xff]  }
 0xe41   :  { %v4590_v56 = vpop.f32.mrf.mxu0  ;;  %v6378_v20 = vpop.f32.mrf.mxu1 }
 0xe42   :  { %6893 = vpow2.f32 %v5809_v4 }
 0xe4d   :  { %v6892_v59 = vpop.eup %6891 }
 0xe4e   :  { %v4640_v16 = vadd.f32 1.0, %v6892_v59 }
 0xe4f   :  { %v6894_v61 = vpop.eup %6893 }
 0xe50   :  { %6895 = vrcp.f32 %v4640_v16  ;;  %v4641_v47 = vadd.f32 1.0, %v6894_v61  ;;  %v5201_v61 = vpack.c.bf16 %v7871_v11, %v7832_v48  ;;  %v6760_v48 = vld [vmem:[#allocation16] sm:$0xff]   ;;  %v5202_v11 = vpack.c.bf16 %v7981_v22, %v7909_v51 }
 0xe51   :  { %v2948_v51 = vadd.f32 %v7810_v38, %v7817_v5  ;;  %v3012_v5 = vadd.f32 %v7808_v21, %v7828_v8 }
 0xe5d   :  { %v6896_v6 = vpop.eup %6895 }
 0xe5e   :  { %v4647_v32 = vmul.f32 %v6896_v6, %v4646_v35  ;;  %v6756_v35 = vld [vmem:[#allocation16 + $0x20] sm:$0xff]   ;;  %v6757_v6 = vld [vmem:[#allocation16 + $0x18] sm:$0xff]  }
 0xe60   :  { %v4648_v49 = vadd.f32 %v4647_v32, %v3004_v41  ;;  %v6758_v41 = vld [vmem:[#allocation16 + $0x10] sm:$0xff]   ;;  %v6759_v32 = vld [vmem:[#allocation16 + $0x8] sm:$0xff]  }
 0xe62   :  { %6897 = vtanh.f32 %v4648_v49 }
 0xe63   :  { %6899 = vrcp.f32 %v4641_v47  ;;  %v2946_v47 = vadd.f32 %v7806_v62, %v7804_v43 }
 0xe6f   :  { %v6898_v26 = vpop.eup %6897 }
 0xe70   :  { %v4650_v36 = vsub.f32 %v8020_v2, %v6898_v26  ;;  %v6900_v60 = vpop.eup %6899 }
 0xe72   :  { %v4651_v25 = vmul.f32 %v6900_v60, %v4650_v36 }
 0xe74   :  { %v8059_v52 = vadd.f32 %v6898_v26, %v4651_v25 }
 0xe76   :  { %v4658_v57 = vpack.c.bf16 %v8059_v52, %v8059_v52  ;;  %v5203_v49 = vpack.c.bf16 %v8059_v52, %v8020_v2 }
 0xe78   :  { %4852 = vmatmul.mubr.bf16.vlgmr.msra.gmra.mxu0 %v4658_v57  ;;  %6396 = vmatmul.mubr.bf16.vlgmr.msra.gmra.mxu1 %v4658_v57 }
 0xe79   :  { %5088 = vmatpush1.bf16.msra.mxu0 %v7918_v14  ;;  %5119 = vmatprep.mubr.bf16.mxu0 %v7144_v0  ;;  %v6745_v0 = vld [vmem:[#allocation14 + $0xb0] ss:$12 sps:$4 sm:$0xff]   ;;  %v6747_v14 = vld [vmem:[#allocation14 + $0x80] ss:$12 sps:$4 sm:$0xff]  }
 0xe7a   :  { %5089 = vmatprep.subr.bf16.mxu0 %v7922_v3  ;;  %6415 = vmatprep.mubr.msk.bf16.mxu1 %vm7146_vm0, %v7145_v50  ;;  %v6748_v3 = vld [vmem:[#allocation14 + $0x68] ss:$12 sps:$4 sm:$0xff]  }
 0xe7b   :  { %6400 = vmatpush3.bf16.msra.mxu1 %v6745_v0 }
 0xe7c   :  { %6401 = vmatprep.subr.bf16.mxu1 %v7145_v50 }
 0xe7d   :  { %5090 = vmatpush1.bf16.msra.mxu0 %v7925_v28  ;;  %v6753_v28 = vld [vmem:[#allocation16 + $0x38] sm:$0xff]  }
 0xe7e   :  { %5091 = vmatprep.subr.bf16.mxu0 %v7929_v18  ;;  %v6749_v18 = vld [vmem:[#allocation14 + $0x50] ss:$12 sps:$4 sm:$0xff]  }
 0xe7f   :  { %6402 = vmatpush3.bf16.msra.mxu1 %v6746_v37 }
 0xe80   :  { %6403 = vmatprep.subr.bf16.mxu1 %v7145_v50 }
 0xe81   :  { %5092 = vmatpush1.bf16.msra.mxu0 %v7932_v19  ;;  %v6750_v19 = vld [vmem:[#allocation14 + $0x38] ss:$12 sps:$4 sm:$0xff]  }
 0xe82   :  { %5093 = vmatprep.subr.bf16.mxu0 %v7938_v34  ;;  %v6752_v34 = vld [vmem:[#allocation14 + $0x8] ss:$12 sps:$4 sm:$0xff]  }
 0xe83   :  { %6404 = vmatpush3.bf16.msra.mxu1 %v6747_v14 }
 0xe84   :  { %6405 = vmatprep.subr.bf16.mxu1 %v7145_v50 }
 0xe85   :  { %5094 = vmatpush1.bf16.msra.mxu0 %v7936_v33  ;;  %v6751_v33 = vld [vmem:[#allocation14 + $0x20] ss:$12 sps:$4 sm:$0xff]  }
 0xe86   :  { %5095 = vmatprep.subr.bf16.mxu0 %v7941_v55  ;;  %v2942_v55 = vadd.f32 %v7794_v31, %v7804_v43  ;;  %v5862_v43 = vld [vmem:[%s8143_s11] ss:$0 sm:$0xff] }
 0xe87   :  { %6406 = vmatpush3.bf16.msra.mxu1 %v6748_v3 }
 0xe88   :  { %6407 = vmatprep.subr.bf16.mxu1 %v7145_v50 }
 0xe89   :  { %5096 = vmatpush1.bf16.msra.mxu0 %v7945_v39 }
 0xe8a   :  { %5097 = vmatprep.subr.bf16.mxu0 %v7949_v58 }
 0xe8b   :  { %6408 = vmatpush3.bf16.msra.mxu1 %v6749_v18 }
 0xe8c   :  { %6409 = vmatprep.subr.bf16.mxu1 %v7145_v50 }
 0xe8d   :  { %5098 = vmatpush1.bf16.msra.mxu0 %v7952_v45 }
 0xe8e   :  { %5099 = vmatprep.subr.bf16.mxu0 %v7956_v53 }
 0xe8f   :  { %6410 = vmatpush3.bf16.msra.mxu1 %v6750_v19 }
 0xe90   :  { %6411 = vmatprep.subr.bf16.mxu1 %v7145_v50 }
 0xe91   :  { %5100 = vmatpush1.bf16.msra.mxu0 %v7959_v12 }
 0xe92   :  { %5101 = vmatprep.subr.bf16.mxu0 %v7963_v29 }
 0xe93   :  { %6412 = vmatpush3.bf16.msra.mxu1 %v6751_v33  ;;  %v6938_v33 = vld [vmem:[%s8141_s9] ss:$0 sm:$0xff]  ;;  %s7147_s9 = smov [#allocation18]  }
 0xe94   :  { %6413 = vmatprep.subr.bf16.mxu1 %v7145_v50  ;;  %s5366_s11 = sshll.u32 %s7147_s9, 4  ;;  %s5367_s11 = int_to_ptr.vmem [resolvable:$true] %s5366_s11 }
 0xe95   :  { %5102 = vmatpush1.bf16.msra.mxu0 %v7966_v13  ;;  %s7079_s22 = scalar_lea.vmem %s5367_s11, 256  ;;  %p7084_p8 = scmp.lt.s32.totalorder %s5367_s11, %s5367_s11 }
 0xe96   :  { %6419 = vmatprep.subr.bf16.mxu0 %v6753_v28  ;;  %p7080_p7 = scmp.ne.s32.totalorder %s5367_s11, %s7079_s22  ;;  %p7085_p9 = scmp.lt.s32.totalorder %s7079_s22, %s7079_s22 }
 0xe97   :  { %6414 = vmatpush3.bf16.msra.mxu1 %v6752_v34 }
 0xe98   :  { %p7086_p10 = por %p7085_p9, %p7084_p8 }
 0xe9a   :  { %p7087_p11 = pnand %p7086_p10, %p7080_p7 }
 0xf38   :  { %v4853_v39 = vpop.f32.mrf.mxu0  ;;  %v4894_v58 = vpop.f32.mrf.mxu1 }
 0xf39   :  { %v4900_v45 = vadd.f32 %v4853_v39, %v2942_v55  ;;  %v4914_v23 = vadd.f32 %v7823_v10, %v4894_v58  ;;  %v6754_v10 = vld [vmem:[#allocation16 + $0x30] sm:$0xff]  }
 0xf3a   :  { %v4855_v53 = vpop.f32.mrf.mxu0  ;;  %v6397_v12 = vpop.f32.mrf.mxu1 }
 0xf3b   :  { %v5834_v29 = vmul.f32 -1.442695, %v4900_v45  ;;  %v4901_v30 = vadd.f32 %v4855_v53, %v2944_v46 }
 0xf3c   :  { %v4857_v13 = vpop.f32.mrf.mxu0  ;;  %v4897_v44 = vpop.f32.mrf.mxu1 }
 0xf3d   :  { %6901 = vpow2.f32 %v5834_v29  ;;  %v5835_v50 = vmul.f32 -1.442695, %v4901_v30 }
 0xf3e   :  { %v4858_v27 = vpop.f32.mrf.mxu0  ;;  %v6398_v15 = vpop.f32.mrf.mxu1 }
 0xf3f   :  { %6903 = vpow2.f32 %v5835_v50 }
 0xf4a   :  { %v6902_v54 = vpop.eup %6901 }
 0xf4b   :  { %v4908_v40 = vadd.f32 1.0, %v6902_v54 }
 0xf4c   :  { %v6904_v31 = vpop.eup %6903 }
 0xf4d   :  { %6905 = vrcp.f32 %v4908_v40  ;;  %v4909_v20 = vadd.f32 1.0, %v6904_v31 }
 0xf5a   :  { %v6906_v7 = vpop.eup %6905 }
 0xf5b   :  { %v4915_v17 = vmul.f32 %v6906_v7, %v4914_v23 }
 0xf5d   :  { %v4916_v56 = vadd.f32 %v4915_v17, %v3009_v1 }
 0xf5f   :  { %6907 = vtanh.f32 %v4916_v56 }
 0xf60   :  { %6909 = vrcp.f32 %v4909_v20 }
 0xf6c   :  { %v6908_v42 = vpop.eup %6907 }
 0xf6d   :  { %v4918_v63 = vsub.f32 %v8059_v52, %v6908_v42  ;;  %v6910_v9 = vpop.eup %6909 }
 0xf6f   :  { %v4919_v4 = vmul.f32 %v6910_v9, %v4918_v63 }
 0xf71   :  { %v8096_v59 = vadd.f32 %v6908_v42, %v4919_v4 }
 0xf73   :  { %v4926_v16 = vpack.c.bf16 %v8096_v59, %v8096_v59 }
 0xf75   :  { %5120 = vmatmul.mubr.bf16.vlgmr.msra.gmra.mxu0 %v4926_v16  ;;  %6416 = vmatmul.mubr.bf16.vlgmr.msra.gmra.mxu1 %v4926_v16 }
 0xf76   :  { %6420 = vmatpush3.bf16.msra.mxu0 %v6753_v28  ;;  %6435 = vmatprep.mubr.bf16.mxu0 %v5201_v61 }
 0xf77   :  { %6421 = vmatprep.subr.bf16.mxu0 %v6754_v10 }
 0xf7a   :  { %6422 = vmatpush3.bf16.msra.mxu0 %v6754_v10 }
 0xf7b   :  { %6423 = vmatprep.subr.bf16.mxu0 %v6755_v24 }
 0xf7e   :  { %6424 = vmatpush3.bf16.msra.mxu0 %v6755_v24 }
 0xf7f   :  { %6425 = vmatprep.subr.bf16.mxu0 %v6756_v35 }
 0xf82   :  { %6426 = vmatpush3.bf16.msra.mxu0 %v6756_v35 }
 0xf83   :  { %6427 = vmatprep.subr.bf16.mxu0 %v6757_v6 }
 0xf86   :  { %6428 = vmatpush3.bf16.msra.mxu0 %v6757_v6 }
 0xf87   :  { %6429 = vmatprep.subr.bf16.mxu0 %v6758_v41 }
 0xf8a   :  { %6430 = vmatpush3.bf16.msra.mxu0 %v6758_v41 }
 0xf8b   :  { %6431 = vmatprep.subr.bf16.mxu0 %v6759_v32 }
 0xf8e   :  { %6432 = vmatpush3.bf16.msra.mxu0 %v6759_v32 }
 0xf8f   :  { %6433 = vmatprep.subr.bf16.mxu0 %v6760_v48 }
 0xf92   :  { %6434 = vmatpush3.bf16.msra.mxu0 %v6760_v48 }
 0xf95   :  { %6436 = vmatmul.mubr.bf16.vlgmr.msra.gmra.mxu0 %v5202_v11 }
 0xf96   :  { %6439 = vmatprep.mubr.bf16.mxu0 %v5203_v49 }
0x1035   :  { %v5121_v26 = vpop.f32.mrf.mxu0  ;;  %v5162_v36 = vpop.f32.mrf.mxu1 }
0x1036   :  { %v5168_v60 = vadd.f32 %v5121_v26, %v2946_v47  ;;  %v5182_v34 = vadd.f32 %v6938_v33, %v5162_v36 }
0x1037   :  { %v5123_v25 = vpop.f32.mrf.mxu0  ;;  %v6417_v57 = vpop.f32.mrf.mxu1 }
0x1038   :  { %v5860_v0 = vmul.f32 -1.442695, %v5168_v60  ;;  %v5169_v22 = vadd.f32 %v5123_v25, %v2948_v51 }
0x1039   :  { %v5125_v37 = vpop.f32.mrf.mxu0  ;;  %v5165_v14 = vpop.f32.mrf.mxu1 }
0x103a   :  { %6911 = vpow2.f32 %v5860_v0  ;;  %v5861_v2 = vmul.f32 -1.442695, %v5169_v22 }
0x103b   :  { %v5126_v3 = vpop.f32.mrf.mxu0  ;;  %v6418_v28 = vpop.f32.mrf.mxu1 }
0x103c   :  { %6913 = vpow2.f32 %v5861_v2 }
0x1047   :  { %v6912_v52 = vpop.eup %6911 }
0x1048   :  { %v5176_v18 = vadd.f32 1.0, %v6912_v52 }
0x1049   :  { %v6914_v19 = vpop.eup %6913 }
0x104a   :  { %6915 = vrcp.f32 %v5176_v18  ;;  %v5177_v29 = vadd.f32 1.0, %v6914_v19 }
0x1055   :  { %v6437_v62 = vpop.f32.mrf.mxu0 }
0x1056   :  { %v5319_v55 = vadd.f32 %v6437_v62, %v5862_v43 }
0x1057   :  { %v6916_v39 = vpop.eup %6915  ;;  %v5310_v38 = vpop.f32.mrf.mxu0 }
0x1058   :  { %v5183_v58 = vmul.f32 %v6916_v39, %v5182_v34  ;;  %5343 = vst [vmem:[#allocation17 + $0x10] sm:$0xff] %v5319_v55  ;;  %v5311_v45 = vadd.f32 %v5862_v43, %v5310_v38 }
0x1059   :  { %v6438_v53 = vpop.f32.mrf.mxu0 }
0x105a   :  { %v5184_v12 = vadd.f32 %v5183_v58, %v3012_v5  ;;  %5341 = vst [vmem:[#allocation17] sm:$0xff] %v5311_v45  ;;  %v5322_v13 = vadd.f32 %v6438_v53, %v5862_v43 }
0x105b   :  { %v5313_v44 = vpop.f32.mrf.mxu0 }
0x105c   :  { %6917 = vtanh.f32 %v5184_v12  ;;  %5344 = vst [vmem:[#allocation17 + $0x18] sm:$0xff] %v5322_v13  ;;  %v5314_v27 = vadd.f32 %v5862_v43, %v5313_v44 }
0x105d   :  { %6919 = vrcp.f32 %v5177_v29 }
0x105e   :  { %5342 = vst [vmem:[#allocation17 + $0x8] sm:$0xff] %v5314_v27 }
0x1069   :  { %v6918_v15 = vpop.eup %6917 }
0x106a   :  { %v5186_v46 = vsub.f32 %v8096_v59, %v6918_v15  ;;  %v6920_v30 = vpop.eup %6919 }
0x106c   :  { %v5187_v50 = vmul.f32 %v6920_v30, %v5186_v46 }
0x106e   :  { %v5188_v21 = vadd.f32 %v6918_v15, %v5187_v50 }
0x1070   :  { %v5204_v8 = vpack.c.bf16 %v5188_v21, %v8096_v59  ;;  %5192 = vst [vmem:[#allocation18 + $0x8] sm:$0xff] %v5188_v21 }
0x1072   :  { %6440 = vmatmul.mubr.bf16.gmra.mxu0 %v5204_v8 }
0x1073   :  { %7090 = shalt.err (!%p7087_p11)
}
0x1074   :  { %5372 = dma.vmem_to_hbm [thread:$0]  %s5367_s11, 256, %s8145_s13, [#allocation19], %s7132_s28, %s7132_s28, %s7133_s29  }
0x1075   :  { %s7148_s0 = smov [#allocation17]  }
0x1076   :  { %s5354_s24 = sshll.u32 %s7148_s0, 4  ;;  %s5355_s24 = int_to_ptr.vmem [resolvable:$true] %s5354_s24 }
0x1077   :  { %s7099_s25 = scalar_lea.vmem %s5355_s24, 1024  ;;  %p7104_p13 = scmp.lt.s32.totalorder %s5355_s24, %s5355_s24 }
0x1078   :  { %p7100_p12 = scmp.ne.s32.totalorder %s5355_s24, %s7099_s25  ;;  %p7105_p0 = scmp.lt.s32.totalorder %s7099_s25, %s7099_s25 }
0x107a   :  { %p7106_p1 = por %p7105_p0, %p7104_p13 }
0x107c   :  { %p7107_p2 = pnand %p7106_p1, %p7100_p12 }
0x1132   :  { %v6441_v54 = vpop.f32.mrf.mxu0 }
0x1133   :  { %v5335_v40 = vadd.f32 %v6441_v54, %v5862_v43 }
0x1134   :  { %v5326_v31 = vpop.f32.mrf.mxu0 }
0x1135   :  { %5347 = vst [vmem:[#allocation17 + $0x30] sm:$0xff] %v5335_v40  ;;  %v5327_v23 = vadd.f32 %v5862_v43, %v5326_v31 }
0x1136   :  { %v6442_v7 = vpop.f32.mrf.mxu0 }
0x1137   :  { %5345 = vst [vmem:[#allocation17 + $0x20] sm:$0xff] %v5327_v23  ;;  %v5338_v1 = vadd.f32 %v6442_v7, %v5862_v43 }
0x1138   :  { %v5329_v17 = vpop.f32.mrf.mxu0 }
0x1139   :  { %5348 = vst [vmem:[#allocation17 + $0x38] sm:$0xff] %v5338_v1  ;;  %v5330_v56 = vadd.f32 %v5862_v43, %v5329_v17 }
0x113b   :  { %5346 = vst [vmem:[#allocation17 + $0x28] sm:$0xff] %v5330_v56 }
0x113c   :  { %7110 = shalt.err (!%p7107_p2)
}
0x113d   :  { %5360 = dma.vmem_to_hbm [thread:$0]  %s5355_s24, 1024, %s8144_s12, [#allocation7], %s7132_s28, %s7132_s28, %s7133_s29  }
0x113e   :  { %7127 = dma.done.wait [#allocation7], 1024  }
0x113f   :  { %7128 = vsyncadd [#allocation7], 4294966272 }
0x1140   :  { %7129 = dma.done.wait [#allocation19], 256  }
0x1141   :  { %7130 = vsyncadd [#allocation19], 4294967040 }
0x1142   :  { %5379 = vsyncpa [#allocation6], 1 }
0x1143   :  { %5380 = vsyncpa [#allocation9], 1 }
0x1144   :  { %5381 = vsyncpa [#allocation12], 1 }
0x1145   :  { %5382 = vsyncpa [#allocation15], 1 }
0x1146   :  { %5383 = vsyncpa [#allocation7], 1 }
0x1147   :  { %5384 = vsyncpa [#allocation19], 1 }

</bundles_post_ra>
